<compile_context>
chip_gen: v7x
topology: tpu7x:2x2x1
jax: 0.10.0
libtpu: 0.0.40
codegen_flags: <defaults>
</compile_context>

<pallas_src>
import functools
import math

import jax
import jax.numpy as jnp
from jax.experimental import pallas as pl
from jax.experimental.pallas import tpu as pltpu


# ---------------------------------------------------------------- constants

def _vmem_capacity():
    try:
        info = pltpu.get_tpu_info()
        return int(getattr(info, "vmem_capacity_bytes", 64 * 1024 * 1024))
    except Exception:          # conservative default if query unavailable
        return 64 * 1024 * 1024


_VMEM_CAP = _vmem_capacity()
_BIG_VMEM = _VMEM_CAP >= 96 * 1024 * 1024          # v5e / v6e (128 MiB)
TM_DEFAULT = 1024 if _BIG_VMEM else 512             # row tile, dout < 2048
TM_WIDE = 512 if _BIG_VMEM else 256                 # row tile, dout >= 2048
VMEM_LIMIT = min(int(_VMEM_CAP * 0.6), 80 * 1024 * 1024)
WEIGHT_RESIDENT_BYTES = VMEM_LIMIT // 4             # double-buffered weight <= half limit
ATTN_TQ_CANDIDATES = (512, 256, 128) if _BIG_VMEM else (256, 128)


def _round_up(x, m):
    return ((x + m - 1) // m) * m


def _pad_rows(a, n_to, value=0):
    n = a.shape[0]
    if n_to == n:
        return a
    return jnp.pad(a, ((0, n_to - n), (0, 0)), constant_values=value)


def _tiling(n, kdim, dout, w_nbytes):
    """Row tiling (padded) + K tiling / weight-residency decision."""
    target = TM_WIDE if dout >= 2048 else TM_DEFAULT
    nt = max(1, -(-n // target))
    tm = _round_up(-(-n // nt), 8)
    npad = tm * nt
    if w_nbytes <= WEIGHT_RESIDENT_BYTES:
        return tm, npad, nt, kdim, 1, True
    tk = next((c for c in (2048, 1024, 512, 256, 128) if kdim % c == 0), kdim)
    nk = kdim // tk
    if nk == 1:
        # TODO(synk): weight larger than residency budget with no clean K
        # divisor; falls back to one resident buffer.
        return tm, npad, nt, kdim, 1, True
    return tm, npad, nt, tk, nk, False


# ------------------------------------------------------------------ kernels


def _linear_resident_kernel(x_ref, w_ref, b_ref, o_ref, *, activation):
    """o = act(x @ w + b); full-K weight resident in VMEM, grid = (M_tiles,)."""
    h = jnp.dot(x_ref[...], w_ref[...],
                preferred_element_type=jnp.float32) + b_ref[...]
    if activation == "gelu":
        # TODO(synk): PyTorch nn.GELU defaults to exact erf; tanh approx here.
        h = jax.nn.gelu(h, approximate=True)
    elif activation == "tanh":
        h = jnp.tanh(h)
    o_ref[...] = h.astype(o_ref.dtype)


def _linear_kernel(x_ref, w_ref, b_ref, o_ref, acc_ref, *, activation):
    """K-tiled fallback: grid = (M_tiles, K_tiles), f32 accumulator."""
    k = pl.program_id(1)

    @pl.when(k == 0)
    def _():
        acc_ref[...] = jnp.zeros_like(acc_ref)

    acc_ref[...] += jnp.dot(x_ref[...], w_ref[...],
                            preferred_element_type=jnp.float32)

    @pl.when(k == pl.num_programs(1) - 1)
    def _():
        h = acc_ref[...] + b_ref[...]
        if activation == "gelu":
            h = jax.nn.gelu(h, approximate=True)
        elif activation == "tanh":
            h = jnp.tanh(h)
        o_ref[...] = h.astype(o_ref.dtype)


def _linear_ln_resident_kernel(x_ref, w_ref, b_ref, r_ref, g_ref, beta_ref,
                               o_ref, *, eps):
    """o = LayerNorm((x @ w + b) + residual) * g + beta, resident weight."""
    x = (jnp.dot(x_ref[...], w_ref[...], preferred_element_type=jnp.float32)
         + b_ref[...] + r_ref[...].astype(jnp.float32))
    mu = jnp.mean(x, axis=-1, keepdims=True)
    var = jnp.mean((x - mu) ** 2, axis=-1, keepdims=True)
    y = (x - mu) * jax.lax.rsqrt(var + eps)
    o_ref[...] = (y * g_ref[...] + beta_ref[...]).astype(o_ref.dtype)


def _linear_ln_kernel(x_ref, w_ref, b_ref, r_ref, g_ref, beta_ref,
                      o_ref, acc_ref, *, eps):
    """K-tiled fallback of the fused matmul + residual + LayerNorm."""
    k = pl.program_id(1)

    @pl.when(k == 0)
    def _():
        acc_ref[...] = jnp.zeros_like(acc_ref)

    acc_ref[...] += jnp.dot(x_ref[...], w_ref[...],
                            preferred_element_type=jnp.float32)

    @pl.when(k == pl.num_programs(1) - 1)
    def _():
        x = acc_ref[...] + b_ref[...] + r_ref[...].astype(jnp.float32)
        mu = jnp.mean(x, axis=-1, keepdims=True)
        var = jnp.mean((x - mu) ** 2, axis=-1, keepdims=True)
        y = (x - mu) * jax.lax.rsqrt(var + eps)
        o_ref[...] = (y * g_ref[...] + beta_ref[...]).astype(o_ref.dtype)


def _add_ln_kernel(x_ref, r_ref, g_ref, b_ref, o_ref, *, eps):
    """o = LayerNorm(x + r) * g + b  (embedding add + embed-LN)."""
    x = x_ref[...].astype(jnp.float32) + r_ref[...].astype(jnp.float32)
    mu = jnp.mean(x, axis=-1, keepdims=True)
    var = jnp.mean((x - mu) ** 2, axis=-1, keepdims=True)
    y = (x - mu) * jax.lax.rsqrt(var + eps)
    o_ref[...] = (y * g_ref[...] + b_ref[...]).astype(o_ref.dtype)


def _mha_kernel(q_ref, k_ref, v_ref, kpm_ref, o_ref, acc_ref, *,
                num_heads, scale, causal):
    """One (batch, q-tile) step.

    q in lane-dense (tq, H*Dh); k/v full (Sk, H*Dh); kpm is a (1, Sk) additive
    key-padding row (causal part built in-kernel).  Per-head results go
    straight into a (tq, D) f32 VMEM scratch slice; single lane-dense store.

    TODO(synk): for very long sequences convert to flash-style online softmax
    with an Sk grid axis instead of materializing the full (tq, Sk) scores.
    """
    q = q_ref[0]            # (tq, D) bf16
    k = k_ref[0]            # (Sk, D) bf16
    v = v_ref[0]            # (Sk, D) bf16
    kpm = kpm_ref[0]        # (1, Sk) f32 additive
    tq, d = q.shape
    sk = k.shape[0]
    dh = d // num_heads

    bias = jnp.broadcast_to(kpm, (tq, sk))              # hoisted out of head loop
    if causal:
        q_pos = (jax.lax.broadcasted_iota(jnp.int32, (tq, sk), 0)
                 + pl.program_id(1) * tq)
        k_pos = jax.lax.broadcasted_iota(jnp.int32, (tq, sk), 1)
        bias = jnp.where(q_pos >= k_pos, bias, jnp.float32(-1e9))

    for h in range(num_heads):
        qh = q[:, h * dh:(h + 1) * dh]
        kh = k[:, h * dh:(h + 1) * dh]
        vh = v[:, h * dh:(h + 1) * dh]
        # contract Dh axes directly: no per-head XLU transpose of K
        s = jax.lax.dot_general(qh, kh, (((1,), (1,)), ((), ())),
                                preferred_element_type=jnp.float32)
        s = s * scale + bias
        s = s - jnp.max(s, axis=-1, keepdims=True)
        p = jnp.exp(s)
        p = p * pl.reciprocal(jnp.sum(p, axis=-1, keepdims=True), approx=True)
        acc_ref[:, h * dh:(h + 1) * dh] = jnp.dot(
            p.astype(vh.dtype), vh, preferred_element_type=jnp.float32)

    o_ref[0] = acc_ref[...].astype(o_ref.dtype)          # single lane-dense store


def _head_loss_kernel(x_ref, w_ref, b_ref, lab_ref, logits_ref, loss_ref,
                      sum_ref, cnt_ref, *, num_labels, ignore_index,
                      label_smoothing):
    """Fused classification out_proj + CrossEntropy(mean, ignore_index,
    label_smoothing) on lane-padded logits; (sum,count) accumulate in VMEM."""
    i = pl.program_id(0)

    @pl.when(i == 0)
    def _():
        sum_ref[...] = jnp.zeros_like(sum_ref)
        cnt_ref[...] = jnp.zeros_like(cnt_ref)

    logits = (jnp.dot(x_ref[...], w_ref[...],
                      preferred_element_type=jnp.float32) + b_ref[...])
    logits_ref[...] = logits.astype(logits_ref.dtype)

    labels = lab_ref[...]                                # (tn, 1) int32
    tn, kpad = logits.shape
    lane = jax.lax.broadcasted_iota(jnp.int32, (tn, kpad), 1)
    valid_lane = lane < num_labels
    z = jnp.where(valid_lane, logits, jnp.float32(-1e30))
    m = jnp.max(z, axis=-1, keepdims=True)
    zz = z - m
    lse = jnp.log(jnp.sum(jnp.where(valid_lane, jnp.exp(zz), 0.0),
                          axis=-1, keepdims=True))
    logp = zz - lse

    onehot = (lane == labels).astype(jnp.float32)
    nll = -jnp.sum(jnp.where(valid_lane, logp * onehot, 0.0),
                   axis=-1, keepdims=True)                        # (tn, 1)
    smooth = -jnp.sum(jnp.where(valid_lane, logp, 0.0),
                      axis=-1, keepdims=True) / num_labels        # (tn, 1)
    per = (1.0 - label_smoothing) * nll + label_smoothing * smooth

    valid_row = (labels != ignore_index).astype(jnp.float32)      # (tn, 1)
    sum_ref[...] += jnp.broadcast_to(jnp.sum(per * valid_row), (1, 1))
    cnt_ref[...] += jnp.broadcast_to(jnp.sum(valid_row), (1, 1))

    @pl.when(i == pl.num_programs(0) - 1)
    def _():
        # TODO(synk): PyTorch returns NaN when no valid targets; we return 0.
        loss_ref[...] = (sum_ref[...] /
                         jnp.maximum(cnt_ref[...], 1.0)).astype(loss_ref.dtype)


# ------------------------------------------------------------- kernel wrappers


def linear(x2d, w, b, activation=None, out_dtype=jnp.bfloat16):
    n, kdim = x2d.shape
    dout = w.shape[1]
    tm, npad, nt, tk, nk, resident = _tiling(n, kdim, dout, kdim * dout * 2)
    xp = _pad_rows(x2d.astype(jnp.bfloat16), npad)
    wb = w.astype(jnp.bfloat16)
    bias = b.reshape(1, dout).astype(jnp.float32)

    if resident:
        out = pl.pallas_call(
            functools.partial(_linear_resident_kernel, activation=activation),
            out_shape=jax.ShapeDtypeStruct((npad, dout), out_dtype),
            grid=(nt,),
            in_specs=[
                pl.BlockSpec((tm, kdim), lambda i: (i, 0)),
                pl.BlockSpec((kdim, dout), lambda i: (0, 0)),   # resident weight
                pl.BlockSpec((1, dout), lambda i: (0, 0)),
            ],
            out_specs=pl.BlockSpec((tm, dout), lambda i: (i, 0)),
            compiler_params=pltpu.CompilerParams(
                dimension_semantics=("parallel",),
                vmem_limit_bytes=VMEM_LIMIT),
        )(xp, wb, bias)
    else:
        out = pl.pallas_call(
            functools.partial(_linear_kernel, activation=activation),
            out_shape=jax.ShapeDtypeStruct((npad, dout), out_dtype),
            grid_spec=pltpu.PrefetchScalarGridSpec(
                num_scalar_prefetch=0,
                grid=(nt, nk),
                in_specs=[
                    pl.BlockSpec((tm, tk), lambda i, kk: (i, kk)),
                    pl.BlockSpec((tk, dout), lambda i, kk: (kk, 0)),
                    pl.BlockSpec((1, dout), lambda i, kk: (0, 0)),
                ],
                out_specs=pl.BlockSpec((tm, dout), lambda i, kk: (i, 0)),
                scratch_shapes=[pltpu.VMEM((tm, dout), jnp.float32)],
            ),
            compiler_params=pltpu.CompilerParams(
                dimension_semantics=("parallel", "arbitrary"),
                vmem_limit_bytes=VMEM_LIMIT),
        )(xp, wb, bias)
    return out if npad == n else out[:n]


def linear_ln(x2d, w, b, residual2d, g, beta, eps=1e-5, out_dtype=jnp.bfloat16):
    n, kdim = x2d.shape
    dout = w.shape[1]
    tm, npad, nt, tk, nk, resident = _tiling(n, kdim, dout, kdim * dout * 2)
    xp = _pad_rows(x2d.astype(jnp.bfloat16), npad)
    rp = _pad_rows(residual2d.astype(jnp.bfloat16), npad)
    wb = w.astype(jnp.bfloat16)
    bias = b.reshape(1, dout).astype(jnp.float32)
    gg = g.reshape(1, dout).astype(jnp.float32)
    bb = beta.reshape(1, dout).astype(jnp.float32)

    if resident:
        out = pl.pallas_call(
            functools.partial(_linear_ln_resident_kernel, eps=eps),
            out_shape=jax.ShapeDtypeStruct((npad, dout), out_dtype),
            grid=(nt,),
            in_specs=[
                pl.BlockSpec((tm, kdim), lambda i: (i, 0)),
                pl.BlockSpec((kdim, dout), lambda i: (0, 0)),   # resident weight
                pl.BlockSpec((1, dout), lambda i: (0, 0)),
                pl.BlockSpec((tm, dout), lambda i: (i, 0)),
                pl.BlockSpec((1, dout), lambda i: (0, 0)),
                pl.BlockSpec((1, dout), lambda i: (0, 0)),
            ],
            out_specs=pl.BlockSpec((tm, dout), lambda i: (i, 0)),
            compiler_params=pltpu.CompilerParams(
                dimension_semantics=("parallel",),
                vmem_limit_bytes=VMEM_LIMIT),
        )(xp, wb, bias, rp, gg, bb)
    else:
        out = pl.pallas_call(
            functools.partial(_linear_ln_kernel, eps=eps),
            out_shape=jax.ShapeDtypeStruct((npad, dout), out_dtype),
            grid_spec=pltpu.PrefetchScalarGridSpec(
                num_scalar_prefetch=0,
                grid=(nt, nk),
                in_specs=[
                    pl.BlockSpec((tm, tk), lambda i, kk: (i, kk)),
                    pl.BlockSpec((tk, dout), lambda i, kk: (kk, 0)),
                    pl.BlockSpec((1, dout), lambda i, kk: (0, 0)),
                    pl.BlockSpec((tm, dout), lambda i, kk: (i, 0)),
                    pl.BlockSpec((1, dout), lambda i, kk: (0, 0)),
                    pl.BlockSpec((1, dout), lambda i, kk: (0, 0)),
                ],
                out_specs=pl.BlockSpec((tm, dout), lambda i, kk: (i, 0)),
                scratch_shapes=[pltpu.VMEM((tm, dout), jnp.float32)],
            ),
            compiler_params=pltpu.CompilerParams(
                dimension_semantics=("parallel", "arbitrary"),
                vmem_limit_bytes=VMEM_LIMIT),
        )(xp, wb, bias, rp, gg, bb)
    return out if npad == n else out[:n]


def add_layer_norm(x2d, r2d, g, b, eps=1e-5):
    n, d = x2d.shape
    nt = max(1, -(-n // TM_DEFAULT))
    tm = _round_up(-(-n // nt), 8)
    npad = tm * nt
    xp = _pad_rows(x2d, npad)
    rp = _pad_rows(r2d, npad)
    out = pl.pallas_call(
        functools.partial(_add_ln_kernel, eps=eps),
        out_shape=jax.ShapeDtypeStruct((npad, d), jnp.bfloat16),
        grid=(nt,),
        in_specs=[
            pl.BlockSpec((tm, d), lambda i: (i, 0)),
            pl.BlockSpec((tm, d), lambda i: (i, 0)),
            pl.BlockSpec((1, d), lambda i: (0, 0)),
            pl.BlockSpec((1, d), lambda i: (0, 0)),
        ],
        out_specs=pl.BlockSpec((tm, d), lambda i: (i, 0)),
        compiler_params=pltpu.CompilerParams(
            dimension_semantics=("parallel",),
            vmem_limit_bytes=VMEM_LIMIT),
    )(xp, rp, g.reshape(1, d).astype(jnp.float32),
      b.reshape(1, d).astype(jnp.float32))
    return out if npad == n else out[:n]


def attention_core(q, k, v, key_pad_bias, num_heads, causal):
    """q:(B,Sq,D) k/v:(B,Sk,D) key_pad_bias:(B,1,Sk) additive f32."""
    b, sq, d = q.shape
    sk = k.shape[1]
    dh = d // num_heads
    tq = next((c for c in ATTN_TQ_CANDIDATES if sq % c == 0), sq)
    nq = sq // tq
    kern = functools.partial(_mha_kernel, num_heads=num_heads,
                             scale=1.0 / math.sqrt(dh), causal=causal)
    return pl.pallas_call(
        kern,
        out_shape=jax.ShapeDtypeStruct((b, sq, d), jnp.bfloat16),
        grid=(b, nq),
        in_specs=[
            pl.BlockSpec((1, tq, d), lambda bi, qi: (bi, qi, 0)),
            pl.BlockSpec((1, sk, d), lambda bi, qi: (bi, 0, 0)),
            pl.BlockSpec((1, sk, d), lambda bi, qi: (bi, 0, 0)),
            pl.BlockSpec((1, 1, sk), lambda bi, qi: (bi, 0, 0)),
        ],
        out_specs=pl.BlockSpec((1, tq, d), lambda bi, qi: (bi, qi, 0)),
        scratch_shapes=[pltpu.VMEM((tq, d), jnp.float32)],
        compiler_params=pltpu.CompilerParams(
            dimension_semantics=("parallel", "parallel"),
            vmem_limit_bytes=VMEM_LIMIT),
    )(q.astype(jnp.bfloat16), k.astype(jnp.bfloat16),
      v.astype(jnp.bfloat16), key_pad_bias.astype(jnp.float32))


def head_out_with_loss(x2d, w_pad, b_pad, labels_flat, num_labels,
                       ignore_index, label_smoothing):
    """Fused out_proj (lane-padded) + cross-entropy loss."""
    n, kdim = x2d.shape
    kpad = w_pad.shape[1]
    tm, npad, nt, _, _, _ = _tiling(n, kdim, kpad, kdim * kpad * 2)
    xp = _pad_rows(x2d.astype(jnp.bfloat16), npad)
    labp = labels_flat.reshape(n, 1).astype(jnp.int32)
    if npad != n:
        labp = jnp.pad(labp, ((0, npad - n), (0, 0)),
                       constant_values=ignore_index)
    kern = functools.partial(_head_loss_kernel, num_labels=num_labels,
                             ignore_index=ignore_index,
                             label_smoothing=label_smoothing)
    logits_pad, loss = pl.pallas_call(
        kern,
        out_shape=(jax.ShapeDtypeStruct((npad, kpad), jnp.float32),
                   jax.ShapeDtypeStruct((1, 1), jnp.float32)),
        grid_spec=pltpu.PrefetchScalarGridSpec(
            num_scalar_prefetch=0,
            grid=(nt,),
            in_specs=[
                pl.BlockSpec((tm, kdim), lambda i: (i, 0)),
                pl.BlockSpec((kdim, kpad), lambda i: (0, 0)),   # resident weight
                pl.BlockSpec((1, kpad), lambda i: (0, 0)),
                pl.BlockSpec((tm, 1), lambda i: (i, 0)),
            ],
            out_specs=[pl.BlockSpec((tm, kpad), lambda i: (i, 0)),
                       pl.BlockSpec((1, 1), lambda i: (0, 0))],
            scratch_shapes=[pltpu.VMEM((1, 1), jnp.float32),
                            pltpu.VMEM((1, 1), jnp.float32)],
        ),
        compiler_params=pltpu.CompilerParams(
            dimension_semantics=("arbitrary",),
            vmem_limit_bytes=VMEM_LIMIT),
    )(xp, w_pad.astype(jnp.bfloat16),
      b_pad.reshape(1, kpad).astype(jnp.float32), labp)
    logits_pad = logits_pad if npad == n else logits_pad[:n]
    return logits_pad, loss[0, 0]


# ------------------------------------------------------------------ model


def self_attention(x, key_pad_bias, p, num_heads, causal):
    b, s, d = x.shape
    qkv = linear(x.reshape(b * s, d), p["wqkv"], p["bqkv"])   # (N, 3D) fused
    q = qkv[:, :d].reshape(b, s, d)
    k = qkv[:, d:2 * d].reshape(b, s, d)
    v = qkv[:, 2 * d:].reshape(b, s, d)
    o = attention_core(q, k, v, key_pad_bias, num_heads, causal)
    return o.reshape(b * s, d)


def cross_attention(x_q, x_kv, key_pad_bias, p, num_heads):
    b, sq, d = x_q.shape
    sk = x_kv.shape[1]
    q = linear(x_q.reshape(b * sq, d), p["wq"], p["bq"]).reshape(b, sq, d)
    kv = linear(x_kv.reshape(b * sk, d), p["wkv"], p["bkv"])  # (N, 2D) fused
    k = kv[:, :d].reshape(b, sk, d)
    v = kv[:, d:].reshape(b, sk, d)
    o = attention_core(q, k, v, key_pad_bias, num_heads, causal=False)
    return o.reshape(b * sq, d)


def encoder_layer(x, enc_kpm, p, num_heads):
    b, s, d = x.shape
    x2d = x.reshape(b * s, d)
    a2d = self_attention(x, enc_kpm, p["self_attn"], num_heads, causal=False)
    x2d = linear_ln(a2d, p["self_attn"]["wo"], p["self_attn"]["bo"],
                    x2d, p["ln1"]["g"], p["ln1"]["b"])
    h = linear(x2d, p["fc1_w"], p["fc1_b"], activation="gelu")
    x2d = linear_ln(h, p["fc2_w"], p["fc2_b"],
                    x2d, p["ln2"]["g"], p["ln2"]["b"])
    return x2d.reshape(b, s, d)


def decoder_layer(y, enc_h, dec_kpm, enc_kpm, p, num_heads):
    b, s, d = y.shape
    y2d = y.reshape(b * s, d)
    a2d = self_attention(y, dec_kpm, p["self_attn"], num_heads, causal=True)
    y2d = linear_ln(a2d, p["self_attn"]["wo"], p["self_attn"]["bo"],
                    y2d, p["ln1"]["g"], p["ln1"]["b"])
    y = y2d.reshape(b, s, d)
    c2d = cross_attention(y, enc_h, enc_kpm, p["cross_attn"], num_heads)
    y2d = linear_ln(c2d, p["cross_attn"]["wo"], p["cross_attn"]["bo"],
                    y2d, p["ln2"]["g"], p["ln2"]["b"])
    h = linear(y2d, p["fc1_w"], p["fc1_b"], activation="gelu")
    y2d = linear_ln(h, p["fc2_w"], p["fc2_b"],
                    y2d, p["ln3"]["g"], p["ln3"]["b"])
    return y2d.reshape(b, s, d)


def bart_classification_forward(params, cfg, input_ids, attention_mask,
                                decoder_input_ids, decoder_attention_mask,
                                label=None):
    bsz, ss = input_ids.shape
    st = decoder_input_ids.shape[1]
    d = cfg["d_model"]
    nh = cfg["num_heads"]
    neg = jnp.float32(-1e9)

    # --- embeddings (token + learned positional); gather is plain-JAX glue
    enc_tok = jnp.take(params["enc_tok_emb"], input_ids, axis=0)        # [B,Ss,D]
    enc_pos = jnp.broadcast_to(params["enc_pos_emb"][:ss][None], (bsz, ss, d))
    dec_tok = jnp.take(params["dec_tok_emb"], decoder_input_ids, axis=0)
    dec_pos = jnp.broadcast_to(params["dec_pos_emb"][:st][None], (bsz, st, d))

    # --- additive key-padding rows [B, 1, Sk]; causal part is built in-kernel
    enc_kpm = ((1.0 - attention_mask.astype(jnp.float32)) * neg)[:, None, :]
    dec_kpm = ((1.0 - decoder_attention_mask.astype(jnp.float32)) * neg)[:, None, :]

    # --- encoder (embedding add + embed-LN fused in one kernel)
    x = add_layer_norm(enc_tok.reshape(bsz * ss, d),
                       enc_pos.reshape(bsz * ss, d),
                       params["enc_emb_ln"]["g"],
                       params["enc_emb_ln"]["b"]).reshape(bsz, ss, d)
    for lp in params["encoder_layers"]:
        x = encoder_layer(x, enc_kpm, lp, nh)
    encoder_hidden = x

    # --- decoder
    y = add_layer_norm(dec_tok.reshape(bsz * st, d),
                       dec_pos.reshape(bsz * st, d),
                       params["dec_emb_ln"]["g"],
                       params["dec_emb_ln"]["b"]).reshape(bsz, st, d)
    for lp in params["decoder_layers"]:
        y = decoder_layer(y, encoder_hidden, dec_kpm, enc_kpm, lp, nh)

    # --- classification head: dense -> tanh -> out_proj (lane-padded to 128)
    h = linear(y.reshape(bsz * st, d),
               params["head"]["w1"], params["head"]["b1"], activation="tanh")

    if label is None:
        logits_pad = linear(h, params["head"]["w2p"], params["head"]["b2p"],
                            activation=None, out_dtype=jnp.float32)
        return logits_pad[:, :cfg["num_labels"]].reshape(bsz, st, cfg["num_labels"])

    # fused out_proj + cross-entropy (logits never re-read from HBM)
    logits_pad, loss = head_out_with_loss(
        h, params["head"]["w2p"], params["head"]["b2p"], label.reshape(-1),
        num_labels=cfg["num_labels"], ignore_index=cfg["pad_idx"],
        label_smoothing=cfg["label_smoothing"])
    logits = logits_pad[:, :cfg["num_labels"]].reshape(bsz, st, cfg["num_labels"])
    return logits, loss


# ----------------------------------------------------------------- params


def init_params(key, cfg):
    d, f, std = cfg["d_model"], cfg["ffn_dim"], cfg["init_std"]
    nl = cfg["num_labels"]
    kpad = ((nl + 127) // 128) * 128
    keys = iter(jax.random.split(key, 512))

    def nrm(shape):
        return jax.random.normal(next(keys), shape, jnp.float32) * std

    def wt(shape):            # matmul weights stored bf16 for MXU / HBM wins
        return nrm(shape).astype(jnp.bfloat16)

    def self_attn_p():
        return dict(wqkv=wt((d, 3 * d)), bqkv=jnp.zeros((3 * d,), jnp.float32),
                    wo=wt((d, d)), bo=jnp.zeros((d,), jnp.float32))

    def cross_attn_p():
        return dict(wq=wt((d, d)), bq=jnp.zeros((d,), jnp.float32),
                    wkv=wt((d, 2 * d)), bkv=jnp.zeros((2 * d,), jnp.float32),
                    wo=wt((d, d)), bo=jnp.zeros((d,), jnp.float32))

    def ln():
        return dict(g=jnp.ones((d,), jnp.float32), b=jnp.zeros((d,), jnp.float32))

    def enc_layer():
        return dict(self_attn=self_attn_p(), ln1=ln(),
                    fc1_w=wt((d, f)), fc1_b=jnp.zeros((f,), jnp.float32),
                    fc2_w=wt((f, d)), fc2_b=jnp.zeros((d,), jnp.float32),
                    ln2=ln())

    def dec_layer():
        return dict(self_attn=self_attn_p(), ln1=ln(),
                    cross_attn=cross_attn_p(), ln2=ln(),
                    fc1_w=wt((d, f)), fc1_b=jnp.zeros((f,), jnp.float32),
                    fc2_w=wt((f, d)), fc2_b=jnp.zeros((d,), jnp.float32),
                    ln3=ln())

    enc_tok = nrm((cfg["src_vocab"], d)).at[cfg["pad_idx"]].set(0.0)
    dec_tok = nrm((cfg["tgt_vocab"], d)).at[cfg["pad_idx"]].set(0.0)

    w2 = nrm((f, nl))
    w2p = jnp.zeros((f, kpad), jnp.float32).at[:, :nl].set(w2).astype(jnp.bfloat16)
    b2p = jnp.zeros((kpad,), jnp.float32)

    return dict(
        enc_tok_emb=enc_tok, dec_tok_emb=dec_tok,
        enc_pos_emb=nrm((cfg["max_pos"], d)), dec_pos_emb=nrm((cfg["max_pos"], d)),
        enc_emb_ln=ln(), dec_emb_ln=ln(),
        encoder_layers=[enc_layer() for _ in range(cfg["enc_layers"])],
        decoder_layers=[dec_layer() for _ in range(cfg["dec_layers"])],
        head=dict(w1=wt((d, f)), b1=jnp.zeros((f,), jnp.float32),
                  w2p=w2p, b2p=b2p),
    )


# ------------------------------------------------------------------- main


if __name__ == "__main__":
    cfg = dict(
        src_vocab=50, tgt_vocab=50, d_model=32, num_heads=4,
        enc_layers=2, dec_layers=2, ffn_dim=64, max_pos=32,
        pad_idx=1, num_labels=6, label_smoothing=0.1, init_std=0.02,
    )
    key = jax.random.PRNGKey(0)
    k_param, k_src, k_tgt, k_lab = jax.random.split(key, 4)

    B, Ss, St = 2, 8, 8
    params = init_params(k_param, cfg)

    input_ids = jax.random.randint(k_src, (B, Ss), 2, cfg["src_vocab"], dtype=jnp.int32)
    decoder_input_ids = jax.random.randint(k_tgt, (B, St), 2, cfg["tgt_vocab"], dtype=jnp.int32)

    attention_mask = jnp.ones((B, Ss), jnp.int32).at[1, 6:].set(0)
    decoder_attention_mask = jnp.ones((B, St), jnp.int32).at[1, 5:].set(0)
    input_ids = jnp.where(attention_mask == 1, input_ids, cfg["pad_idx"])
    decoder_input_ids = jnp.where(decoder_attention_mask == 1, decoder_input_ids, cfg["pad_idx"])

    label = jax.random.randint(k_lab, (B, St), 0, cfg["num_labels"], dtype=jnp.int32)
    label = jnp.where(decoder_attention_mask == 1, label, cfg["pad_idx"])  # pad -> ignore_index

    fwd = jax.jit(functools.partial(bart_classification_forward, params, cfg))
    logits, loss = fwd(input_ids, attention_mask,
                       decoder_input_ids, decoder_attention_mask, label)

    jax.block_until_ready((logits, loss))
    assert logits.shape == (B, St, cfg["num_labels"])
    assert jnp.isfinite(loss)
    print("KERNEL_OK")
</pallas_src>

<mosaic_0001>
module attributes {stable_mosaic.version = 11 : i64} {
  func.func @_add_ln_kernel(%arg0: i32, %arg1: memref<16x32xf32, #tpu.memory_space<vmem>>, %arg2: memref<16x32xf32, #tpu.memory_space<vmem>>, %arg3: memref<1x32xf32, #tpu.memory_space<vmem>>, %arg4: memref<1x32xf32, #tpu.memory_space<vmem>>, %arg5: memref<16x32xbf16, #tpu.memory_space<vmem>>) attributes {dimension_semantics = [#tpu.dimension_semantics<parallel>], iteration_bounds = array<i64: 1>, scalar_prefetch = 0 : i64, scratch_operands = 0 : i64, tpu.core_type = #tpu.core_type<tc>, window_params = [{transform_indices = @transform_0, window_bounds = array<i64: 16, 32>}, {transform_indices = @transform_1, window_bounds = array<i64: 16, 32>}, {pipeline_mode = #tpu.pipeline_mode<synchronous>, transform_indices = @transform_2, window_bounds = array<i64: 1, 32>}, {pipeline_mode = #tpu.pipeline_mode<synchronous>, transform_indices = @transform_3, window_bounds = array<i64: 1, 32>}, {transform_indices = @transform_4, window_bounds = array<i64: 16, 32>}]} {
    %c0 = arith.constant 0 : index
    %c0_0 = arith.constant 0 : index
    %0 = vector.load %arg1[%c0, %c0_0] : memref<16x32xf32, #tpu.memory_space<vmem>>, vector<16x32xf32>
    %c0_1 = arith.constant 0 : index
    %c0_2 = arith.constant 0 : index
    %1 = vector.load %arg2[%c0_1, %c0_2] : memref<16x32xf32, #tpu.memory_space<vmem>>, vector<16x32xf32>
    %2 = arith.addf %0, %1 : vector<16x32xf32>
    %cst = arith.constant dense<0.000000e+00> : vector<16xf32>
    %3 = vector.multi_reduction <add>, %2, %cst [1] : vector<16x32xf32> to vector<16xf32>
    %4 = vector.shape_cast %3 : vector<16xf32> to vector<16x1xf32>
    %cst_3 = arith.constant 3.200000e+01 : f32
    %5 = vector.broadcast %cst_3 : f32 to vector<16x1xf32>
    %6 = arith.divf %4, %5 : vector<16x1xf32>
    %7 = vector.broadcast %6 : vector<16x1xf32> to vector<16x32xf32>
    %8 = arith.subf %2, %7 : vector<16x32xf32>
    %9 = arith.mulf %8, %8 : vector<16x32xf32>
    %cst_4 = arith.constant dense<0.000000e+00> : vector<16xf32>
    %10 = vector.multi_reduction <add>, %9, %cst_4 [1] : vector<16x32xf32> to vector<16xf32>
    %11 = vector.shape_cast %10 : vector<16xf32> to vector<16x1xf32>
    %cst_5 = arith.constant 3.200000e+01 : f32
    %12 = vector.broadcast %cst_5 : f32 to vector<16x1xf32>
    %13 = arith.divf %11, %12 : vector<16x1xf32>
    %14 = vector.broadcast %6 : vector<16x1xf32> to vector<16x32xf32>
    %15 = arith.subf %2, %14 : vector<16x32xf32>
    %cst_6 = arith.constant 9.99999974E-6 : f32
    %16 = vector.broadcast %cst_6 : f32 to vector<16x1xf32>
    %17 = arith.addf %13, %16 : vector<16x1xf32>
    %18 = math.rsqrt %17 : vector<16x1xf32>
    %19 = vector.broadcast %18 : vector<16x1xf32> to vector<16x32xf32>
    %20 = arith.mulf %15, %19 : vector<16x32xf32>
    %c0_7 = arith.constant 0 : index
    %c0_8 = arith.constant 0 : index
    %21 = vector.load %arg3[%c0_7, %c0_8] : memref<1x32xf32, #tpu.memory_space<vmem>>, vector<1x32xf32>
    %22 = vector.broadcast %21 : vector<1x32xf32> to vector<16x32xf32>
    %23 = arith.mulf %20, %22 : vector<16x32xf32>
    %c0_9 = arith.constant 0 : index
    %c0_10 = arith.constant 0 : index
    %24 = vector.load %arg4[%c0_9, %c0_10] : memref<1x32xf32, #tpu.memory_space<vmem>>, vector<1x32xf32>
    %25 = vector.broadcast %24 : vector<1x32xf32> to vector<16x32xf32>
    %26 = arith.addf %23, %25 : vector<16x32xf32>
    %27 = arith.truncf %26 : vector<16x32xf32> to vector<16x32xbf16>
    %c0_11 = arith.constant 0 : index
    %c0_12 = arith.constant 0 : index
    %28 = vector.load %arg5[%c0_11, %c0_12] : memref<16x32xbf16, #tpu.memory_space<vmem>>, vector<16x32xbf16>
    tpu.vector_store %arg5[%c0_11, %c0_12], %27 {strides = array<i32>} : memref<16x32xbf16, #tpu.memory_space<vmem>>, vector<16x32xbf16>,
    return
  }
  func.func @transform_0(%arg0: i32) -> (i32, i32) {
    %c0_i32 = arith.constant 0 : i32
    %c0_i32_0 = arith.constant 0 : i32
    return %arg0, %c0_i32 : i32, i32
  }
  func.func @transform_1(%arg0: i32) -> (i32, i32) {
    %c0_i32 = arith.constant 0 : i32
    %c0_i32_0 = arith.constant 0 : i32
    return %arg0, %c0_i32 : i32, i32
  }
  func.func @transform_2(%arg0: i32) -> (i32, i32) {
    %c0_i32 = arith.constant 0 : i32
    %c0_i32_0 = arith.constant 0 : i32
    %c0_i32_1 = arith.constant 0 : i32
    return %c0_i32, %c0_i32_0 : i32, i32
  }
  func.func @transform_3(%arg0: i32) -> (i32, i32) {
    %c0_i32 = arith.constant 0 : i32
    %c0_i32_0 = arith.constant 0 : i32
    %c0_i32_1 = arith.constant 0 : i32
    return %c0_i32, %c0_i32_0 : i32, i32
  }
  func.func @transform_4(%arg0: i32) -> (i32, i32) {
    %c0_i32 = arith.constant 0 : i32
    %c0_i32_0 = arith.constant 0 : i32
    return %arg0, %c0_i32 : i32, i32
  }
}

module attributes {stable_mosaic.version = 11 : i64} {
  func.func @_linear_resident_kernel(%arg0: i32, %arg1: memref<16x32xbf16, #tpu.memory_space<vmem>>, %arg2: memref<32x96xbf16, #tpu.memory_space<vmem>>, %arg3: memref<1x96xf32, #tpu.memory_space<vmem>>, %arg4: memref<16x96xbf16, #tpu.memory_space<vmem>>) attributes {dimension_semantics = [#tpu.dimension_semantics<parallel>], iteration_bounds = array<i64: 1>, scalar_prefetch = 0 : i64, scratch_operands = 0 : i64, tpu.core_type = #tpu.core_type<tc>, window_params = [{transform_indices = @transform_0, window_bounds = array<i64: 16, 32>}, {pipeline_mode = #tpu.pipeline_mode<synchronous>, transform_indices = @transform_1, window_bounds = array<i64: 32, 96>}, {pipeline_mode = #tpu.pipeline_mode<synchronous>, transform_indices = @transform_2, window_bounds = array<i64: 1, 96>}, {transform_indices = @transform_3, window_bounds = array<i64: 16, 96>}]} {
    %c0 = arith.constant 0 : index
    %c0_0 = arith.constant 0 : index
    %0 = vector.load %arg1[%c0, %c0_0] : memref<16x32xbf16, #tpu.memory_space<vmem>>, vector<16x32xbf16>
    %c0_1 = arith.constant 0 : index
    %c0_2 = arith.constant 0 : index
    %1 = vector.load %arg2[%c0_1, %c0_2] : memref<32x96xbf16, #tpu.memory_space<vmem>>, vector<32x96xbf16>
    %cst = arith.constant dense<0.000000e+00> : vector<16x96xf32>
    %2 = tpu.matmul %0, %1, %cst {dimension_numbers = #tpu.dot_dimension_numbers<[1], [0], [0], [1], [0, 0, 1, 1], [], []>} : vector<16x32xbf16>, vector<32x96xbf16>, vector<16x96xf32> -> vector<16x96xf32>
    %c0_3 = arith.constant 0 : index
    %c0_4 = arith.constant 0 : index
    %3 = vector.load %arg3[%c0_3, %c0_4] : memref<1x96xf32, #tpu.memory_space<vmem>>, vector<1x96xf32>
    %4 = vector.broadcast %3 : vector<1x96xf32> to vector<16x96xf32>
    %5 = arith.addf %2, %4 : vector<16x96xf32>
    %6 = arith.truncf %5 : vector<16x96xf32> to vector<16x96xbf16>
    %c0_5 = arith.constant 0 : index
    %c0_6 = arith.constant 0 : index
    %7 = vector.load %arg4[%c0_5, %c0_6] : memref<16x96xbf16, #tpu.memory_space<vmem>>, vector<16x96xbf16>
    tpu.vector_store %arg4[%c0_5, %c0_6], %6 {strides = array<i32>} : memref<16x96xbf16, #tpu.memory_space<vmem>>, vector<16x96xbf16>,
    return
  }
  func.func @transform_0(%arg0: i32) -> (i32, i32) {
    %c0_i32 = arith.constant 0 : i32
    %c0_i32_0 = arith.constant 0 : i32
    return %arg0, %c0_i32 : i32, i32
  }
  func.func @transform_1(%arg0: i32) -> (i32, i32) {
    %c0_i32 = arith.constant 0 : i32
    %c0_i32_0 = arith.constant 0 : i32
    %c0_i32_1 = arith.constant 0 : i32
    return %c0_i32, %c0_i32_0 : i32, i32
  }
  func.func @transform_2(%arg0: i32) -> (i32, i32) {
    %c0_i32 = arith.constant 0 : i32
    %c0_i32_0 = arith.constant 0 : i32
    %c0_i32_1 = arith.constant 0 : i32
    return %c0_i32, %c0_i32_0 : i32, i32
  }
  func.func @transform_3(%arg0: i32) -> (i32, i32) {
    %c0_i32 = arith.constant 0 : i32
    %c0_i32_0 = arith.constant 0 : i32
    return %arg0, %c0_i32 : i32, i32
  }
}

module attributes {stable_mosaic.version = 11 : i64} {
  func.func @_linear_ln_resident_kernel(%arg0: i32, %arg1: memref<16x32xbf16, #tpu.memory_space<vmem>>, %arg2: memref<32x32xbf16, #tpu.memory_space<vmem>>, %arg3: memref<1x32xf32, #tpu.memory_space<vmem>>, %arg4: memref<16x32xbf16, #tpu.memory_space<vmem>>, %arg5: memref<1x32xf32, #tpu.memory_space<vmem>>, %arg6: memref<1x32xf32, #tpu.memory_space<vmem>>, %arg7: memref<16x32xbf16, #tpu.memory_space<vmem>>) attributes {dimension_semantics = [#tpu.dimension_semantics<parallel>], iteration_bounds = array<i64: 1>, scalar_prefetch = 0 : i64, scratch_operands = 0 : i64, tpu.core_type = #tpu.core_type<tc>, window_params = [{transform_indices = @transform_0, window_bounds = array<i64: 16, 32>}, {pipeline_mode = #tpu.pipeline_mode<synchronous>, transform_indices = @transform_1, window_bounds = array<i64: 32, 32>}, {pipeline_mode = #tpu.pipeline_mode<synchronous>, transform_indices = @transform_2, window_bounds = array<i64: 1, 32>}, {transform_indices = @transform_3, window_bounds = array<i64: 16, 32>}, {pipeline_mode = #tpu.pipeline_mode<synchronous>, transform_indices = @transform_4, window_bounds = array<i64: 1, 32>}, {pipeline_mode = #tpu.pipeline_mode<synchronous>, transform_indices = @transform_5, window_bounds = array<i64: 1, 32>}, {transform_indices = @transform_6, window_bounds = array<i64: 16, 32>}]} {
    %c0 = arith.constant 0 : index
    %c0_0 = arith.constant 0 : index
    %0 = vector.load %arg1[%c0, %c0_0] : memref<16x32xbf16, #tpu.memory_space<vmem>>, vector<16x32xbf16>
    %c0_1 = arith.constant 0 : index
    %c0_2 = arith.constant 0 : index
    %1 = vector.load %arg2[%c0_1, %c0_2] : memref<32x32xbf16, #tpu.memory_space<vmem>>, vector<32x32xbf16>
    %cst = arith.constant dense<0.000000e+00> : vector<16x32xf32>
    %2 = tpu.matmul %0, %1, %cst {dimension_numbers = #tpu.dot_dimension_numbers<[1], [0], [0], [1], [0, 0, 1, 1], [], []>} : vector<16x32xbf16>, vector<32x32xbf16>, vector<16x32xf32> -> vector<16x32xf32>
    %c0_3 = arith.constant 0 : index
    %c0_4 = arith.constant 0 : index
    %3 = vector.load %arg3[%c0_3, %c0_4] : memref<1x32xf32, #tpu.memory_space<vmem>>, vector<1x32xf32>
    %4 = vector.broadcast %3 : vector<1x32xf32> to vector<16x32xf32>
    %5 = arith.addf %2, %4 : vector<16x32xf32>
    %c0_5 = arith.constant 0 : index
    %c0_6 = arith.constant 0 : index
    %6 = vector.load %arg4[%c0_5, %c0_6] : memref<16x32xbf16, #tpu.memory_space<vmem>>, vector<16x32xbf16>
    %7 = arith.extf %6 : vector<16x32xbf16> to vector<16x32xf32>
    %8 = arith.addf %5, %7 : vector<16x32xf32>
    %cst_7 = arith.constant dense<0.000000e+00> : vector<16xf32>
    %9 = vector.multi_reduction <add>, %8, %cst_7 [1] : vector<16x32xf32> to vector<16xf32>
    %10 = vector.shape_cast %9 : vector<16xf32> to vector<16x1xf32>
    %cst_8 = arith.constant 3.200000e+01 : f32
    %11 = vector.broadcast %cst_8 : f32 to vector<16x1xf32>
    %12 = arith.divf %10, %11 : vector<16x1xf32>
    %13 = vector.broadcast %12 : vector<16x1xf32> to vector<16x32xf32>
    %14 = arith.subf %8, %13 : vector<16x32xf32>
    %15 = arith.mulf %14, %14 : vector<16x32xf32>
    %cst_9 = arith.constant dense<0.000000e+00> : vector<16xf32>
    %16 = vector.multi_reduction <add>, %15, %cst_9 [1] : vector<16x32xf32> to vector<16xf32>
    %17 = vector.shape_cast %16 : vector<16xf32> to vector<16x1xf32>
    %cst_10 = arith.constant 3.200000e+01 : f32
    %18 = vector.broadcast %cst_10 : f32 to vector<16x1xf32>
    %19 = arith.divf %17, %18 : vector<16x1xf32>
    %20 = vector.broadcast %12 : vector<16x1xf32> to vector<16x32xf32>
    %21 = arith.subf %8, %20 : vector<16x32xf32>
    %cst_11 = arith.constant 9.99999974E-6 : f32
    %22 = vector.broadcast %cst_11 : f32 to vector<16x1xf32>
    %23 = arith.addf %19, %22 : vector<16x1xf32>
    %24 = math.rsqrt %23 : vector<16x1xf32>
    %25 = vector.broadcast %24 : vector<16x1xf32> to vector<16x32xf32>
    %26 = arith.mulf %21, %25 : vector<16x32xf32>
    %c0_12 = arith.constant 0 : index
    %c0_13 = arith.constant 0 : index
    %27 = vector.load %arg5[%c0_12, %c0_13] : memref<1x32xf32, #tpu.memory_space<vmem>>, vector<1x32xf32>
    %28 = vector.broadcast %27 : vector<1x32xf32> to vector<16x32xf32>
    %29 = arith.mulf %26, %28 : vector<16x32xf32>
    %c0_14 = arith.constant 0 : index
    %c0_15 = arith.constant 0 : index
    %30 = vector.load %arg6[%c0_14, %c0_15] : memref<1x32xf32, #tpu.memory_space<vmem>>, vector<1x32xf32>
    %31 = vector.broadcast %30 : vector<1x32xf32> to vector<16x32xf32>
    %32 = arith.addf %29, %31 : vector<16x32xf32>
    %33 = arith.truncf %32 : vector<16x32xf32> to vector<16x32xbf16>
    %c0_16 = arith.constant 0 : index
    %c0_17 = arith.constant 0 : index
    %34 = vector.load %arg7[%c0_16, %c0_17] : memref<16x32xbf16, #tpu.memory_space<vmem>>, vector<16x32xbf16>
    tpu.vector_store %arg7[%c0_16, %c0_17], %33 {strides = array<i32>} : memref<16x32xbf16, #tpu.memory_space<vmem>>, vector<16x32xbf16>,
    return
  }
  func.func @transform_0(%arg0: i32) -> (i32, i32) {
    %c0_i32 = arith.constant 0 : i32
    %c0_i32_0 = arith.constant 0 : i32
    return %arg0, %c0_i32 : i32, i32
  }
  func.func @transform_1(%arg0: i32) -> (i32, i32) {
    %c0_i32 = arith.constant 0 : i32
    %c0_i32_0 = arith.constant 0 : i32
    %c0_i32_1 = arith.constant 0 : i32
    return %c0_i32, %c0_i32_0 : i32, i32
  }
  func.func @transform_2(%arg0: i32) -> (i32, i32) {
    %c0_i32 = arith.constant 0 : i32
    %c0_i32_0 = arith.constant 0 : i32
    %c0_i32_1 = arith.constant 0 : i32
    return %c0_i32, %c0_i32_0 : i32, i32
  }
  func.func @transform_3(%arg0: i32) -> (i32, i32) {
    %c0_i32 = arith.constant 0 : i32
    %c0_i32_0 = arith.constant 0 : i32
    return %arg0, %c0_i32 : i32, i32
  }
  func.func @transform_4(%arg0: i32) -> (i32, i32) {
    %c0_i32 = arith.constant 0 : i32
    %c0_i32_0 = arith.constant 0 : i32
    %c0_i32_1 = arith.constant 0 : i32
    return %c0_i32, %c0_i32_0 : i32, i32
  }
  func.func @transform_5(%arg0: i32) -> (i32, i32) {
    %c0_i32 = arith.constant 0 : i32
    %c0_i32_0 = arith.constant 0 : i32
    %c0_i32_1 = arith.constant 0 : i32
    return %c0_i32, %c0_i32_0 : i32, i32
  }
  func.func @transform_6(%arg0: i32) -> (i32, i32) {
    %c0_i32 = arith.constant 0 : i32
    %c0_i32_0 = arith.constant 0 : i32
    return %arg0, %c0_i32 : i32, i32
  }
}

module attributes {stable_mosaic.version = 11 : i64} {
  func.func @_mha_kernel(%arg0: i32, %arg1: i32, %arg2: memref<1x8x32xbf16, #tpu.memory_space<vmem>>, %arg3: memref<1x8x32xbf16, #tpu.memory_space<vmem>>, %arg4: memref<1x8x32xbf16, #tpu.memory_space<vmem>>, %arg5: memref<1x1x8xf32, #tpu.memory_space<vmem>>, %arg6: memref<1x8x32xbf16, #tpu.memory_space<vmem>>, %arg7: memref<8x32xf32, #tpu.memory_space<vmem>>) attributes {dimension_semantics = [#tpu.dimension_semantics<parallel>, #tpu.dimension_semantics<parallel>], iteration_bounds = array<i64: 2, 1>, scalar_prefetch = 0 : i64, scratch_operands = 1 : i64, tpu.core_type = #tpu.core_type<tc>, window_params = [{transform_indices = @transform_0, window_bounds = array<i64: 1, 8, 32>}, {transform_indices = @transform_1, window_bounds = array<i64: 1, 8, 32>}, {transform_indices = @transform_2, window_bounds = array<i64: 1, 8, 32>}, {transform_indices = @transform_3, window_bounds = array<i64: 1, 1, 8>}, {transform_indices = @transform_4, window_bounds = array<i64: 1, 8, 32>}]} {
    %c0 = arith.constant 0 : index
    %c0_0 = arith.constant 0 : index
    %c0_1 = arith.constant 0 : index
    %0 = vector.load %arg2[%c0, %c0_0, %c0_1] : memref<1x8x32xbf16, #tpu.memory_space<vmem>>, vector<1x8x32xbf16>
    %1 = vector.shape_cast %0 : vector<1x8x32xbf16> to vector<8x32xbf16>
    %c0_2 = arith.constant 0 : index
    %c0_3 = arith.constant 0 : index
    %c0_4 = arith.constant 0 : index
    %2 = vector.load %arg3[%c0_2, %c0_3, %c0_4] : memref<1x8x32xbf16, #tpu.memory_space<vmem>>, vector<1x8x32xbf16>
    %3 = vector.shape_cast %2 : vector<1x8x32xbf16> to vector<8x32xbf16>
    %c0_5 = arith.constant 0 : index
    %c0_6 = arith.constant 0 : index
    %c0_7 = arith.constant 0 : index
    %4 = vector.load %arg4[%c0_5, %c0_6, %c0_7] : memref<1x8x32xbf16, #tpu.memory_space<vmem>>, vector<1x8x32xbf16>
    %5 = vector.shape_cast %4 : vector<1x8x32xbf16> to vector<8x32xbf16>
    %c0_8 = arith.constant 0 : index
    %c0_9 = arith.constant 0 : index
    %c0_10 = arith.constant 0 : index
    %6 = vector.load %arg5[%c0_8, %c0_9, %c0_10] : memref<1x1x8xf32, #tpu.memory_space<vmem>>, vector<1x1x8xf32>
    %7 = vector.shape_cast %6 : vector<1x1x8xf32> to vector<1x8xf32>
    %8 = vector.shape_cast %7 : vector<1x8xf32> to vector<1x8xf32>
    %9 = vector.broadcast %8 : vector<1x8xf32> to vector<8x8xf32>
    %10 = tpu.iota {dimensions = array<i32: 0>} : vector<8x8xi32>
    %c8_i32 = arith.constant 8 : i32
    %11 = arith.muli %arg1, %c8_i32 : i32
    %12 = vector.broadcast %11 : i32 to vector<8x8xi32>
    %13 = arith.addi %10, %12 : vector<8x8xi32>
    %14 = tpu.iota {dimensions = array<i32: 1>} : vector<8x8xi32>
    %15 = arith.cmpi sge, %13, %14 : vector<8x8xi32>
    %cst = arith.constant -1.000000e+09 : f32
    %16 = vector.broadcast %cst : f32 to vector<8x8xf32>
    %17 = arith.select %15, %9, %16 : vector<8x8xi1>, vector<8x8xf32>
    %18 = vector.extract_strided_slice %1 {offsets = [0, 0], sizes = [8, 8], strides = [1, 1]} : vector<8x32xbf16> to vector<8x8xbf16>
    %19 = vector.extract_strided_slice %3 {offsets = [0, 0], sizes = [8, 8], strides = [1, 1]} : vector<8x32xbf16> to vector<8x8xbf16>
    %20 = vector.extract_strided_slice %5 {offsets = [0, 0], sizes = [8, 8], strides = [1, 1]} : vector<8x32xbf16> to vector<8x8xbf16>
    %cst_11 = arith.constant dense<0.000000e+00> : vector<8x8xf32>
    %21 = tpu.matmul %18, %19, %cst_11 {dimension_numbers = #tpu.dot_dimension_numbers<[1], [1], [0], [0], [0, 0, 1, 0], [], []>} : vector<8x8xbf16>, vector<8x8xbf16>, vector<8x8xf32> -> vector<8x8xf32>
    %cst_12 = arith.constant 0.353553385 : f32
    %22 = vector.broadcast %cst_12 : f32 to vector<8x8xf32>
    %23 = arith.mulf %21, %22 : vector<8x8xf32>
    %24 = arith.addf %23, %17 : vector<8x8xf32>
    %cst_13 = arith.constant dense<0xFF800000> : vector<8xf32>
    %25 = vector.multi_reduction <maximumf>, %24, %cst_13 [1] : vector<8x8xf32> to vector<8xf32>
    %26 = vector.shape_cast %25 : vector<8xf32> to vector<8x1xf32>
    %27 = vector.broadcast %26 : vector<8x1xf32> to vector<8x8xf32>
    %28 = arith.subf %24, %27 : vector<8x8xf32>
    %29 = math.exp %28 : vector<8x8xf32>
    %cst_14 = arith.constant dense<0.000000e+00> : vector<8xf32>
    %30 = vector.multi_reduction <add>, %29, %cst_14 [1] : vector<8x8xf32> to vector<8xf32>
    %31 = vector.shape_cast %30 : vector<8xf32> to vector<8x1xf32>
    %32 = tpu.reciprocal %31 {approx = true} : vector<8x1xf32> -> vector<8x1xf32>
    %33 = vector.broadcast %32 : vector<8x1xf32> to vector<8x8xf32>
    %34 = arith.mulf %29, %33 : vector<8x8xf32>
    %35 = arith.truncf %34 : vector<8x8xf32> to vector<8x8xbf16>
    %cst_15 = arith.constant dense<0.000000e+00> : vector<8x8xf32>
    %36 = tpu.matmul %35, %20, %cst_15 {dimension_numbers = #tpu.dot_dimension_numbers<[1], [0], [0], [1], [0, 0, 1, 1], [], []>} : vector<8x8xbf16>, vector<8x8xbf16>, vector<8x8xf32> -> vector<8x8xf32>
    %c0_16 = arith.constant 0 : index
    %c0_17 = arith.constant 0 : index
    %37 = vector.load %arg7[%c0_16, %c0_17] : memref<8x32xf32, #tpu.memory_space<vmem>>, vector<8x8xf32>
    tpu.vector_store %arg7[%c0_16, %c0_17], %36 {strides = array<i32>} : memref<8x32xf32, #tpu.memory_space<vmem>>, vector<8x8xf32>,
    %38 = vector.extract_strided_slice %1 {offsets = [0, 8], sizes = [8, 8], strides = [1, 1]} : vector<8x32xbf16> to vector<8x8xbf16>
    %39 = vector.extract_strided_slice %3 {offsets = [0, 8], sizes = [8, 8], strides = [1, 1]} : vector<8x32xbf16> to vector<8x8xbf16>
    %40 = vector.extract_strided_slice %5 {offsets = [0, 8], sizes = [8, 8], strides = [1, 1]} : vector<8x32xbf16> to vector<8x8xbf16>
    %cst_18 = arith.constant dense<0.000000e+00> : vector<8x8xf32>
    %41 = tpu.matmul %38, %39, %cst_18 {dimension_numbers = #tpu.dot_dimension_numbers<[1], [1], [0], [0], [0, 0, 1, 0], [], []>} : vector<8x8xbf16>, vector<8x8xbf16>, vector<8x8xf32> -> vector<8x8xf32>
    %cst_19 = arith.constant 0.353553385 : f32
    %42 = vector.broadcast %cst_19 : f32 to vector<8x8xf32>
    %43 = arith.mulf %41, %42 : vector<8x8xf32>
    %44 = arith.addf %43, %17 : vector<8x8xf32>
    %cst_20 = arith.constant dense<0xFF800000> : vector<8xf32>
    %45 = vector.multi_reduction <maximumf>, %44, %cst_20 [1] : vector<8x8xf32> to vector<8xf32>
    %46 = vector.shape_cast %45 : vector<8xf32> to vector<8x1xf32>
    %47 = vector.broadcast %46 : vector<8x1xf32> to vector<8x8xf32>
    %48 = arith.subf %44, %47 : vector<8x8xf32>
    %49 = math.exp %48 : vector<8x8xf32>
    %cst_21 = arith.constant dense<0.000000e+00> : vector<8xf32>
    %50 = vector.multi_reduction <add>, %49, %cst_21 [1] : vector<8x8xf32> to vector<8xf32>
    %51 = vector.shape_cast %50 : vector<8xf32> to vector<8x1xf32>
    %52 = tpu.reciprocal %51 {approx = true} : vector<8x1xf32> -> vector<8x1xf32>
    %53 = vector.broadcast %52 : vector<8x1xf32> to vector<8x8xf32>
    %54 = arith.mulf %49, %53 : vector<8x8xf32>
    %55 = arith.truncf %54 : vector<8x8xf32> to vector<8x8xbf16>
    %cst_22 = arith.constant dense<0.000000e+00> : vector<8x8xf32>
    %56 = tpu.matmul %55, %40, %cst_22 {dimension_numbers = #tpu.dot_dimension_numbers<[1], [0], [0], [1], [0, 0, 1, 1], [], []>} : vector<8x8xbf16>, vector<8x8xbf16>, vector<8x8xf32> -> vector<8x8xf32>
    %c0_23 = arith.constant 0 : index
    %c8 = arith.constant 8 : index
    %57 = vector.load %arg7[%c0_23, %c8] : memref<8x32xf32, #tpu.memory_space<vmem>>, vector<8x8xf32>
    tpu.vector_store %arg7[%c0_23, %c8], %56 {strides = array<i32>} : memref<8x32xf32, #tpu.memory_space<vmem>>, vector<8x8xf32>,
    %58 = vector.extract_strided_slice %1 {offsets = [0, 16], sizes = [8, 8], strides = [1, 1]} : vector<8x32xbf16> to vector<8x8xbf16>
    %59 = vector.extract_strided_slice %3 {offsets = [0, 16], sizes = [8, 8], strides = [1, 1]} : vector<8x32xbf16> to vector<8x8xbf16>
    %60 = vector.extract_strided_slice %5 {offsets = [0, 16], sizes = [8, 8], strides = [1, 1]} : vector<8x32xbf16> to vector<8x8xbf16>
    %cst_24 = arith.constant dense<0.000000e+00> : vector<8x8xf32>
    %61 = tpu.matmul %58, %59, %cst_24 {dimension_numbers = #tpu.dot_dimension_numbers<[1], [1], [0], [0], [0, 0, 1, 0], [], []>} : vector<8x8xbf16>, vector<8x8xbf16>, vector<8x8xf32> -> vector<8x8xf32>
    %cst_25 = arith.constant 0.353553385 : f32
    %62 = vector.broadcast %cst_25 : f32 to vector<8x8xf32>
    %63 = arith.mulf %61, %62 : vector<8x8xf32>
    %64 = arith.addf %63, %17 : vector<8x8xf32>
    %cst_26 = arith.constant dense<0xFF800000> : vector<8xf32>
    %65 = vector.multi_reduction <maximumf>, %64, %cst_26 [1] : vector<8x8xf32> to vector<8xf32>
    %66 = vector.shape_cast %65 : vector<8xf32> to vector<8x1xf32>
    %67 = vector.broadcast %66 : vector<8x1xf32> to vector<8x8xf32>
    %68 = arith.subf %64, %67 : vector<8x8xf32>
    %69 = math.exp %68 : vector<8x8xf32>
    %cst_27 = arith.constant dense<0.000000e+00> : vector<8xf32>
    %70 = vector.multi_reduction <add>, %69, %cst_27 [1] : vector<8x8xf32> to vector<8xf32>
    %71 = vector.shape_cast %70 : vector<8xf32> to vector<8x1xf32>
    %72 = tpu.reciprocal %71 {approx = true} : vector<8x1xf32> -> vector<8x1xf32>
    %73 = vector.broadcast %72 : vector<8x1xf32> to vector<8x8xf32>
    %74 = arith.mulf %69, %73 : vector<8x8xf32>
    %75 = arith.truncf %74 : vector<8x8xf32> to vector<8x8xbf16>
    %cst_28 = arith.constant dense<0.000000e+00> : vector<8x8xf32>
    %76 = tpu.matmul %75, %60, %cst_28 {dimension_numbers = #tpu.dot_dimension_numbers<[1], [0], [0], [1], [0, 0, 1, 1], [], []>} : vector<8x8xbf16>, vector<8x8xbf16>, vector<8x8xf32> -> vector<8x8xf32>
    %c0_29 = arith.constant 0 : index
    %c16 = arith.constant 16 : index
    %77 = vector.load %arg7[%c0_29, %c16] : memref<8x32xf32, #tpu.memory_space<vmem>>, vector<8x8xf32>
    tpu.vector_store %arg7[%c0_29, %c16], %76 {strides = array<i32>} : memref<8x32xf32, #tpu.memory_space<vmem>>, vector<8x8xf32>,
    %78 = vector.extract_strided_slice %1 {offsets = [0, 24], sizes = [8, 8], strides = [1, 1]} : vector<8x32xbf16> to vector<8x8xbf16>
    %79 = vector.extract_strided_slice %3 {offsets = [0, 24], sizes = [8, 8], strides = [1, 1]} : vector<8x32xbf16> to vector<8x8xbf16>
    %80 = vector.extract_strided_slice %5 {offsets = [0, 24], sizes = [8, 8], strides = [1, 1]} : vector<8x32xbf16> to vector<8x8xbf16>
    %cst_30 = arith.constant dense<0.000000e+00> : vector<8x8xf32>
    %81 = tpu.matmul %78, %79, %cst_30 {dimension_numbers = #tpu.dot_dimension_numbers<[1], [1], [0], [0], [0, 0, 1, 0], [], []>} : vector<8x8xbf16>, vector<8x8xbf16>, vector<8x8xf32> -> vector<8x8xf32>
    %cst_31 = arith.constant 0.353553385 : f32
    %82 = vector.broadcast %cst_31 : f32 to vector<8x8xf32>
    %83 = arith.mulf %81, %82 : vector<8x8xf32>
    %84 = arith.addf %83, %17 : vector<8x8xf32>
    %cst_32 = arith.constant dense<0xFF800000> : vector<8xf32>
    %85 = vector.multi_reduction <maximumf>, %84, %cst_32 [1] : vector<8x8xf32> to vector<8xf32>
    %86 = vector.shape_cast %85 : vector<8xf32> to vector<8x1xf32>
    %87 = vector.broadcast %86 : vector<8x1xf32> to vector<8x8xf32>
    %88 = arith.subf %84, %87 : vector<8x8xf32>
    %89 = math.exp %88 : vector<8x8xf32>
    %cst_33 = arith.constant dense<0.000000e+00> : vector<8xf32>
    %90 = vector.multi_reduction <add>, %89, %cst_33 [1] : vector<8x8xf32> to vector<8xf32>
    %91 = vector.shape_cast %90 : vector<8xf32> to vector<8x1xf32>
    %92 = tpu.reciprocal %91 {approx = true} : vector<8x1xf32> -> vector<8x1xf32>
    %93 = vector.broadcast %92 : vector<8x1xf32> to vector<8x8xf32>
    %94 = arith.mulf %89, %93 : vector<8x8xf32>
    %95 = arith.truncf %94 : vector<8x8xf32> to vector<8x8xbf16>
    %cst_34 = arith.constant dense<0.000000e+00> : vector<8x8xf32>
    %96 = tpu.matmul %95, %80, %cst_34 {dimension_numbers = #tpu.dot_dimension_numbers<[1], [0], [0], [1], [0, 0, 1, 1], [], []>} : vector<8x8xbf16>, vector<8x8xbf16>, vector<8x8xf32> -> vector<8x8xf32>
    %c0_35 = arith.constant 0 : index
    %c24 = arith.constant 24 : index
    %97 = vector.load %arg7[%c0_35, %c24] : memref<8x32xf32, #tpu.memory_space<vmem>>, vector<8x8xf32>
    tpu.vector_store %arg7[%c0_35, %c24], %96 {strides = array<i32>} : memref<8x32xf32, #tpu.memory_space<vmem>>, vector<8x8xf32>,
    %c0_36 = arith.constant 0 : index
    %c0_37 = arith.constant 0 : index
    %98 = vector.load %arg7[%c0_36, %c0_37] : memref<8x32xf32, #tpu.memory_space<vmem>>, vector<8x32xf32>
    %99 = arith.truncf %98 : vector<8x32xf32> to vector<8x32xbf16>
    %c0_38 = arith.constant 0 : index
    %c0_39 = arith.constant 0 : index
    %c0_40 = arith.constant 0 : index
    %100 = vector.load %arg6[%c0_38, %c0_39, %c0_40] : memref<1x8x32xbf16, #tpu.memory_space<vmem>>, vector<1x8x32xbf16>
    %101 = vector.shape_cast %100 : vector<1x8x32xbf16> to vector<8x32xbf16>
    %102 = vector.shape_cast %99 : vector<8x32xbf16> to vector<1x8x32xbf16>
    tpu.vector_store %arg6[%c0_38, %c0_39, %c0_40], %102 {strides = array<i32>} : memref<1x8x32xbf16, #tpu.memory_space<vmem>>, vector<1x8x32xbf16>,
    return
  }
  func.func @transform_0(%arg0: i32, %arg1: i32) -> (i32, i32, i32) {
    %c0_i32 = arith.constant 0 : i32
    %c0_i32_0 = arith.constant 0 : i32
    return %arg0, %arg1, %c0_i32 : i32, i32, i32
  }
  func.func @transform_1(%arg0: i32, %arg1: i32) -> (i32, i32, i32) {
    %c0_i32 = arith.constant 0 : i32
    %c0_i32_0 = arith.constant 0 : i32
    %c0_i32_1 = arith.constant 0 : i32
    return %arg0, %c0_i32, %c0_i32_0 : i32, i32, i32
  }
  func.func @transform_2(%arg0: i32, %arg1: i32) -> (i32, i32, i32) {
    %c0_i32 = arith.constant 0 : i32
    %c0_i32_0 = arith.constant 0 : i32
    %c0_i32_1 = arith.constant 0 : i32
    return %arg0, %c0_i32, %c0_i32_0 : i32, i32, i32
  }
  func.func @transform_3(%arg0: i32, %arg1: i32) -> (i32, i32, i32) {
    %c0_i32 = arith.constant 0 : i32
    %c0_i32_0 = arith.constant 0 : i32
    %c0_i32_1 = arith.constant 0 : i32
    return %arg0, %c0_i32, %c0_i32_0 : i32, i32, i32
  }
  func.func @transform_4(%arg0: i32, %arg1: i32) -> (i32, i32, i32) {
    %c0_i32 = arith.constant 0 : i32
    %c0_i32_0 = arith.constant 0 : i32
    return %arg0, %arg1, %c0_i32 : i32, i32, i32
  }
}

module attributes {stable_mosaic.version = 11 : i64} {
  func.func @_linear_resident_kernel(%arg0: i32, %arg1: memref<16x32xbf16, #tpu.memory_space<vmem>>, %arg2: memref<32x32xbf16, #tpu.memory_space<vmem>>, %arg3: memref<1x32xf32, #tpu.memory_space<vmem>>, %arg4: memref<16x32xbf16, #tpu.memory_space<vmem>>) attributes {dimension_semantics = [#tpu.dimension_semantics<parallel>], iteration_bounds = array<i64: 1>, scalar_prefetch = 0 : i64, scratch_operands = 0 : i64, tpu.core_type = #tpu.core_type<tc>, window_params = [{transform_indices = @transform_0, window_bounds = array<i64: 16, 32>}, {pipeline_mode = #tpu.pipeline_mode<synchronous>, transform_indices = @transform_1, window_bounds = array<i64: 32, 32>}, {pipeline_mode = #tpu.pipeline_mode<synchronous>, transform_indices = @transform_2, window_bounds = array<i64: 1, 32>}, {transform_indices = @transform_3, window_bounds = array<i64: 16, 32>}]} {
    %c0 = arith.constant 0 : index
    %c0_0 = arith.constant 0 : index
    %0 = vector.load %arg1[%c0, %c0_0] : memref<16x32xbf16, #tpu.memory_space<vmem>>, vector<16x32xbf16>
    %c0_1 = arith.constant 0 : index
    %c0_2 = arith.constant 0 : index
    %1 = vector.load %arg2[%c0_1, %c0_2] : memref<32x32xbf16, #tpu.memory_space<vmem>>, vector<32x32xbf16>
    %cst = arith.constant dense<0.000000e+00> : vector<16x32xf32>
    %2 = tpu.matmul %0, %1, %cst {dimension_numbers = #tpu.dot_dimension_numbers<[1], [0], [0], [1], [0, 0, 1, 1], [], []>} : vector<16x32xbf16>, vector<32x32xbf16>, vector<16x32xf32> -> vector<16x32xf32>
    %c0_3 = arith.constant 0 : index
    %c0_4 = arith.constant 0 : index
    %3 = vector.load %arg3[%c0_3, %c0_4] : memref<1x32xf32, #tpu.memory_space<vmem>>, vector<1x32xf32>
    %4 = vector.broadcast %3 : vector<1x32xf32> to vector<16x32xf32>
    %5 = arith.addf %2, %4 : vector<16x32xf32>
    %6 = arith.truncf %5 : vector<16x32xf32> to vector<16x32xbf16>
    %c0_5 = arith.constant 0 : index
    %c0_6 = arith.constant 0 : index
    %7 = vector.load %arg4[%c0_5, %c0_6] : memref<16x32xbf16, #tpu.memory_space<vmem>>, vector<16x32xbf16>
    tpu.vector_store %arg4[%c0_5, %c0_6], %6 {strides = array<i32>} : memref<16x32xbf16, #tpu.memory_space<vmem>>, vector<16x32xbf16>,
    return
  }
  func.func @transform_0(%arg0: i32) -> (i32, i32) {
    %c0_i32 = arith.constant 0 : i32
    %c0_i32_0 = arith.constant 0 : i32
    return %arg0, %c0_i32 : i32, i32
  }
  func.func @transform_1(%arg0: i32) -> (i32, i32) {
    %c0_i32 = arith.constant 0 : i32
    %c0_i32_0 = arith.constant 0 : i32
    %c0_i32_1 = arith.constant 0 : i32
    return %c0_i32, %c0_i32_0 : i32, i32
  }
  func.func @transform_2(%arg0: i32) -> (i32, i32) {
    %c0_i32 = arith.constant 0 : i32
    %c0_i32_0 = arith.constant 0 : i32
    %c0_i32_1 = arith.constant 0 : i32
    return %c0_i32, %c0_i32_0 : i32, i32
  }
  func.func @transform_3(%arg0: i32) -> (i32, i32) {
    %c0_i32 = arith.constant 0 : i32
    %c0_i32_0 = arith.constant 0 : i32
    return %arg0, %c0_i32 : i32, i32
  }
}

module attributes {stable_mosaic.version = 11 : i64} {
  func.func @_mha_kernel(%arg0: i32, %arg1: i32, %arg2: memref<1x8x32xbf16, #tpu.memory_space<vmem>>, %arg3: memref<1x8x32xbf16, #tpu.memory_space<vmem>>, %arg4: memref<1x8x32xbf16, #tpu.memory_space<vmem>>, %arg5: memref<1x1x8xf32, #tpu.memory_space<vmem>>, %arg6: memref<1x8x32xbf16, #tpu.memory_space<vmem>>, %arg7: memref<8x32xf32, #tpu.memory_space<vmem>>) attributes {dimension_semantics = [#tpu.dimension_semantics<parallel>, #tpu.dimension_semantics<parallel>], iteration_bounds = array<i64: 2, 1>, scalar_prefetch = 0 : i64, scratch_operands = 1 : i64, tpu.core_type = #tpu.core_type<tc>, window_params = [{transform_indices = @transform_0, window_bounds = array<i64: 1, 8, 32>}, {transform_indices = @transform_1, window_bounds = array<i64: 1, 8, 32>}, {transform_indices = @transform_2, window_bounds = array<i64: 1, 8, 32>}, {transform_indices = @transform_3, window_bounds = array<i64: 1, 1, 8>}, {transform_indices = @transform_4, window_bounds = array<i64: 1, 8, 32>}]} {
    %c0 = arith.constant 0 : index
    %c0_0 = arith.constant 0 : index
    %c0_1 = arith.constant 0 : index
    %0 = vector.load %arg2[%c0, %c0_0, %c0_1] : memref<1x8x32xbf16, #tpu.memory_space<vmem>>, vector<1x8x32xbf16>
    %1 = vector.shape_cast %0 : vector<1x8x32xbf16> to vector<8x32xbf16>
    %c0_2 = arith.constant 0 : index
    %c0_3 = arith.constant 0 : index
    %c0_4 = arith.constant 0 : index
    %2 = vector.load %arg3[%c0_2, %c0_3, %c0_4] : memref<1x8x32xbf16, #tpu.memory_space<vmem>>, vector<1x8x32xbf16>
    %3 = vector.shape_cast %2 : vector<1x8x32xbf16> to vector<8x32xbf16>
    %c0_5 = arith.constant 0 : index
    %c0_6 = arith.constant 0 : index
    %c0_7 = arith.constant 0 : index
    %4 = vector.load %arg4[%c0_5, %c0_6, %c0_7] : memref<1x8x32xbf16, #tpu.memory_space<vmem>>, vector<1x8x32xbf16>
    %5 = vector.shape_cast %4 : vector<1x8x32xbf16> to vector<8x32xbf16>
    %c0_8 = arith.constant 0 : index
    %c0_9 = arith.constant 0 : index
    %c0_10 = arith.constant 0 : index
    %6 = vector.load %arg5[%c0_8, %c0_9, %c0_10] : memref<1x1x8xf32, #tpu.memory_space<vmem>>, vector<1x1x8xf32>
    %7 = vector.shape_cast %6 : vector<1x1x8xf32> to vector<1x8xf32>
    %8 = vector.shape_cast %7 : vector<1x8xf32> to vector<1x8xf32>
    %9 = vector.broadcast %8 : vector<1x8xf32> to vector<8x8xf32>
    %10 = vector.extract_strided_slice %1 {offsets = [0, 0], sizes = [8, 8], strides = [1, 1]} : vector<8x32xbf16> to vector<8x8xbf16>
    %11 = vector.extract_strided_slice %3 {offsets = [0, 0], sizes = [8, 8], strides = [1, 1]} : vector<8x32xbf16> to vector<8x8xbf16>
    %12 = vector.extract_strided_slice %5 {offsets = [0, 0], sizes = [8, 8], strides = [1, 1]} : vector<8x32xbf16> to vector<8x8xbf16>
    %cst = arith.constant dense<0.000000e+00> : vector<8x8xf32>
    %13 = tpu.matmul %10, %11, %cst {dimension_numbers = #tpu.dot_dimension_numbers<[1], [1], [0], [0], [0, 0, 1, 0], [], []>} : vector<8x8xbf16>, vector<8x8xbf16>, vector<8x8xf32> -> vector<8x8xf32>
    %cst_11 = arith.constant 0.353553385 : f32
    %14 = vector.broadcast %cst_11 : f32 to vector<8x8xf32>
    %15 = arith.mulf %13, %14 : vector<8x8xf32>
    %16 = arith.addf %15, %9 : vector<8x8xf32>
    %cst_12 = arith.constant dense<0xFF800000> : vector<8xf32>
    %17 = vector.multi_reduction <maximumf>, %16, %cst_12 [1] : vector<8x8xf32> to vector<8xf32>
    %18 = vector.shape_cast %17 : vector<8xf32> to vector<8x1xf32>
    %19 = vector.broadcast %18 : vector<8x1xf32> to vector<8x8xf32>
    %20 = arith.subf %16, %19 : vector<8x8xf32>
    %21 = math.exp %20 : vector<8x8xf32>
    %cst_13 = arith.constant dense<0.000000e+00> : vector<8xf32>
    %22 = vector.multi_reduction <add>, %21, %cst_13 [1] : vector<8x8xf32> to vector<8xf32>
    %23 = vector.shape_cast %22 : vector<8xf32> to vector<8x1xf32>
    %24 = tpu.reciprocal %23 {approx = true} : vector<8x1xf32> -> vector<8x1xf32>
    %25 = vector.broadcast %24 : vector<8x1xf32> to vector<8x8xf32>
    %26 = arith.mulf %21, %25 : vector<8x8xf32>
    %27 = arith.truncf %26 : vector<8x8xf32> to vector<8x8xbf16>
    %cst_14 = arith.constant dense<0.000000e+00> : vector<8x8xf32>
    %28 = tpu.matmul %27, %12, %cst_14 {dimension_numbers = #tpu.dot_dimension_numbers<[1], [0], [0], [1], [0, 0, 1, 1], [], []>} : vector<8x8xbf16>, vector<8x8xbf16>, vector<8x8xf32> -> vector<8x8xf32>
    %c0_15 = arith.constant 0 : index
    %c0_16 = arith.constant 0 : index
    %29 = vector.load %arg7[%c0_15, %c0_16] : memref<8x32xf32, #tpu.memory_space<vmem>>, vector<8x8xf32>
    tpu.vector_store %arg7[%c0_15, %c0_16], %28 {strides = array<i32>} : memref<8x32xf32, #tpu.memory_space<vmem>>, vector<8x8xf32>,
    %30 = vector.extract_strided_slice %1 {offsets = [0, 8], sizes = [8, 8], strides = [1, 1]} : vector<8x32xbf16> to vector<8x8xbf16>
    %31 = vector.extract_strided_slice %3 {offsets = [0, 8], sizes = [8, 8], strides = [1, 1]} : vector<8x32xbf16> to vector<8x8xbf16>
    %32 = vector.extract_strided_slice %5 {offsets = [0, 8], sizes = [8, 8], strides = [1, 1]} : vector<8x32xbf16> to vector<8x8xbf16>
    %cst_17 = arith.constant dense<0.000000e+00> : vector<8x8xf32>
    %33 = tpu.matmul %30, %31, %cst_17 {dimension_numbers = #tpu.dot_dimension_numbers<[1], [1], [0], [0], [0, 0, 1, 0], [], []>} : vector<8x8xbf16>, vector<8x8xbf16>, vector<8x8xf32> -> vector<8x8xf32>
    %cst_18 = arith.constant 0.353553385 : f32
    %34 = vector.broadcast %cst_18 : f32 to vector<8x8xf32>
    %35 = arith.mulf %33, %34 : vector<8x8xf32>
    %36 = arith.addf %35, %9 : vector<8x8xf32>
    %cst_19 = arith.constant dense<0xFF800000> : vector<8xf32>
    %37 = vector.multi_reduction <maximumf>, %36, %cst_19 [1] : vector<8x8xf32> to vector<8xf32>
    %38 = vector.shape_cast %37 : vector<8xf32> to vector<8x1xf32>
    %39 = vector.broadcast %38 : vector<8x1xf32> to vector<8x8xf32>
    %40 = arith.subf %36, %39 : vector<8x8xf32>
    %41 = math.exp %40 : vector<8x8xf32>
    %cst_20 = arith.constant dense<0.000000e+00> : vector<8xf32>
    %42 = vector.multi_reduction <add>, %41, %cst_20 [1] : vector<8x8xf32> to vector<8xf32>
    %43 = vector.shape_cast %42 : vector<8xf32> to vector<8x1xf32>
    %44 = tpu.reciprocal %43 {approx = true} : vector<8x1xf32> -> vector<8x1xf32>
    %45 = vector.broadcast %44 : vector<8x1xf32> to vector<8x8xf32>
    %46 = arith.mulf %41, %45 : vector<8x8xf32>
    %47 = arith.truncf %46 : vector<8x8xf32> to vector<8x8xbf16>
    %cst_21 = arith.constant dense<0.000000e+00> : vector<8x8xf32>
    %48 = tpu.matmul %47, %32, %cst_21 {dimension_numbers = #tpu.dot_dimension_numbers<[1], [0], [0], [1], [0, 0, 1, 1], [], []>} : vector<8x8xbf16>, vector<8x8xbf16>, vector<8x8xf32> -> vector<8x8xf32>
    %c0_22 = arith.constant 0 : index
    %c8 = arith.constant 8 : index
    %49 = vector.load %arg7[%c0_22, %c8] : memref<8x32xf32, #tpu.memory_space<vmem>>, vector<8x8xf32>
    tpu.vector_store %arg7[%c0_22, %c8], %48 {strides = array<i32>} : memref<8x32xf32, #tpu.memory_space<vmem>>, vector<8x8xf32>,
    %50 = vector.extract_strided_slice %1 {offsets = [0, 16], sizes = [8, 8], strides = [1, 1]} : vector<8x32xbf16> to vector<8x8xbf16>
    %51 = vector.extract_strided_slice %3 {offsets = [0, 16], sizes = [8, 8], strides = [1, 1]} : vector<8x32xbf16> to vector<8x8xbf16>
    %52 = vector.extract_strided_slice %5 {offsets = [0, 16], sizes = [8, 8], strides = [1, 1]} : vector<8x32xbf16> to vector<8x8xbf16>
    %cst_23 = arith.constant dense<0.000000e+00> : vector<8x8xf32>
    %53 = tpu.matmul %50, %51, %cst_23 {dimension_numbers = #tpu.dot_dimension_numbers<[1], [1], [0], [0], [0, 0, 1, 0], [], []>} : vector<8x8xbf16>, vector<8x8xbf16>, vector<8x8xf32> -> vector<8x8xf32>
    %cst_24 = arith.constant 0.353553385 : f32
    %54 = vector.broadcast %cst_24 : f32 to vector<8x8xf32>
    %55 = arith.mulf %53, %54 : vector<8x8xf32>
    %56 = arith.addf %55, %9 : vector<8x8xf32>
    %cst_25 = arith.constant dense<0xFF800000> : vector<8xf32>
    %57 = vector.multi_reduction <maximumf>, %56, %cst_25 [1] : vector<8x8xf32> to vector<8xf32>
    %58 = vector.shape_cast %57 : vector<8xf32> to vector<8x1xf32>
    %59 = vector.broadcast %58 : vector<8x1xf32> to vector<8x8xf32>
    %60 = arith.subf %56, %59 : vector<8x8xf32>
    %61 = math.exp %60 : vector<8x8xf32>
    %cst_26 = arith.constant dense<0.000000e+00> : vector<8xf32>
    %62 = vector.multi_reduction <add>, %61, %cst_26 [1] : vector<8x8xf32> to vector<8xf32>
    %63 = vector.shape_cast %62 : vector<8xf32> to vector<8x1xf32>
    %64 = tpu.reciprocal %63 {approx = true} : vector<8x1xf32> -> vector<8x1xf32>
    %65 = vector.broadcast %64 : vector<8x1xf32> to vector<8x8xf32>
    %66 = arith.mulf %61, %65 : vector<8x8xf32>
    %67 = arith.truncf %66 : vector<8x8xf32> to vector<8x8xbf16>
    %cst_27 = arith.constant dense<0.000000e+00> : vector<8x8xf32>
    %68 = tpu.matmul %67, %52, %cst_27 {dimension_numbers = #tpu.dot_dimension_numbers<[1], [0], [0], [1], [0, 0, 1, 1], [], []>} : vector<8x8xbf16>, vector<8x8xbf16>, vector<8x8xf32> -> vector<8x8xf32>
    %c0_28 = arith.constant 0 : index
    %c16 = arith.constant 16 : index
    %69 = vector.load %arg7[%c0_28, %c16] : memref<8x32xf32, #tpu.memory_space<vmem>>, vector<8x8xf32>
    tpu.vector_store %arg7[%c0_28, %c16], %68 {strides = array<i32>} : memref<8x32xf32, #tpu.memory_space<vmem>>, vector<8x8xf32>,
    %70 = vector.extract_strided_slice %1 {offsets = [0, 24], sizes = [8, 8], strides = [1, 1]} : vector<8x32xbf16> to vector<8x8xbf16>
    %71 = vector.extract_strided_slice %3 {offsets = [0, 24], sizes = [8, 8], strides = [1, 1]} : vector<8x32xbf16> to vector<8x8xbf16>
    %72 = vector.extract_strided_slice %5 {offsets = [0, 24], sizes = [8, 8], strides = [1, 1]} : vector<8x32xbf16> to vector<8x8xbf16>
    %cst_29 = arith.constant dense<0.000000e+00> : vector<8x8xf32>
    %73 = tpu.matmul %70, %71, %cst_29 {dimension_numbers = #tpu.dot_dimension_numbers<[1], [1], [0], [0], [0, 0, 1, 0], [], []>} : vector<8x8xbf16>, vector<8x8xbf16>, vector<8x8xf32> -> vector<8x8xf32>
    %cst_30 = arith.constant 0.353553385 : f32
    %74 = vector.broadcast %cst_30 : f32 to vector<8x8xf32>
    %75 = arith.mulf %73, %74 : vector<8x8xf32>
    %76 = arith.addf %75, %9 : vector<8x8xf32>
    %cst_31 = arith.constant dense<0xFF800000> : vector<8xf32>
    %77 = vector.multi_reduction <maximumf>, %76, %cst_31 [1] : vector<8x8xf32> to vector<8xf32>
    %78 = vector.shape_cast %77 : vector<8xf32> to vector<8x1xf32>
    %79 = vector.broadcast %78 : vector<8x1xf32> to vector<8x8xf32>
    %80 = arith.subf %76, %79 : vector<8x8xf32>
    %81 = math.exp %80 : vector<8x8xf32>
    %cst_32 = arith.constant dense<0.000000e+00> : vector<8xf32>
    %82 = vector.multi_reduction <add>, %81, %cst_32 [1] : vector<8x8xf32> to vector<8xf32>
    %83 = vector.shape_cast %82 : vector<8xf32> to vector<8x1xf32>
    %84 = tpu.reciprocal %83 {approx = true} : vector<8x1xf32> -> vector<8x1xf32>
    %85 = vector.broadcast %84 : vector<8x1xf32> to vector<8x8xf32>
    %86 = arith.mulf %81, %85 : vector<8x8xf32>
    %87 = arith.truncf %86 : vector<8x8xf32> to vector<8x8xbf16>
    %cst_33 = arith.constant dense<0.000000e+00> : vector<8x8xf32>
    %88 = tpu.matmul %87, %72, %cst_33 {dimension_numbers = #tpu.dot_dimension_numbers<[1], [0], [0], [1], [0, 0, 1, 1], [], []>} : vector<8x8xbf16>, vector<8x8xbf16>, vector<8x8xf32> -> vector<8x8xf32>
    %c0_34 = arith.constant 0 : index
    %c24 = arith.constant 24 : index
    %89 = vector.load %arg7[%c0_34, %c24] : memref<8x32xf32, #tpu.memory_space<vmem>>, vector<8x8xf32>
    tpu.vector_store %arg7[%c0_34, %c24], %88 {strides = array<i32>} : memref<8x32xf32, #tpu.memory_space<vmem>>, vector<8x8xf32>,
    %c0_35 = arith.constant 0 : index
    %c0_36 = arith.constant 0 : index
    %90 = vector.load %arg7[%c0_35, %c0_36] : memref<8x32xf32, #tpu.memory_space<vmem>>, vector<8x32xf32>
    %91 = arith.truncf %90 : vector<8x32xf32> to vector<8x32xbf16>
    %c0_37 = arith.constant 0 : index
    %c0_38 = arith.constant 0 : index
    %c0_39 = arith.constant 0 : index
    %92 = vector.load %arg6[%c0_37, %c0_38, %c0_39] : memref<1x8x32xbf16, #tpu.memory_space<vmem>>, vector<1x8x32xbf16>
    %93 = vector.shape_cast %92 : vector<1x8x32xbf16> to vector<8x32xbf16>
    %94 = vector.shape_cast %91 : vector<8x32xbf16> to vector<1x8x32xbf16>
    tpu.vector_store %arg6[%c0_37, %c0_38, %c0_39], %94 {strides = array<i32>} : memref<1x8x32xbf16, #tpu.memory_space<vmem>>, vector<1x8x32xbf16>,
    return
  }
  func.func @transform_0(%arg0: i32, %arg1: i32) -> (i32, i32, i32) {
    %c0_i32 = arith.constant 0 : i32
    %c0_i32_0 = arith.constant 0 : i32
    return %arg0, %arg1, %c0_i32 : i32, i32, i32
  }
  func.func @transform_1(%arg0: i32, %arg1: i32) -> (i32, i32, i32) {
    %c0_i32 = arith.constant 0 : i32
    %c0_i32_0 = arith.constant 0 : i32
    %c0_i32_1 = arith.constant 0 : i32
    return %arg0, %c0_i32, %c0_i32_0 : i32, i32, i32
  }
  func.func @transform_2(%arg0: i32, %arg1: i32) -> (i32, i32, i32) {
    %c0_i32 = arith.constant 0 : i32
    %c0_i32_0 = arith.constant 0 : i32
    %c0_i32_1 = arith.constant 0 : i32
    return %arg0, %c0_i32, %c0_i32_0 : i32, i32, i32
  }
  func.func @transform_3(%arg0: i32, %arg1: i32) -> (i32, i32, i32) {
    %c0_i32 = arith.constant 0 : i32
    %c0_i32_0 = arith.constant 0 : i32
    %c0_i32_1 = arith.constant 0 : i32
    return %arg0, %c0_i32, %c0_i32_0 : i32, i32, i32
  }
  func.func @transform_4(%arg0: i32, %arg1: i32) -> (i32, i32, i32) {
    %c0_i32 = arith.constant 0 : i32
    %c0_i32_0 = arith.constant 0 : i32
    return %arg0, %arg1, %c0_i32 : i32, i32, i32
  }
}

module attributes {stable_mosaic.version = 11 : i64} {
  func.func @_linear_ln_resident_kernel(%arg0: i32, %arg1: memref<16x64xbf16, #tpu.memory_space<vmem>>, %arg2: memref<64x32xbf16, #tpu.memory_space<vmem>>, %arg3: memref<1x32xf32, #tpu.memory_space<vmem>>, %arg4: memref<16x32xbf16, #tpu.memory_space<vmem>>, %arg5: memref<1x32xf32, #tpu.memory_space<vmem>>, %arg6: memref<1x32xf32, #tpu.memory_space<vmem>>, %arg7: memref<16x32xbf16, #tpu.memory_space<vmem>>) attributes {dimension_semantics = [#tpu.dimension_semantics<parallel>], iteration_bounds = array<i64: 1>, scalar_prefetch = 0 : i64, scratch_operands = 0 : i64, tpu.core_type = #tpu.core_type<tc>, window_params = [{transform_indices = @transform_0, window_bounds = array<i64: 16, 64>}, {pipeline_mode = #tpu.pipeline_mode<synchronous>, transform_indices = @transform_1, window_bounds = array<i64: 64, 32>}, {pipeline_mode = #tpu.pipeline_mode<synchronous>, transform_indices = @transform_2, window_bounds = array<i64: 1, 32>}, {transform_indices = @transform_3, window_bounds = array<i64: 16, 32>}, {pipeline_mode = #tpu.pipeline_mode<synchronous>, transform_indices = @transform_4, window_bounds = array<i64: 1, 32>}, {pipeline_mode = #tpu.pipeline_mode<synchronous>, transform_indices = @transform_5, window_bounds = array<i64: 1, 32>}, {transform_indices = @transform_6, window_bounds = array<i64: 16, 32>}]} {
    %c0 = arith.constant 0 : index
    %c0_0 = arith.constant 0 : index
    %0 = vector.load %arg1[%c0, %c0_0] : memref<16x64xbf16, #tpu.memory_space<vmem>>, vector<16x64xbf16>
    %c0_1 = arith.constant 0 : index
    %c0_2 = arith.constant 0 : index
    %1 = vector.load %arg2[%c0_1, %c0_2] : memref<64x32xbf16, #tpu.memory_space<vmem>>, vector<64x32xbf16>
    %cst = arith.constant dense<0.000000e+00> : vector<16x32xf32>
    %2 = tpu.matmul %0, %1, %cst {dimension_numbers = #tpu.dot_dimension_numbers<[1], [0], [0], [1], [0, 0, 1, 1], [], []>} : vector<16x64xbf16>, vector<64x32xbf16>, vector<16x32xf32> -> vector<16x32xf32>
    %c0_3 = arith.constant 0 : index
    %c0_4 = arith.constant 0 : index
    %3 = vector.load %arg3[%c0_3, %c0_4] : memref<1x32xf32, #tpu.memory_space<vmem>>, vector<1x32xf32>
    %4 = vector.broadcast %3 : vector<1x32xf32> to vector<16x32xf32>
    %5 = arith.addf %2, %4 : vector<16x32xf32>
    %c0_5 = arith.constant 0 : index
    %c0_6 = arith.constant 0 : index
    %6 = vector.load %arg4[%c0_5, %c0_6] : memref<16x32xbf16, #tpu.memory_space<vmem>>, vector<16x32xbf16>
    %7 = arith.extf %6 : vector<16x32xbf16> to vector<16x32xf32>
    %8 = arith.addf %5, %7 : vector<16x32xf32>
    %cst_7 = arith.constant dense<0.000000e+00> : vector<16xf32>
    %9 = vector.multi_reduction <add>, %8, %cst_7 [1] : vector<16x32xf32> to vector<16xf32>
    %10 = vector.shape_cast %9 : vector<16xf32> to vector<16x1xf32>
    %cst_8 = arith.constant 3.200000e+01 : f32
    %11 = vector.broadcast %cst_8 : f32 to vector<16x1xf32>
    %12 = arith.divf %10, %11 : vector<16x1xf32>
    %13 = vector.broadcast %12 : vector<16x1xf32> to vector<16x32xf32>
    %14 = arith.subf %8, %13 : vector<16x32xf32>
    %15 = arith.mulf %14, %14 : vector<16x32xf32>
    %cst_9 = arith.constant dense<0.000000e+00> : vector<16xf32>
    %16 = vector.multi_reduction <add>, %15, %cst_9 [1] : vector<16x32xf32> to vector<16xf32>
    %17 = vector.shape_cast %16 : vector<16xf32> to vector<16x1xf32>
    %cst_10 = arith.constant 3.200000e+01 : f32
    %18 = vector.broadcast %cst_10 : f32 to vector<16x1xf32>
    %19 = arith.divf %17, %18 : vector<16x1xf32>
    %20 = vector.broadcast %12 : vector<16x1xf32> to vector<16x32xf32>
    %21 = arith.subf %8, %20 : vector<16x32xf32>
    %cst_11 = arith.constant 9.99999974E-6 : f32
    %22 = vector.broadcast %cst_11 : f32 to vector<16x1xf32>
    %23 = arith.addf %19, %22 : vector<16x1xf32>
    %24 = math.rsqrt %23 : vector<16x1xf32>
    %25 = vector.broadcast %24 : vector<16x1xf32> to vector<16x32xf32>
    %26 = arith.mulf %21, %25 : vector<16x32xf32>
    %c0_12 = arith.constant 0 : index
    %c0_13 = arith.constant 0 : index
    %27 = vector.load %arg5[%c0_12, %c0_13] : memref<1x32xf32, #tpu.memory_space<vmem>>, vector<1x32xf32>
    %28 = vector.broadcast %27 : vector<1x32xf32> to vector<16x32xf32>
    %29 = arith.mulf %26, %28 : vector<16x32xf32>
    %c0_14 = arith.constant 0 : index
    %c0_15 = arith.constant 0 : index
    %30 = vector.load %arg6[%c0_14, %c0_15] : memref<1x32xf32, #tpu.memory_space<vmem>>, vector<1x32xf32>
    %31 = vector.broadcast %30 : vector<1x32xf32> to vector<16x32xf32>
    %32 = arith.addf %29, %31 : vector<16x32xf32>
    %33 = arith.truncf %32 : vector<16x32xf32> to vector<16x32xbf16>
    %c0_16 = arith.constant 0 : index
    %c0_17 = arith.constant 0 : index
    %34 = vector.load %arg7[%c0_16, %c0_17] : memref<16x32xbf16, #tpu.memory_space<vmem>>, vector<16x32xbf16>
    tpu.vector_store %arg7[%c0_16, %c0_17], %33 {strides = array<i32>} : memref<16x32xbf16, #tpu.memory_space<vmem>>, vector<16x32xbf16>,
    return
  }
  func.func @transform_0(%arg0: i32) -> (i32, i32) {
    %c0_i32 = arith.constant 0 : i32
    %c0_i32_0 = arith.constant 0 : i32
    return %arg0, %c0_i32 : i32, i32
  }
  func.func @transform_1(%arg0: i32) -> (i32, i32) {
    %c0_i32 = arith.constant 0 : i32
    %c0_i32_0 = arith.constant 0 : i32
    %c0_i32_1 = arith.constant 0 : i32
    return %c0_i32, %c0_i32_0 : i32, i32
  }
  func.func @transform_2(%arg0: i32) -> (i32, i32) {
    %c0_i32 = arith.constant 0 : i32
    %c0_i32_0 = arith.constant 0 : i32
    %c0_i32_1 = arith.constant 0 : i32
    return %c0_i32, %c0_i32_0 : i32, i32
  }
  func.func @transform_3(%arg0: i32) -> (i32, i32) {
    %c0_i32 = arith.constant 0 : i32
    %c0_i32_0 = arith.constant 0 : i32
    return %arg0, %c0_i32 : i32, i32
  }
  func.func @transform_4(%arg0: i32) -> (i32, i32) {
    %c0_i32 = arith.constant 0 : i32
    %c0_i32_0 = arith.constant 0 : i32
    %c0_i32_1 = arith.constant 0 : i32
    return %c0_i32, %c0_i32_0 : i32, i32
  }
  func.func @transform_5(%arg0: i32) -> (i32, i32) {
    %c0_i32 = arith.constant 0 : i32
    %c0_i32_0 = arith.constant 0 : i32
    %c0_i32_1 = arith.constant 0 : i32
    return %c0_i32, %c0_i32_0 : i32, i32
  }
  func.func @transform_6(%arg0: i32) -> (i32, i32) {
    %c0_i32 = arith.constant 0 : i32
    %c0_i32_0 = arith.constant 0 : i32
    return %arg0, %c0_i32 : i32, i32
  }
}

module attributes {stable_mosaic.version = 11 : i64} {
  func.func @_linear_resident_kernel(%arg0: i32, %arg1: memref<16x32xbf16, #tpu.memory_space<vmem>>, %arg2: memref<32x64xbf16, #tpu.memory_space<vmem>>, %arg3: memref<1x64xf32, #tpu.memory_space<vmem>>, %arg4: memref<16x64xbf16, #tpu.memory_space<vmem>>) attributes {dimension_semantics = [#tpu.dimension_semantics<parallel>], iteration_bounds = array<i64: 1>, scalar_prefetch = 0 : i64, scratch_operands = 0 : i64, tpu.core_type = #tpu.core_type<tc>, window_params = [{transform_indices = @transform_0, window_bounds = array<i64: 16, 32>}, {pipeline_mode = #tpu.pipeline_mode<synchronous>, transform_indices = @transform_1, window_bounds = array<i64: 32, 64>}, {pipeline_mode = #tpu.pipeline_mode<synchronous>, transform_indices = @transform_2, window_bounds = array<i64: 1, 64>}, {transform_indices = @transform_3, window_bounds = array<i64: 16, 64>}]} {
    %c0 = arith.constant 0 : index
    %c0_0 = arith.constant 0 : index
    %0 = vector.load %arg1[%c0, %c0_0] : memref<16x32xbf16, #tpu.memory_space<vmem>>, vector<16x32xbf16>
    %c0_1 = arith.constant 0 : index
    %c0_2 = arith.constant 0 : index
    %1 = vector.load %arg2[%c0_1, %c0_2] : memref<32x64xbf16, #tpu.memory_space<vmem>>, vector<32x64xbf16>
    %cst = arith.constant dense<0.000000e+00> : vector<16x64xf32>
    %2 = tpu.matmul %0, %1, %cst {dimension_numbers = #tpu.dot_dimension_numbers<[1], [0], [0], [1], [0, 0, 1, 1], [], []>} : vector<16x32xbf16>, vector<32x64xbf16>, vector<16x64xf32> -> vector<16x64xf32>
    %c0_3 = arith.constant 0 : index
    %c0_4 = arith.constant 0 : index
    %3 = vector.load %arg3[%c0_3, %c0_4] : memref<1x64xf32, #tpu.memory_space<vmem>>, vector<1x64xf32>
    %4 = vector.broadcast %3 : vector<1x64xf32> to vector<16x64xf32>
    %5 = arith.addf %2, %4 : vector<16x64xf32>
    %6 = arith.mulf %5, %5 : vector<16x64xf32>
    %7 = arith.mulf %5, %6 : vector<16x64xf32>
    %cst_5 = arith.constant 4.471500e-02 : f32
    %8 = vector.broadcast %cst_5 : f32 to vector<16x64xf32>
    %9 = arith.mulf %8, %7 : vector<16x64xf32>
    %10 = arith.addf %5, %9 : vector<16x64xf32>
    %cst_6 = arith.constant 0.797884583 : f32
    %11 = vector.broadcast %cst_6 : f32 to vector<16x64xf32>
    %12 = arith.mulf %11, %10 : vector<16x64xf32>
    %13 = math.tanh %12 : vector<16x64xf32>
    %cst_7 = arith.constant 1.000000e+00 : f32
    %14 = vector.broadcast %cst_7 : f32 to vector<16x64xf32>
    %15 = arith.addf %14, %13 : vector<16x64xf32>
    %cst_8 = arith.constant 5.000000e-01 : f32
    %16 = vector.broadcast %cst_8 : f32 to vector<16x64xf32>
    %17 = arith.mulf %16, %15 : vector<16x64xf32>
    %18 = arith.mulf %5, %17 : vector<16x64xf32>
    %19 = arith.truncf %18 : vector<16x64xf32> to vector<16x64xbf16>
    %c0_9 = arith.constant 0 : index
    %c0_10 = arith.constant 0 : index
    %20 = vector.load %arg4[%c0_9, %c0_10] : memref<16x64xbf16, #tpu.memory_space<vmem>>, vector<16x64xbf16>
    tpu.vector_store %arg4[%c0_9, %c0_10], %19 {strides = array<i32>} : memref<16x64xbf16, #tpu.memory_space<vmem>>, vector<16x64xbf16>,
    return
  }
  func.func @transform_0(%arg0: i32) -> (i32, i32) {
    %c0_i32 = arith.constant 0 : i32
    %c0_i32_0 = arith.constant 0 : i32
    return %arg0, %c0_i32 : i32, i32
  }
  func.func @transform_1(%arg0: i32) -> (i32, i32) {
    %c0_i32 = arith.constant 0 : i32
    %c0_i32_0 = arith.constant 0 : i32
    %c0_i32_1 = arith.constant 0 : i32
    return %c0_i32, %c0_i32_0 : i32, i32
  }
  func.func @transform_2(%arg0: i32) -> (i32, i32) {
    %c0_i32 = arith.constant 0 : i32
    %c0_i32_0 = arith.constant 0 : i32
    %c0_i32_1 = arith.constant 0 : i32
    return %c0_i32, %c0_i32_0 : i32, i32
  }
  func.func @transform_3(%arg0: i32) -> (i32, i32) {
    %c0_i32 = arith.constant 0 : i32
    %c0_i32_0 = arith.constant 0 : i32
    return %arg0, %c0_i32 : i32, i32
  }
}

module attributes {stable_mosaic.version = 11 : i64} {
  func.func @_linear_resident_kernel(%arg0: i32, %arg1: memref<16x32xbf16, #tpu.memory_space<vmem>>, %arg2: memref<32x64xbf16, #tpu.memory_space<vmem>>, %arg3: memref<1x64xf32, #tpu.memory_space<vmem>>, %arg4: memref<16x64xbf16, #tpu.memory_space<vmem>>) attributes {dimension_semantics = [#tpu.dimension_semantics<parallel>], iteration_bounds = array<i64: 1>, scalar_prefetch = 0 : i64, scratch_operands = 0 : i64, tpu.core_type = #tpu.core_type<tc>, window_params = [{transform_indices = @transform_0, window_bounds = array<i64: 16, 32>}, {pipeline_mode = #tpu.pipeline_mode<synchronous>, transform_indices = @transform_1, window_bounds = array<i64: 32, 64>}, {pipeline_mode = #tpu.pipeline_mode<synchronous>, transform_indices = @transform_2, window_bounds = array<i64: 1, 64>}, {transform_indices = @transform_3, window_bounds = array<i64: 16, 64>}]} {
    %c0 = arith.constant 0 : index
    %c0_0 = arith.constant 0 : index
    %0 = vector.load %arg1[%c0, %c0_0] : memref<16x32xbf16, #tpu.memory_space<vmem>>, vector<16x32xbf16>
    %c0_1 = arith.constant 0 : index
    %c0_2 = arith.constant 0 : index
    %1 = vector.load %arg2[%c0_1, %c0_2] : memref<32x64xbf16, #tpu.memory_space<vmem>>, vector<32x64xbf16>
    %cst = arith.constant dense<0.000000e+00> : vector<16x64xf32>
    %2 = tpu.matmul %0, %1, %cst {dimension_numbers = #tpu.dot_dimension_numbers<[1], [0], [0], [1], [0, 0, 1, 1], [], []>} : vector<16x32xbf16>, vector<32x64xbf16>, vector<16x64xf32> -> vector<16x64xf32>
    %c0_3 = arith.constant 0 : index
    %c0_4 = arith.constant 0 : index
    %3 = vector.load %arg3[%c0_3, %c0_4] : memref<1x64xf32, #tpu.memory_space<vmem>>, vector<1x64xf32>
    %4 = vector.broadcast %3 : vector<1x64xf32> to vector<16x64xf32>
    %5 = arith.addf %2, %4 : vector<16x64xf32>
    %6 = arith.truncf %5 : vector<16x64xf32> to vector<16x64xbf16>
    %c0_5 = arith.constant 0 : index
    %c0_6 = arith.constant 0 : index
    %7 = vector.load %arg4[%c0_5, %c0_6] : memref<16x64xbf16, #tpu.memory_space<vmem>>, vector<16x64xbf16>
    tpu.vector_store %arg4[%c0_5, %c0_6], %6 {strides = array<i32>} : memref<16x64xbf16, #tpu.memory_space<vmem>>, vector<16x64xbf16>,
    return
  }
  func.func @transform_0(%arg0: i32) -> (i32, i32) {
    %c0_i32 = arith.constant 0 : i32
    %c0_i32_0 = arith.constant 0 : i32
    return %arg0, %c0_i32 : i32, i32
  }
  func.func @transform_1(%arg0: i32) -> (i32, i32) {
    %c0_i32 = arith.constant 0 : i32
    %c0_i32_0 = arith.constant 0 : i32
    %c0_i32_1 = arith.constant 0 : i32
    return %c0_i32, %c0_i32_0 : i32, i32
  }
  func.func @transform_2(%arg0: i32) -> (i32, i32) {
    %c0_i32 = arith.constant 0 : i32
    %c0_i32_0 = arith.constant 0 : i32
    %c0_i32_1 = arith.constant 0 : i32
    return %c0_i32, %c0_i32_0 : i32, i32
  }
  func.func @transform_3(%arg0: i32) -> (i32, i32) {
    %c0_i32 = arith.constant 0 : i32
    %c0_i32_0 = arith.constant 0 : i32
    return %arg0, %c0_i32 : i32, i32
  }
}

module attributes {stable_mosaic.version = 11 : i64} {
  func.func @_linear_resident_kernel(%arg0: i32, %arg1: memref<16x32xbf16, #tpu.memory_space<vmem>>, %arg2: memref<32x64xbf16, #tpu.memory_space<vmem>>, %arg3: memref<1x64xf32, #tpu.memory_space<vmem>>, %arg4: memref<16x64xbf16, #tpu.memory_space<vmem>>) attributes {dimension_semantics = [#tpu.dimension_semantics<parallel>], iteration_bounds = array<i64: 1>, scalar_prefetch = 0 : i64, scratch_operands = 0 : i64, tpu.core_type = #tpu.core_type<tc>, window_params = [{transform_indices = @transform_0, window_bounds = array<i64: 16, 32>}, {pipeline_mode = #tpu.pipeline_mode<synchronous>, transform_indices = @transform_1, window_bounds = array<i64: 32, 64>}, {pipeline_mode = #tpu.pipeline_mode<synchronous>, transform_indices = @transform_2, window_bounds = array<i64: 1, 64>}, {transform_indices = @transform_3, window_bounds = array<i64: 16, 64>}]} {
    %c0 = arith.constant 0 : index
    %c0_0 = arith.constant 0 : index
    %0 = vector.load %arg1[%c0, %c0_0] : memref<16x32xbf16, #tpu.memory_space<vmem>>, vector<16x32xbf16>
    %c0_1 = arith.constant 0 : index
    %c0_2 = arith.constant 0 : index
    %1 = vector.load %arg2[%c0_1, %c0_2] : memref<32x64xbf16, #tpu.memory_space<vmem>>, vector<32x64xbf16>
    %cst = arith.constant dense<0.000000e+00> : vector<16x64xf32>
    %2 = tpu.matmul %0, %1, %cst {dimension_numbers = #tpu.dot_dimension_numbers<[1], [0], [0], [1], [0, 0, 1, 1], [], []>} : vector<16x32xbf16>, vector<32x64xbf16>, vector<16x64xf32> -> vector<16x64xf32>
    %c0_3 = arith.constant 0 : index
    %c0_4 = arith.constant 0 : index
    %3 = vector.load %arg3[%c0_3, %c0_4] : memref<1x64xf32, #tpu.memory_space<vmem>>, vector<1x64xf32>
    %4 = vector.broadcast %3 : vector<1x64xf32> to vector<16x64xf32>
    %5 = arith.addf %2, %4 : vector<16x64xf32>
    %6 = math.tanh %5 : vector<16x64xf32>
    %7 = arith.truncf %6 : vector<16x64xf32> to vector<16x64xbf16>
    %c0_5 = arith.constant 0 : index
    %c0_6 = arith.constant 0 : index
    %8 = vector.load %arg4[%c0_5, %c0_6] : memref<16x64xbf16, #tpu.memory_space<vmem>>, vector<16x64xbf16>
    tpu.vector_store %arg4[%c0_5, %c0_6], %7 {strides = array<i32>} : memref<16x64xbf16, #tpu.memory_space<vmem>>, vector<16x64xbf16>,
    return
  }
  func.func @transform_0(%arg0: i32) -> (i32, i32) {
    %c0_i32 = arith.constant 0 : i32
    %c0_i32_0 = arith.constant 0 : i32
    return %arg0, %c0_i32 : i32, i32
  }
  func.func @transform_1(%arg0: i32) -> (i32, i32) {
    %c0_i32 = arith.constant 0 : i32
    %c0_i32_0 = arith.constant 0 : i32
    %c0_i32_1 = arith.constant 0 : i32
    return %c0_i32, %c0_i32_0 : i32, i32
  }
  func.func @transform_2(%arg0: i32) -> (i32, i32) {
    %c0_i32 = arith.constant 0 : i32
    %c0_i32_0 = arith.constant 0 : i32
    %c0_i32_1 = arith.constant 0 : i32
    return %c0_i32, %c0_i32_0 : i32, i32
  }
  func.func @transform_3(%arg0: i32) -> (i32, i32) {
    %c0_i32 = arith.constant 0 : i32
    %c0_i32_0 = arith.constant 0 : i32
    return %arg0, %c0_i32 : i32, i32
  }
}

module attributes {stable_mosaic.version = 11 : i64} {
  func.func @_head_loss_kernel(%arg0: i32, %arg1: memref<16x64xbf16, #tpu.memory_space<vmem>>, %arg2: memref<64x128xbf16, #tpu.memory_space<vmem>>, %arg3: memref<1x128xf32, #tpu.memory_space<vmem>>, %arg4: memref<16x1xi32, #tpu.memory_space<vmem>>, %arg5: memref<16x128xf32, #tpu.memory_space<vmem>>, %arg6: memref<1x1xf32, #tpu.memory_space<vmem>>, %arg7: memref<1x1xf32, #tpu.memory_space<vmem>>, %arg8: memref<1x1xf32, #tpu.memory_space<vmem>>) attributes {dimension_semantics = [#tpu.dimension_semantics<arbitrary>], iteration_bounds = array<i64: 1>, scalar_prefetch = 0 : i64, scratch_operands = 2 : i64, tpu.core_type = #tpu.core_type<tc>, window_params = [{transform_indices = @transform_0, window_bounds = array<i64: 16, 64>}, {pipeline_mode = #tpu.pipeline_mode<synchronous>, transform_indices = @transform_1, window_bounds = array<i64: 64, 128>}, {pipeline_mode = #tpu.pipeline_mode<synchronous>, transform_indices = @transform_2, window_bounds = array<i64: 1, 128>}, {transform_indices = @transform_3, window_bounds = array<i64: 16, 1>}, {transform_indices = @transform_4, window_bounds = array<i64: 16, 128>}, {pipeline_mode = #tpu.pipeline_mode<synchronous>, transform_indices = @transform_5, window_bounds = array<i64: 1, 1>}]} {
    %c0_i32 = arith.constant 0 : i32
    %0 = arith.cmpi eq, %arg0, %c0_i32 : i32
    %1 = arith.extui %0 : i1 to i32
    %c0_i32_0 = arith.constant 0 : i32
    %2 = arith.cmpi ne, %1, %c0_i32_0 : i32
    scf.if %2 {
      %cst_35 = arith.constant 0.000000e+00 : f32
      %76 = vector.broadcast %cst_35 : f32 to vector<1x1xf32>
      %c0_36 = arith.constant 0 : index
      %c0_37 = arith.constant 0 : index
      %77 = vector.load %arg7[%c0_36, %c0_37] : memref<1x1xf32, #tpu.memory_space<vmem>>, vector<1x1xf32>
      tpu.vector_store %arg7[%c0_36, %c0_37], %76 {strides = array<i32>} : memref<1x1xf32, #tpu.memory_space<vmem>>, vector<1x1xf32>,
      %cst_38 = arith.constant 0.000000e+00 : f32
      %78 = vector.broadcast %cst_38 : f32 to vector<1x1xf32>
      %c0_39 = arith.constant 0 : index
      %c0_40 = arith.constant 0 : index
      %79 = vector.load %arg8[%c0_39, %c0_40] : memref<1x1xf32, #tpu.memory_space<vmem>>, vector<1x1xf32>
      tpu.vector_store %arg8[%c0_39, %c0_40], %78 {strides = array<i32>} : memref<1x1xf32, #tpu.memory_space<vmem>>, vector<1x1xf32>,
    } else {
    }
    %c0 = arith.constant 0 : index
    %c0_1 = arith.constant 0 : index
    %3 = vector.load %arg1[%c0, %c0_1] : memref<16x64xbf16, #tpu.memory_space<vmem>>, vector<16x64xbf16>
    %c0_2 = arith.constant 0 : index
    %c0_3 = arith.constant 0 : index
    %4 = vector.load %arg2[%c0_2, %c0_3] : memref<64x128xbf16, #tpu.memory_space<vmem>>, vector<64x128xbf16>
    %cst = arith.constant dense<0.000000e+00> : vector<16x128xf32>
    %5 = tpu.matmul %3, %4, %cst {dimension_numbers = #tpu.dot_dimension_numbers<[1], [0], [0], [1], [0, 0, 1, 1], [], []>} : vector<16x64xbf16>, vector<64x128xbf16>, vector<16x128xf32> -> vector<16x128xf32>
    %c0_4 = arith.constant 0 : index
    %c0_5 = arith.constant 0 : index
    %6 = vector.load %arg3[%c0_4, %c0_5] : memref<1x128xf32, #tpu.memory_space<vmem>>, vector<1x128xf32>
    %7 = vector.broadcast %6 : vector<1x128xf32> to vector<16x128xf32>
    %8 = arith.addf %5, %7 : vector<16x128xf32>
    %c0_6 = arith.constant 0 : index
    %c0_7 = arith.constant 0 : index
    %9 = vector.load %arg5[%c0_6, %c0_7] : memref<16x128xf32, #tpu.memory_space<vmem>>, vector<16x128xf32>
    tpu.vector_store %arg5[%c0_6, %c0_7], %8 {strides = array<i32>} : memref<16x128xf32, #tpu.memory_space<vmem>>, vector<16x128xf32>,
    %c0_8 = arith.constant 0 : index
    %c0_9 = arith.constant 0 : index
    %10 = vector.load %arg4[%c0_8, %c0_9] : memref<16x1xi32, #tpu.memory_space<vmem>>, vector<16x1xi32>
    %11 = tpu.iota {dimensions = array<i32: 1>} : vector<16x128xi32>
    %c6_i32 = arith.constant 6 : i32
    %12 = vector.broadcast %c6_i32 : i32 to vector<16x128xi32>
    %13 = arith.cmpi slt, %11, %12 : vector<16x128xi32>
    %cst_10 = arith.constant -1.000000e+30 : f32
    %14 = vector.broadcast %cst_10 : f32 to vector<16x128xf32>
    %15 = arith.select %13, %8, %14 : vector<16x128xi1>, vector<16x128xf32>
    %cst_11 = arith.constant dense<0xFF800000> : vector<16xf32>
    %16 = vector.multi_reduction <maximumf>, %15, %cst_11 [1] : vector<16x128xf32> to vector<16xf32>
    %17 = vector.shape_cast %16 : vector<16xf32> to vector<16x1xf32>
    %18 = vector.broadcast %17 : vector<16x1xf32> to vector<16x128xf32>
    %19 = arith.subf %15, %18 : vector<16x128xf32>
    %20 = math.exp %19 : vector<16x128xf32>
    %cst_12 = arith.constant 0.000000e+00 : f32
    %21 = vector.broadcast %cst_12 : f32 to vector<16x128xf32>
    %22 = arith.select %13, %20, %21 : vector<16x128xi1>, vector<16x128xf32>
    %cst_13 = arith.constant dense<0.000000e+00> : vector<16xf32>
    %23 = vector.multi_reduction <add>, %22, %cst_13 [1] : vector<16x128xf32> to vector<16xf32>
    %24 = vector.shape_cast %23 : vector<16xf32> to vector<16x1xf32>
    %25 = math.log %24 : vector<16x1xf32>
    %26 = vector.broadcast %25 : vector<16x1xf32> to vector<16x128xf32>
    %27 = arith.subf %19, %26 : vector<16x128xf32>
    %28 = vector.broadcast %10 : vector<16x1xi32> to vector<16x128xi32>
    %29 = arith.cmpi eq, %11, %28 : vector<16x128xi32>
    %30 = arith.extui %29 : vector<16x128xi1> to vector<16x128xi32>
    %31 = arith.sitofp %30 : vector<16x128xi32> to vector<16x128xf32>
    %32 = arith.mulf %27, %31 : vector<16x128xf32>
    %cst_14 = arith.constant 0.000000e+00 : f32
    %33 = vector.broadcast %cst_14 : f32 to vector<16x128xf32>
    %34 = arith.select %13, %32, %33 : vector<16x128xi1>, vector<16x128xf32>
    %cst_15 = arith.constant dense<0.000000e+00> : vector<16xf32>
    %35 = vector.multi_reduction <add>, %34, %cst_15 [1] : vector<16x128xf32> to vector<16xf32>
    %36 = vector.shape_cast %35 : vector<16xf32> to vector<16x1xf32>
    %cst_16 = arith.constant 0.000000e+00 : f32
    %37 = vector.broadcast %cst_16 : f32 to vector<16x1xf32>
    %38 = arith.subf %37, %36 : vector<16x1xf32>
    %cst_17 = arith.constant 0.000000e+00 : f32
    %39 = vector.broadcast %cst_17 : f32 to vector<16x128xf32>
    %40 = arith.select %13, %27, %39 : vector<16x128xi1>, vector<16x128xf32>
    %cst_18 = arith.constant dense<0.000000e+00> : vector<16xf32>
    %41 = vector.multi_reduction <add>, %40, %cst_18 [1] : vector<16x128xf32> to vector<16xf32>
    %42 = vector.shape_cast %41 : vector<16xf32> to vector<16x1xf32>
    %cst_19 = arith.constant 0.000000e+00 : f32
    %43 = vector.broadcast %cst_19 : f32 to vector<16x1xf32>
    %44 = arith.subf %43, %42 : vector<16x1xf32>
    %cst_20 = arith.constant 6.000000e+00 : f32
    %45 = vector.broadcast %cst_20 : f32 to vector<16x1xf32>
    %46 = arith.divf %44, %45 : vector<16x1xf32>
    %cst_21 = arith.constant 0.899999976 : f32
    %47 = vector.broadcast %cst_21 : f32 to vector<16x1xf32>
    %48 = arith.mulf %47, %38 : vector<16x1xf32>
    %cst_22 = arith.constant 1.000000e-01 : f32
    %49 = vector.broadcast %cst_22 : f32 to vector<16x1xf32>
    %50 = arith.mulf %49, %46 : vector<16x1xf32>
    %51 = arith.addf %48, %50 : vector<16x1xf32>
    %c1_i32 = arith.constant 1 : i32
    %52 = vector.broadcast %c1_i32 : i32 to vector<16x1xi32>
    %53 = arith.cmpi ne, %10, %52 : vector<16x1xi32>
    %54 = arith.extui %53 : vector<16x1xi1> to vector<16x1xi32>
    %55 = arith.sitofp %54 : vector<16x1xi32> to vector<16x1xf32>
    %c0_23 = arith.constant 0 : index
    %c0_24 = arith.constant 0 : index
    %56 = vector.load %arg7[%c0_23, %c0_24] : memref<1x1xf32, #tpu.memory_space<vmem>>, vector<1x1xf32>
    %57 = arith.mulf %51, %55 : vector<16x1xf32>
    %58 = vector.shape_cast %57 : vector<16x1xf32> to vector<1x16x1xf32>
    %cst_25 = arith.constant dense<0.000000e+00> : vector<1xf32>
    %59 = vector.multi_reduction <add>, %58, %cst_25 [1, 2] : vector<1x16x1xf32> to vector<1xf32>
    %60 = vector.shape_cast %59 : vector<1xf32> to vector<1x1x1xf32>
    %61 = vector.extract %60[0, 0, 0] : f32 from vector<1x1x1xf32>
    %62 = vector.broadcast %61 : f32 to vector<1x1xf32>
    %63 = arith.addf %56, %62 : vector<1x1xf32>
    %c0_26 = arith.constant 0 : index
    %c0_27 = arith.constant 0 : index
    %64 = vector.load %arg7[%c0_26, %c0_27] : memref<1x1xf32, #tpu.memory_space<vmem>>, vector<1x1xf32>
    tpu.vector_store %arg7[%c0_26, %c0_27], %63 {strides = array<i32>} : memref<1x1xf32, #tpu.memory_space<vmem>>, vector<1x1xf32>,
    %c0_28 = arith.constant 0 : index
    %c0_29 = arith.constant 0 : index
    %65 = vector.load %arg8[%c0_28, %c0_29] : memref<1x1xf32, #tpu.memory_space<vmem>>, vector<1x1xf32>
    %66 = vector.shape_cast %55 : vector<16x1xf32> to vector<1x16x1xf32>
    %cst_30 = arith.constant dense<0.000000e+00> : vector<1xf32>
    %67 = vector.multi_reduction <add>, %66, %cst_30 [1, 2] : vector<1x16x1xf32> to vector<1xf32>
    %68 = vector.shape_cast %67 : vector<1xf32> to vector<1x1x1xf32>
    %69 = vector.extract %68[0, 0, 0] : f32 from vector<1x1x1xf32>
    %70 = vector.broadcast %69 : f32 to vector<1x1xf32>
    %71 = arith.addf %65, %70 : vector<1x1xf32>
    %c0_31 = arith.constant 0 : index
    %c0_32 = arith.constant 0 : index
    %72 = vector.load %arg8[%c0_31, %c0_32] : memref<1x1xf32, #tpu.memory_space<vmem>>, vector<1x1xf32>
    tpu.vector_store %arg8[%c0_31, %c0_32], %71 {strides = array<i32>} : memref<1x1xf32, #tpu.memory_space<vmem>>, vector<1x1xf32>,
    %c0_i32_33 = arith.constant 0 : i32
    %73 = arith.cmpi eq, %arg0, %c0_i32_33 : i32
    %74 = arith.extui %73 : i1 to i32
    %c0_i32_34 = arith.constant 0 : i32
    %75 = arith.cmpi ne, %74, %c0_i32_34 : i32
    scf.if %75 {
      %c0_35 = arith.constant 0 : index
      %c0_36 = arith.constant 0 : index
      %76 = vector.load %arg7[%c0_35, %c0_36] : memref<1x1xf32, #tpu.memory_space<vmem>>, vector<1x1xf32>
      %c0_37 = arith.constant 0 : index
      %c0_38 = arith.constant 0 : index
      %77 = vector.load %arg8[%c0_37, %c0_38] : memref<1x1xf32, #tpu.memory_space<vmem>>, vector<1x1xf32>
      %cst_39 = arith.constant 1.000000e+00 : f32
      %78 = vector.broadcast %cst_39 : f32 to vector<1x1xf32>
      %79 = arith.maximumf %77, %78 : vector<1x1xf32>
      %80 = arith.divf %76, %79 : vector<1x1xf32>
      %c0_40 = arith.constant 0 : index
      %c0_41 = arith.constant 0 : index
      %81 = vector.load %arg6[%c0_40, %c0_41] : memref<1x1xf32, #tpu.memory_space<vmem>>, vector<1x1xf32>
      tpu.vector_store %arg6[%c0_40, %c0_41], %80 {strides = array<i32>} : memref<1x1xf32, #tpu.memory_space<vmem>>, vector<1x1xf32>,
    } else {
    }
    return
  }
  func.func @transform_0(%arg0: i32) -> (i32, i32) {
    %c0_i32 = arith.constant 0 : i32
    %c0_i32_0 = arith.constant 0 : i32
    return %arg0, %c0_i32 : i32, i32
  }
  func.func @transform_1(%arg0: i32) -> (i32, i32) {
    %c0_i32 = arith.constant 0 : i32
    %c0_i32_0 = arith.constant 0 : i32
    %c0_i32_1 = arith.constant 0 : i32
    return %c0_i32, %c0_i32_0 : i32, i32
  }
  func.func @transform_2(%arg0: i32) -> (i32, i32) {
    %c0_i32 = arith.constant 0 : i32
    %c0_i32_0 = arith.constant 0 : i32
    %c0_i32_1 = arith.constant 0 : i32
    return %c0_i32, %c0_i32_0 : i32, i32
  }
  func.func @transform_3(%arg0: i32) -> (i32, i32) {
    %c0_i32 = arith.constant 0 : i32
    %c0_i32_0 = arith.constant 0 : i32
    return %arg0, %c0_i32 : i32, i32
  }
  func.func @transform_4(%arg0: i32) -> (i32, i32) {
    %c0_i32 = arith.constant 0 : i32
    %c0_i32_0 = arith.constant 0 : i32
    return %arg0, %c0_i32 : i32, i32
  }
  func.func @transform_5(%arg0: i32) -> (i32, i32) {
    %c0_i32 = arith.constant 0 : i32
    %c0_i32_0 = arith.constant 0 : i32
    %c0_i32_1 = arith.constant 0 : i32
    return %c0_i32, %c0_i32_0 : i32, i32
  }
}

</mosaic_0001>

<bundles_post_ra>
// kernel: bart_classification_forward.46
= control target key start
LH: loop header
LB: loop body
LE: loop exit
PB: predicated region body
PF: predicated region fallthrough
CT: control target
= control target key end

     0   :  { %v200_v0 = vmov 0.0   ;;  %vm201_vm0 = vmmov 0   ;;  %vm54_vm1 = vcmask 261120   ;;  %vm158_vm2 = vcmask 257024   ;;  %s269_s1 = inlined_call_operand.vmem [shape: bf16[32,32], index: 1, kind: input, shape index: {}]   ;;  %s270_s0 = inlined_call_operand.vmem [shape: bf16[16,32], index: 0, kind: input, shape index: {}]   ;;  %s271_s3 = inlined_call_operand.vmem [shape: bf16[16,32], index: 3, kind: input, shape index: {}]   ;;  %s272_s2 = inlined_call_operand.vmem [shape: f32[1,32], index: 2, kind: input, shape index: {}, may-alias: {2,5}]   ;;  %s273_s4 = inlined_call_operand.vmem [shape: f32[1,32], index: 4, kind: input, shape index: {}]   ;;  %s274_s5 = inlined_call_operand.vmem [shape: f32[1,32], index: 5, kind: input, shape index: {}, may-alias: {2,5}]   ;;  %s275_s6 = inlined_call_operand.vmem [shape: bf16[16,32], index: 6, kind: output, shape index: {}]  }
   0x1   :  { %183 = vmatprep.subr.bf16.mxu0 %v200_v0  ;;  %v193_v1 = vld [vmem:[%s269_s1] sm:$0xff]   ;;  %187 = vmatprep.mubr.msk.bf16.mxu0 %vm201_vm0, %v200_v0  ;;  %v194_v2 = vld [vmem:[%s269_s1 + $0x8] sm:$0xff]  }
   0x2   :  { %184 = vmatpush3.bf16.msra.mxu0 %v193_v1  ;;  %v195_v3 = vld [vmem:[%s270_s0] sm:$0xff]  }
   0x3   :  { %185 = vmatprep.subr.bf16.mxu0 %v200_v0  ;;  %v177_v4 = vld [vmem:[%s271_s3] sm:$0xff]  }
   0x4   :  { %v165_v5 = vld [vmem:[%s272_s2] ss:$0 sm:$0xff]  ;;  %v178_v6 = vunpack.c.l.bf16 %v177_v4  ;;  %v179_v10 = vunpack.c.h.bf16 %v177_v4 }
   0x5   :  { %v170_v35 = vld [vmem:[%s273_s4] ss:$0 sm:$0xff] }
   0x6   :  { %186 = vmatpush3.bf16.msra.mxu0 %v194_v2  ;;  %v171_v37 = vld [vmem:[%s274_s5] ss:$0 sm:$0xff] }
   0x9   :  { %188 = vmatmul.mubr.msk.bf16.vlgmr.msra.gmra.mrb[0].mxu0 %vm54_vm1, %v195_v3 }
  0xdc   :  { %v92_v7 = vpop.f32.mrb[0].mxu0 }
  0xdd   :  { %v93_v8 = vadd.f32 %v165_v5, %v92_v7  ;;  %v189_v9 = vpop.f32.mrb[1].mxu0 }
  0xde   :  { %v95_v11 = vpop.f32.mrb[2].mxu0 }
  0xdf   :  { %v96_v12 = vadd.f32 %v165_v5, %v95_v11  ;;  %v190_v13 = vpop.f32.mrb[3].mxu0  ;;  %v103_v14 = vadd.f32 %v178_v6, %v93_v8 }
  0xe1   :  { %v105_v15 = vsel %vm54_vm1, %v103_v14, 0.0  ;;  %v104_v16 = vadd.f32 %v179_v10, %v96_v12 }
  0xe2   :  { %106 = vadd.xlane.f32.xlu0 %v105_v15 }
  0xe3   :  { %v108_v17 = vsel %vm54_vm1, %v104_v16, 0.0 }
  0xe6   :  { %109 = vadd.xlane.f32.xlu0 %v108_v17 }
 0x16f   :  { %v107_v18 = vpop.xlane.xlu0 %106 }
 0x170   :  { %v112_v19 = vmul.f32 0.03125, %v107_v18 }
 0x172   :  { %v114_v20 = vsub.f32 %v103_v14, %v112_v19 }
 0x173   :  { %v110_v21 = vpop.xlane.xlu0 %109 }
 0x174   :  { %v113_v22 = vmul.f32 0.03125, %v110_v21  ;;  %v116_v23 = vmul.f32 %v114_v20, %v114_v20 }
 0x176   :  { %v115_v24 = vsub.f32 %v104_v16, %v113_v22  ;;  %v118_v25 = vsel %vm54_vm1, %v116_v23, 0.0 }
 0x177   :  { %119 = vadd.xlane.f32.xlu1 %v118_v25 }
 0x178   :  { %v117_v26 = vmul.f32 %v115_v24, %v115_v24 }
 0x17a   :  { %v121_v27 = vsel %vm54_vm1, %v117_v26, 0.0 }
 0x17b   :  { %122 = vadd.xlane.f32.xlu1 %v121_v27 }
 0x204   :  { %v120_v28 = vpop.xlane.xlu1 %119 }
 0x205   :  { %v124_v29 = vmul.f32 0.03125, %v120_v28 }
 0x207   :  { %v126_v30 = vadd.f32 1e-05, %v124_v29 }
 0x208   :  { %v123_v31 = vpop.xlane.xlu1 %122 }
 0x209   :  { %196 = vrsqrt.f32 %v126_v30  ;;  %v125_v32 = vmul.f32 0.03125, %v123_v31 }
 0x20b   :  { %v127_v33 = vadd.f32 1e-05, %v125_v32 }
 0x20d   :  { %198 = vrsqrt.f32 %v127_v33 }
 0x213   :  { %v197_v34 = vpop.eup %196 }
 0x214   :  { %v130_v36 = vmul.f32 %v197_v34, %v114_v20 }
 0x216   :  { %v139_v38 = vmul.f32 %v170_v35, %v130_v36 }
 0x217   :  { %v199_v39 = vpop.eup %198 }
 0x218   :  { %v148_v40 = vadd.f32 %v171_v37, %v139_v38  ;;  %v131_v41 = vmul.f32 %v199_v39, %v115_v24 }
 0x21a   :  { %v174_v42 = vpack.c.bf16 %v148_v40, %v148_v40  ;;  %v140_v43 = vmul.f32 %v170_v35, %v131_v41 }
 0x21c   :  { %159 = vst.msk [vmem:[%s275_s6] sm:$0xf] %vm158_vm2, %v174_v42  ;;  %v149_v44 = vadd.f32 %v171_v37, %v140_v43 }
 0x21e   :  { %v175_v45 = vpack.c.bf16 %v149_v44, %v149_v44 }
 0x220   :  { %160 = vst.msk [vmem:[%s275_s6 + $0x4] sm:$0xf] %vm158_vm2, %v175_v45 }

// kernel: bart_classification_forward.43
= control target key start
LH: loop header
LB: loop body
LE: loop exit
PB: predicated region body
PF: predicated region fallthrough
CT: control target
= control target key end

     0   :  { %vm23_vm0 = vcmask 261120   ;;  %vm77_vm1 = vcmask 257024   ;;  %s147_s0 = inlined_call_operand.vmem [shape: f32[16,32], index: 0, kind: input, shape index: {}]   ;;  %s148_s1 = inlined_call_operand.vmem [shape: f32[16,32], index: 1, kind: input, shape index: {}]   ;;  %s149_s2 = inlined_call_operand.vmem [shape: f32[1,32], index: 2, kind: input, shape index: {}]   ;;  %s150_s3 = inlined_call_operand.vmem [shape: f32[1,32], index: 3, kind: input, shape index: {}]   ;;  %s151_s4 = inlined_call_operand.vmem [shape: bf16[16,32], index: 4, kind: output, shape index: {}]  }
   0x1   :  { %v17_v0 = vld [vmem:[%s147_s0] sm:$0xff]  ;;  %v18_v2 = vld [vmem:[%s147_s0 + $0x8] sm:$0xff] }
   0x2   :  { %v19_v1 = vld [vmem:[%s148_s1] sm:$0xff]  ;;  %v20_v4 = vld [vmem:[%s148_s1 + $0x8] sm:$0xff] }
   0x3   :  { %v21_v3 = vadd.f32 %v19_v1, %v17_v0  ;;  %v22_v5 = vadd.f32 %v20_v4, %v18_v2  ;;  %v84_v25 = vld [vmem:[%s149_s2] ss:$0 sm:$0xff] }
   0x4   :  { %v85_v27 = vld [vmem:[%s150_s3] ss:$0 sm:$0xff] }
   0x5   :  { %v24_v6 = vsel %vm23_vm0, %v21_v3, 0.0  ;;  %v27_v7 = vsel %vm23_vm0, %v22_v5, 0.0 }
   0x6   :  { %25 = vadd.xlane.f32.xlu0 %v24_v6 }
   0xa   :  { %28 = vadd.xlane.f32.xlu0 %v27_v7 }
  0x93   :  { %v26_v8 = vpop.xlane.xlu0 %25 }
  0x94   :  { %v31_v9 = vmul.f32 0.03125, %v26_v8 }
  0x96   :  { %v33_v10 = vsub.f32 %v21_v3, %v31_v9 }
  0x97   :  { %v29_v11 = vpop.xlane.xlu0 %28 }
  0x98   :  { %v32_v12 = vmul.f32 0.03125, %v29_v11  ;;  %v35_v13 = vmul.f32 %v33_v10, %v33_v10 }
  0x9a   :  { %v34_v14 = vsub.f32 %v22_v5, %v32_v12  ;;  %v37_v15 = vsel %vm23_vm0, %v35_v13, 0.0 }
  0x9b   :  { %38 = vadd.xlane.f32.xlu1 %v37_v15 }
  0x9c   :  { %v36_v16 = vmul.f32 %v34_v14, %v34_v14 }
  0x9e   :  { %v40_v17 = vsel %vm23_vm0, %v36_v16, 0.0 }
  0x9f   :  { %41 = vadd.xlane.f32.xlu1 %v40_v17 }
 0x128   :  { %v39_v18 = vpop.xlane.xlu1 %38 }
 0x129   :  { %v43_v19 = vmul.f32 0.03125, %v39_v18 }
 0x12b   :  { %v45_v20 = vadd.f32 1e-05, %v43_v19 }
 0x12c   :  { %v42_v21 = vpop.xlane.xlu1 %41 }
 0x12d   :  { %90 = vrsqrt.f32 %v45_v20  ;;  %v44_v22 = vmul.f32 0.03125, %v42_v21 }
 0x12f   :  { %v46_v23 = vadd.f32 1e-05, %v44_v22 }
 0x131   :  { %92 = vrsqrt.f32 %v46_v23 }
 0x137   :  { %v91_v24 = vpop.eup %90 }
 0x138   :  { %v49_v26 = vmul.f32 %v91_v24, %v33_v10 }
 0x13a   :  { %v58_v28 = vmul.f32 %v84_v25, %v49_v26 }
 0x13b   :  { %v93_v29 = vpop.eup %92 }
 0x13c   :  { %v67_v30 = vadd.f32 %v85_v27, %v58_v28  ;;  %v50_v31 = vmul.f32 %v93_v29, %v34_v14 }
 0x13e   :  { %v88_v32 = vpack.c.bf16 %v67_v30, %v67_v30  ;;  %v59_v33 = vmul.f32 %v84_v25, %v50_v31 }
 0x140   :  { %78 = vst.msk [vmem:[%s151_s4] sm:$0xf] %vm77_vm1, %v88_v32  ;;  %v68_v34 = vadd.f32 %v85_v27, %v59_v33 }
 0x142   :  { %v89_v35 = vpack.c.bf16 %v68_v34, %v68_v34 }
 0x144   :  { %79 = vst.msk [vmem:[%s151_s4 + $0x4] sm:$0xf] %vm77_vm1, %v89_v35 }

// kernel: bart_classification_forward.44
= control target key start
LH: loop header
LB: loop body
LE: loop exit
PB: predicated region body
PF: predicated region fallthrough
CT: control target
= control target key end

     0   :  { %v130_v0 = vmov 0.0   ;;  %vm131_vm0 = vmmov 0   ;;  %vm45_vm1 = vcmask 261120   ;;  %vm98_vm2 = vcmask 781312   ;;  %s170_s1 = inlined_call_operand.vmem [shape: bf16[32,96], index: 1, kind: input, shape index: {}]   ;;  %s171_s0 = inlined_call_operand.vmem [shape: bf16[16,32], index: 0, kind: input, shape index: {}]   ;;  %s172_s2 = inlined_call_operand.vmem [shape: f32[1,96], index: 2, kind: input, shape index: {}]   ;;  %s173_s3 = inlined_call_operand.vmem [shape: bf16[16,96], index: 3, kind: output, shape index: {}]  }
   0x1   :  { %117 = vmatprep.subr.bf16.mxu0 %v130_v0  ;;  %v127_v1 = vld [vmem:[%s170_s1] sm:$0xff]   ;;  %121 = vmatprep.mubr.msk.bf16.mxu0 %vm131_vm0, %v130_v0  ;;  %v128_v2 = vld [vmem:[%s170_s1 + $0x8] sm:$0xff]  }
   0x2   :  { %118 = vmatpush3.bf16.msra.mxu0 %v127_v1  ;;  %v129_v3 = vld [vmem:[%s171_s0] sm:$0xff]  }
   0x3   :  { %119 = vmatprep.subr.bf16.mxu0 %v130_v0  ;;  %v105_v4 = vld [vmem:[%s172_s2] ss:$0 sm:$0xff] }
   0x6   :  { %120 = vmatpush3.bf16.msra.mxu0 %v128_v2 }
   0x9   :  { %122 = vmatmul.mubr.msk.bf16.vlgmr.msra.gmra.mrb[0].mxu0 %vm45_vm1, %v129_v3 }
  0xdc   :  { %v83_v5 = vpop.f32.mrb[0].mxu0 }
  0xdd   :  { %v84_v6 = vadd.f32 %v105_v4, %v83_v5  ;;  %v123_v7 = vpop.f32.mrb[1].mxu0 }
  0xde   :  { %v86_v8 = vpop.f32.mrb[2].mxu0 }
  0xdf   :  { %v112_v9 = vpack.c.bf16 %v84_v6, %v84_v6  ;;  %v87_v10 = vadd.f32 %v105_v4, %v86_v8  ;;  %v124_v11 = vpop.f32.mrb[3].mxu0 }
  0xe1   :  { %99 = vst.msk [vmem:[%s173_s3] sm:$0xf] %vm98_vm2, %v112_v9  ;;  %v113_v12 = vpack.c.bf16 %v87_v10, %v87_v10 }
  0xe3   :  { %100 = vst.msk [vmem:[%s173_s3 + $0x4] sm:$0xf] %vm98_vm2, %v113_v12 }

// kernel: bart_classification_forward.45
= control target key start
LH: loop header
LB: loop body
LE: loop exit
PB: predicated region body
PF: predicated region fallthrough
CT: control target
= control target key end

     0   :  { %s1070_s15 = smov 0   ;;  %s1072_s16 = smov 0   ;;  %s1187_s0 = inlined_call_operand.vmem [shape: bf16[2,8,32], index: 0, kind: input, shape index: {}]   ;;  %s1188_s1 = inlined_call_operand.vmem [shape: bf16[2,8,32], index: 1, kind: input, shape index: {}]   ;;  %s1189_s2 = inlined_call_operand.vmem [shape: bf16[2,8,32], index: 2, kind: input, shape index: {}]   ;;  %s1190_s3 = inlined_call_operand.vmem [shape: f32[2,1,8], index: 3, kind: input, shape index: {}]   ;;  %s1191_s4 = inlined_call_operand.vmem [shape: bf16[2,8,32], index: 4, kind: output, shape index: {}]  }
   0x1   :  { %s1074_s17 = smov 0  }
   0x2 LB: > { %s26_s18 = sadd.s32 1, %s1031_s16  ;;  %p879_p0 = scmp.ge.s32.totalorder %s1035_s17, 1  ;;  %s1035_s17 = sphi %s1074_s17, %s14_s17   ;;  %s1031_s16 = sphi %s1072_s16, %s1193_s16   ;;  %s1027_s15 = sphi %s1070_s15, %s1192_s15  }
   0x3   : > { %p28_p1 = scmp.ge.s32.totalorder %s26_s18, 2  ;;  %p206_p2 = scmp.lt.s32.totalorder %s1035_s17, 3 }
   0x5   : > { %s1195_s18 = smov (%p28_p1, %s26_s18), 0  ;;  %p207_p3 = pnand %p879_p0, %p206_p2 }
   0x6   : > { %p247_p4 = scmp.lt.s32.totalorder (!%p207_p3), %s1027_s15, 1  ;;  %v1037_v0 = vmov (!%p207_p3), 0.0   ;;  %vm1038_vm0 = vmmov (!%p207_p3), 0   ;;  %vm292_vm1 = vcmask (!%p207_p3), 64512   ;;  %v283_v4 = vlaneseq (!%p207_p3)  ;;  %s1039_s29 = smov (!%p207_p3), 120  }
   0x7   : > { %210 = sbr.rel (%p207_p3) target bundleno = 1489 (0x5d1), region = 36  ;;  %914 = vmatprep.subr.bf16.mxu0 (!%p207_p3), %v1037_v0  ;;  %916 = vmatprep.mubr.msk.bf16.mxu0 (!%p207_p3), %vm1038_vm0, %v1037_v0  ;;  %s1040_s30 = smov (!%p207_p3), 112   ;;  %vm356_vm3 = vcmask (!%p207_p3), 1043456   ;;  %vm526_vm4 = vcmask (!%p207_p3), 130112   ;;  %vm644_vm5 = vcmask (!%p207_p3), 195712   ;;  %vm762_vm6 = vcmask (!%p207_p3), 261312  }
   0x8   : > { %920 = vmatprep.subr.bf16.mxu1 (!%p207_p3), %v1037_v0  ;;  %922 = vmatprep.mubr.msk.bf16.mxu1 (!%p207_p3), %vm1038_vm0, %v1037_v0  ;;  %v284_v5 = vshrl.u32 (!%p207_p3), %v283_v4, 7  ;;  %v289_v6 = vand.u32 (!%p207_p3), 127, %v283_v4  ;;  %s1041_s5 = smov (!%p207_p3), 104   ;;  %s1042_s9 = smov (!%p207_p3), 8   ;;  %vm766_vm7 = vcmask (!%p207_p3), 257024  }
   0x9   : > { %s1043_s10 = smov (!%p207_p3), 16   ;;  %s1044_s11 = smov (!%p207_p3), 24  }
   0xa   : > { %vm290_vm2 = vcmp.ge.s32.totalorder (!%p207_p3), %v284_v5, %v289_v6 }
   0xe   : > { %s1197_s15 = smov (!%p247_p4, %s1027_s15), 1 }
   0xf   : > { %s1094_s19 = sshll.u32 %s1197_s15, 2  ;;  %s264_s28 = scalar_lea.vmem %s1190_s3, %s1197_s15 }
  0x10   : > { %s257_s22 = scalar_lea.vmem %s1188_s1, %s1094_s19  ;;  %s253_s25 = scalar_lea.vmem %s1187_s0, %s1094_s19  ;;  %v884_v7 = vld [vmem:[%s264_s28] ss:$0 sm:$0xff] }
  0x11   : > { %v274_v1 = vld [vmem:[%s257_s22] sm:$0xf]  ;;  %v1112_v9 = vsel %vm290_vm2, %v884_v7, -1e+09  ;;  %s261_s8 = scalar_lea.vmem %s1189_s2, %s1094_s19  ;;  %s271_s14 = scalar_lea.vmem %s1191_s4, %s1094_s19 }
  0x12   : > { %v297_v2 = vsel %vm292_vm1, %v274_v1, 0  ;;  %v273_v3 = vld [vmem:[%s253_s25] sm:$0xf]  ;;  %v888_v16 = vcombine.low %v274_v1, %v274_v1 }
  0x13   : > { %915 = vmatpush3.bf16.xpose.msra.mxu0 %v297_v2  ;;  %v887_v17 = vcombine.low %v273_v3, %v273_v3  ;;  %v1126_v23 = vld [vmem:[%s261_s8] sm:$0xf] }
  0x14   : > { %932 = vmatprep.subr.bf16.mxu0 %v1037_v0  ;;  %409 = vrot.lane.b32.xlu1 %v888_v16, %s1039_s29  ;;  %v358_v24 = vsel %vm356_vm3, %v1126_v23, 0 }
  0x15   : > { %921 = vmatpush3.bf16.msra.mxu1 %v358_v24 }
  0x16   : > { %926 = vmatprep.subr.bf16.mxu1 %v1037_v0 }
  0x18   : > { %404 = vrot.lane.b32.xlu1 %v887_v17, %s1039_s29 }
  0x1a   : > { %917 = vmatmul.mubr.msk.bf16.vlgmr.msra.gmra.mrb[0].mxu0 %vm292_vm1, %v273_v3 }
  0x1b   : > { %934 = vmatprep.mubr.msk.bf16.mxu0 %vm1038_vm0, %v1037_v0 }
  0x1c   : > { %528 = vrot.lane.b32.xlu1 %v887_v17, %s1040_s30 }
  0x20   : > { %648 = vrot.lane.b32.xlu1 %v888_v16, %s1041_s5 }
  0x24   : > { %646 = vrot.lane.b32.xlu1 %v887_v17, %s1041_s5 }
  0x86   : > { %v410_v27 = vpop.permute.xlu1 %409 }
  0x87   : > { %v415_v29 = vsel %vm292_vm1, %v410_v27, 0 }
  0x8a   : > { %v405_v31 = vpop.permute.xlu1 %404 }
  0x8e   : > { %v529_v33 = vpop.permute.xlu1 %528 }
  0x92   : > { %v649_v35 = vpop.permute.xlu1 %648 }
  0x93   : > { %v654_v36 = vsel %vm292_vm1, %v649_v35, 0 }
  0x96   : > { %v647_v37 = vpop.permute.xlu1 %646 }
  0xed   : > { %v333_v8 = vpop.f32.mrb[0].mxu0 }
  0xee   : > { %v339_v10 = vmul.f32 0.35355338, %v333_v8  ;;  %v918_v11 = vpop.f32.mrb[1].mxu0 }
  0xef   : > { %v336_v12 = vpop.f32.mrb[2].mxu0 }
  0xf0   : > { %v919_v13 = vpop.f32.mrb[3].mxu0  ;;  %v340_v14 = vadd.f32 %v339_v10, %v1112_v9 }
  0xf2   : > { %v341_v15 = vsel %vm292_vm1, %v340_v14, -inf }
  0xf3   : > { %342 = vmax.xlane.f32.xlu0 %v341_v15 }
 0x180   : > { %v343_v18 = vpop.xlane.xlu0 %342 }
 0x181   : > { %v344_v19 = vsub.f32 %v340_v14, %v343_v18 }
 0x183   : > { %v345_v20 = vmul.f32 1.442695, %v344_v19 }
 0x185   : > { %997 = vpow2.f32 %v345_v20 }
 0x18f   : > { %v998_v21 = vpop.eup %997 }
 0x190   : > { %v347_v22 = vsel %vm292_vm1, %v998_v21, 0.0 }
 0x191   : > { %348 = vadd.xlane.f32.xlu0 %v347_v22 }
 0x1a7   : > { %530 = vrot.lane.b32.xlu0 %v888_v16, %s1040_s30 }
 0x21e   : > { %v349_v25 = vpop.xlane.xlu0 %348 }
 0x21f   : > { %999 = vrcp.f32 %v349_v25 }
 0x222   : > { %v531_v32 = vpop.permute.xlu0 %530 }
 0x223   : > { %v536_v34 = vsel %vm292_vm1, %v531_v32, 0 }
 0x229   : > { %v1000_v26 = vpop.eup %999 }
 0x22a   : > { %v351_v28 = vmul.f32 %v1000_v26, %v998_v21 }
 0x22c   : > { %v352_v30 = vpack.c.bf16 %v351_v28, %v351_v28 }
 0x22e   : > { %923 = vmatmul.mubr.msk.bf16.vlgmr.msra.gmra.mrb[0].mxu1 %vm292_vm1, %v352_v30 }
 0x22f   : > { %927 = vmatpush3.bf16.xpose.msra.mxu1 %v415_v29  ;;  %928 = vmatprep.mubr.msk.bf16.mxu1 %vm1038_vm0, %v1037_v0 }
 0x230   : > { %938 = vmatprep.subr.bf16.mxu1 %v1037_v0 }
 0x236   : > { %929 = vmatmul.mubr.msk.bf16.vlgmr.msra.gmra.mrb[4].mxu1 %vm292_vm1, %v405_v31 }
 0x237   : > { %939 = vmatpush3.bf16.xpose.msra.mxu1 %v536_v34  ;;  %940 = vmatprep.mubr.msk.bf16.mxu1 %vm1038_vm0, %v1037_v0 }
 0x238   : > { %950 = vmatprep.subr.bf16.mxu1 %v1037_v0 }
 0x23e   : > { %941 = vmatmul.mubr.msk.bf16.vlgmr.msra.gmra.mrb[8].mxu1 %vm292_vm1, %v529_v33 }
 0x23f   : > { %951 = vmatpush3.bf16.xpose.msra.mxu1 %v654_v36  ;;  %952 = vmatprep.mubr.msk.bf16.mxu1 %vm1038_vm0, %v1037_v0 }
 0x246   : > { %953 = vmatmul.mubr.msk.bf16.vlgmr.msra.gmra.mrb[12].mxu1 %vm292_vm1, %v647_v37 }
 0x301   : > { %v394_v38 = vpop.f32.mrb[0].mxu1 }
 0x302   : > { %400 = vst.msk [vmem:[#allocation2] sm:$0xff] %vm292_vm1, %v394_v38  ;;  %v924_v39 = vpop.f32.mrb[1].mxu1 }
 0x303   : > { %v397_v40 = vpop.f32.mrb[2].mxu1 }
 0x304   : > { %v925_v41 = vpop.f32.mrb[3].mxu1 }
 0x309   : > { %v451_v42 = vpop.f32.mrb[4].mxu1 }
 0x30a   : > { %v457_v43 = vmul.f32 0.35355338, %v451_v42  ;;  %v930_v44 = vpop.f32.mrb[5].mxu1 }
 0x30b   : > { %v454_v45 = vpop.f32.mrb[6].mxu1 }
 0x30c   : > { %v931_v46 = vpop.f32.mrb[7].mxu1  ;;  %v458_v47 = vadd.f32 %v457_v43, %v1112_v9 }
 0x30e   : > { %v459_v48 = vsel %vm292_vm1, %v458_v47, -inf }
 0x30f   : > { %460 = vmax.xlane.f32.xlu1 %v459_v48 }
 0x311   : > { %v572_v49 = vpop.f32.mrb[8].mxu1 }
 0x312   : > { %v578_v50 = vmul.f32 0.35355338, %v572_v49  ;;  %v942_v51 = vpop.f32.mrb[9].mxu1 }
 0x313   : > { %v575_v52 = vpop.f32.mrb[10].mxu1 }
 0x314   : > { %v579_v53 = vadd.f32 %v578_v50, %v1112_v9  ;;  %v943_v54 = vpop.f32.mrb[11].mxu1 }
 0x316   : > { %v580_v55 = vsel %vm292_vm1, %v579_v53, -inf }
 0x317   : > { %581 = vmax.xlane.f32.xlu0 %v580_v55 }
 0x319   : > { %v690_v56 = vpop.f32.mrb[12].mxu1 }
 0x31a   : > { %v696_v57 = vmul.f32 0.35355338, %v690_v56  ;;  %v954_v58 = vpop.f32.mrb[13].mxu1 }
 0x31b   : > { %v693_v59 = vpop.f32.mrb[14].mxu1 }
 0x31c   : > { %v697_v60 = vadd.f32 %v696_v57, %v1112_v9  ;;  %v955_v61 = vpop.f32.mrb[15].mxu1  ;;  %v890_v9 = vcombine.low %v1126_v23, %v1126_v23 }
 0x31e   : > { %v698_v62 = vsel %vm292_vm1, %v697_v60, -inf }
 0x31f   : > { %699 = vmax.xlane.f32.xlu1 %v698_v62 }
 0x39c   : > { %v461_v63 = vpop.xlane.xlu1 %460 }
 0x39d   : > { %v462_v1 = vsub.f32 %v458_v47, %v461_v63 }
 0x39f   : > { %v463_v2 = vmul.f32 1.442695, %v462_v1 }
 0x3a1   : > { %1001 = vpow2.f32 %v463_v2 }
 0x3a4   : > { %v582_v3 = vpop.xlane.xlu0 %581 }
 0x3a5   : > { %v583_v4 = vsub.f32 %v579_v53, %v582_v3 }
 0x3a7   : > { %v584_v5 = vmul.f32 1.442695, %v583_v4 }
 0x3a9   : > { %1003 = vpow2.f32 %v584_v5 }
 0x3ab   : > { %v1002_v6 = vpop.eup %1001 }
 0x3ac   : > { %v465_v7 = vsel %vm292_vm1, %v1002_v6, 0.0  ;;  %v700_v11 = vpop.xlane.xlu1 %699 }
 0x3ad   : > { %466 = vadd.xlane.f32.xlu1 %v465_v7  ;;  %v701_v12 = vsub.f32 %v697_v60, %v700_v11 }
 0x3af   : > { %v702_v13 = vmul.f32 1.442695, %v701_v12 }
 0x3b1   : > { %1005 = vpow2.f32 %v702_v13 }
 0x3b3   : > { %v1004_v8 = vpop.eup %1003 }
 0x3b4   : > { %v586_v10 = vsel %vm292_vm1, %v1004_v8, 0.0 }
 0x3b5   : > { %587 = vadd.xlane.f32.xlu0 %v586_v10 }
 0x3bb   : > { %v1006_v14 = vpop.eup %1005 }
 0x3bc   : > { %v704_v15 = vsel %vm292_vm1, %v1006_v14, 0.0 }
 0x3be   : > { %592 = vrot.lane.b32.xlu1 %v890_v9, %s1040_s30 }
 0x3cb   : > { %474 = vrot.lane.b32.xlu0 %v890_v9, %s1039_s29 }
 0x3e2   : > { %705 = vadd.xlane.f32.xlu1 %v704_v15 }
 0x3f3   : > { %710 = vrot.lane.b32.xlu1 %v890_v9, %s1041_s5 }
 0x43a   : > { %v467_v16 = vpop.xlane.xlu1 %466 }
 0x43b   : > { %1007 = vrcp.f32 %v467_v16 }
 0x43e   : > { %v593_v22 = vpop.permute.xlu1 %592 }
 0x43f   : > { %v598_v24 = vsel %vm356_vm3, %v593_v22, 0 }
 0x442   : > { %v588_v17 = vpop.xlane.xlu0 %587 }
 0x443   : > { %1009 = vrcp.f32 %v588_v17 }
 0x445   : > { %v1008_v18 = vpop.eup %1007 }
 0x446   : > { %v469_v19 = vmul.f32 %v1008_v18, %v1002_v6  ;;  %v475_v20 = vpop.permute.xlu0 %474 }
 0x447   : > { %v480_v21 = vsel %vm356_vm3, %v475_v20, 0 }
 0x448   : > { %933 = vmatpush3.bf16.msra.mxu0 %v480_v21  ;;  %v470_v23 = vpack.c.bf16 %v469_v19, %v469_v19 }
 0x449   : > { %944 = vmatprep.subr.bf16.mxu0 %v1037_v0 }
 0x44b   : > { %935 = vmatmul.mubr.msk.bf16.vlgmr.msra.gmra.mrb[4].mxu0 %vm292_vm1, %v470_v23 }
 0x44c   : > { %945 = vmatpush3.bf16.msra.mxu0 %v598_v24  ;;  %946 = vmatprep.mubr.msk.bf16.mxu0 %vm1038_vm0, %v1037_v0 }
 0x44d   : > { %v1010_v25 = vpop.eup %1009  ;;  %956 = vmatprep.subr.bf16.mxu0 %v1037_v0 }
 0x44e   : > { %v590_v26 = vmul.f32 %v1010_v25, %v1004_v8 }
 0x450   : > { %v591_v27 = vpack.c.bf16 %v590_v26, %v590_v26 }
 0x453   : > { %947 = vmatmul.mubr.msk.bf16.vlgmr.msra.gmra.mrb[8].mxu0 %vm292_vm1, %v591_v27 }
 0x454   : > { %958 = vmatprep.mubr.msk.bf16.mxu0 %vm1038_vm0, %v1037_v0 }
 0x46f   : > { %v706_v28 = vpop.xlane.xlu1 %705 }
 0x470   : > { %1011 = vrcp.f32 %v706_v28 }
 0x473   : > { %v711_v29 = vpop.permute.xlu1 %710 }
 0x474   : > { %v716_v30 = vsel %vm356_vm3, %v711_v29, 0 }
 0x475   : > { %957 = vmatpush3.bf16.msra.mxu0 %v716_v30 }
 0x47a   : > { %v1012_v31 = vpop.eup %1011 }
 0x47b   : > { %v708_v32 = vmul.f32 %v1012_v31, %v1006_v14 }
 0x47d   : > { %v709_v33 = vpack.c.bf16 %v708_v32, %v708_v32 }
 0x47f   : > { %959 = vmatmul.mubr.msk.bf16.vlgmr.msra.gmra.mrb[12].mxu0 %vm292_vm1, %v709_v33 }
 0x51e   : > { %v516_v34 = vpop.f32.mrb[4].mxu0 }
 0x51f   : > { %523 = vrot.lane.b32.xlu0 %v516_v34, %s1042_s9  ;;  %v936_v35 = vpop.f32.mrb[5].mxu0 }
 0x520   : > { %v519_v36 = vpop.f32.mrb[6].mxu0 }
 0x521   : > { %v937_v37 = vpop.f32.mrb[7].mxu0 }
 0x526   : > { %v634_v38 = vpop.f32.mrb[8].mxu0 }
 0x527   : > { %641 = vrot.lane.b32.xlu1 %v634_v38, %s1043_s10  ;;  %v948_v0 = vpop.f32.mrb[9].mxu0 }
 0x528   : > { %v637_v39 = vpop.f32.mrb[10].mxu0 }
 0x529   : > { %v949_v40 = vpop.f32.mrb[11].mxu0 }
 0x552   : > { %v752_v41 = vpop.f32.mrb[12].mxu0 }
 0x553   : > { %759 = vrot.lane.b32.xlu0 %v752_v41, %s1044_s11  ;;  %v960_v42 = vpop.f32.mrb[13].mxu0 }
 0x554   : > { %v755_v43 = vpop.f32.mrb[14].mxu0 }
 0x555   : > { %v961_v44 = vpop.f32.mrb[15].mxu0 }
 0x591   : > { %v524_v45 = vpop.permute.xlu0 %523 }
 0x592   : > { %527 = vst.msk [vmem:[#allocation2] sm:$0xff] %vm526_vm4, %v524_v45 }
 0x599   : > { %v642_v46 = vpop.permute.xlu1 %641 }
 0x59a   : > { %645 = vst.msk [vmem:[#allocation2] sm:$0xff] %vm644_vm5, %v642_v46 }
 0x5c5   : > { %v760_v47 = vpop.permute.xlu0 %759 }
 0x5c6   : > { %763 = vst.msk [vmem:[#allocation2] sm:$0xff] %vm762_vm6, %v760_v47 }
 0x5cd   : > { %v764_v48 = vld [vmem:[#allocation2] sm:$0xff] }
 0x5ce   : > { %v765_v49 = vpack.c.bf16 %v764_v48, %v764_v48 }
 0x5d0   : > { %767 = vst.msk [vmem:[%s271_s14] sm:$0xf] %vm766_vm7, %v765_v49 }
 0x5d1 PF: > { %s14_s17 = sadd.s32 1, %s1035_s17   ;;  %s1192_s15 = smov %s1031_s16 }
 0x5d2   : > { %p11_p5 = scmp.ge.s32.totalorder %s14_s17, 4   ;;  %s1193_s16 = smov %s1195_s18 }
 0x5d4   :  { %13 = sbr.rel (!%p11_p5) target bundleno = 2 (0x2), region = 75 }

// kernel: bart_classification_forward.47
= control target key start
LH: loop header
LB: loop body
LE: loop exit
PB: predicated region body
PF: predicated region fallthrough
CT: control target
= control target key end

     0   :  { %v130_v0 = vmov 0.0   ;;  %vm131_vm0 = vmmov 0   ;;  %vm45_vm1 = vcmask 261120   ;;  %vm98_vm2 = vcmask 257024   ;;  %s170_s1 = inlined_call_operand.vmem [shape: bf16[32,32], index: 1, kind: input, shape index: {}]   ;;  %s171_s0 = inlined_call_operand.vmem [shape: bf16[16,32], index: 0, kind: input, shape index: {}]   ;;  %s172_s2 = inlined_call_operand.vmem [shape: f32[1,32], index: 2, kind: input, shape index: {}]   ;;  %s173_s3 = inlined_call_operand.vmem [shape: bf16[16,32], index: 3, kind: output, shape index: {}]  }
   0x1   :  { %117 = vmatprep.subr.bf16.mxu0 %v130_v0  ;;  %v127_v1 = vld [vmem:[%s170_s1] sm:$0xff]   ;;  %121 = vmatprep.mubr.msk.bf16.mxu0 %vm131_vm0, %v130_v0  ;;  %v128_v2 = vld [vmem:[%s170_s1 + $0x8] sm:$0xff]  }
   0x2   :  { %118 = vmatpush3.bf16.msra.mxu0 %v127_v1  ;;  %v129_v3 = vld [vmem:[%s171_s0] sm:$0xff]  }
   0x3   :  { %119 = vmatprep.subr.bf16.mxu0 %v130_v0  ;;  %v105_v4 = vld [vmem:[%s172_s2] ss:$0 sm:$0xff] }
   0x6   :  { %120 = vmatpush3.bf16.msra.mxu0 %v128_v2 }
   0x9   :  { %122 = vmatmul.mubr.msk.bf16.vlgmr.msra.gmra.mrb[0].mxu0 %vm45_vm1, %v129_v3 }
  0xdc   :  { %v83_v5 = vpop.f32.mrb[0].mxu0 }
  0xdd   :  { %v84_v6 = vadd.f32 %v105_v4, %v83_v5  ;;  %v123_v7 = vpop.f32.mrb[1].mxu0 }
  0xde   :  { %v86_v8 = vpop.f32.mrb[2].mxu0 }
  0xdf   :  { %v112_v9 = vpack.c.bf16 %v84_v6, %v84_v6  ;;  %v87_v10 = vadd.f32 %v105_v4, %v86_v8  ;;  %v124_v11 = vpop.f32.mrb[3].mxu0 }
  0xe1   :  { %99 = vst.msk [vmem:[%s173_s3] sm:$0xf] %vm98_vm2, %v112_v9  ;;  %v113_v12 = vpack.c.bf16 %v87_v10, %v87_v10 }
  0xe3   :  { %100 = vst.msk [vmem:[%s173_s3 + $0x4] sm:$0xf] %vm98_vm2, %v113_v12 }

// kernel: bart_classification_forward.34
= control target key start
LH: loop header
LB: loop body
LE: loop exit
PB: predicated region body
PF: predicated region fallthrough
CT: control target
= control target key end

     0   :  { %s1061_s15 = smov 0   ;;  %s1063_s16 = smov 0   ;;  %s1178_s0 = inlined_call_operand.vmem [shape: bf16[2,8,32], index: 0, kind: input, shape index: {}]   ;;  %s1179_s1 = inlined_call_operand.vmem [shape: bf16[2,8,32], index: 1, kind: input, shape index: {}]   ;;  %s1180_s2 = inlined_call_operand.vmem [shape: bf16[2,8,32], index: 2, kind: input, shape index: {}]   ;;  %s1181_s3 = inlined_call_operand.vmem [shape: f32[2,1,8], index: 3, kind: input, shape index: {}]   ;;  %s1182_s4 = inlined_call_operand.vmem [shape: bf16[2,8,32], index: 4, kind: output, shape index: {}]  }
   0x1   :  { %s1065_s17 = smov 0  }
   0x2 LB: > { %s26_s18 = sadd.s32 1, %s1022_s16  ;;  %p870_p0 = scmp.ge.s32.totalorder %s1026_s17, 1  ;;  %s1026_s17 = sphi %s1065_s17, %s14_s17   ;;  %s1022_s16 = sphi %s1063_s16, %s1184_s16   ;;  %s1018_s15 = sphi %s1061_s15, %s1183_s15  }
   0x3   : > { %p28_p1 = scmp.ge.s32.totalorder %s26_s18, 2  ;;  %p206_p2 = scmp.lt.s32.totalorder %s1026_s17, 3 }
   0x5   : > { %s1186_s18 = smov (%p28_p1, %s26_s18), 0  ;;  %p207_p3 = pnand %p870_p0, %p206_p2 }
   0x6   : > { %p247_p4 = scmp.lt.s32.totalorder (!%p207_p3), %s1018_s15, 1  ;;  %v1028_v0 = vmov (!%p207_p3), 0.0   ;;  %vm1029_vm0 = vmmov (!%p207_p3), 0   ;;  %vm283_vm1 = vcmask (!%p207_p3), 64512   ;;  %s1030_s29 = smov (!%p207_p3), 120   ;;  %vm347_vm2 = vcmask (!%p207_p3), 1043456  }
   0x7   : > { %210 = sbr.rel (%p207_p3) target bundleno = 1489 (0x5d1), region = 36  ;;  %905 = vmatprep.subr.bf16.mxu0 (!%p207_p3), %v1028_v0  ;;  %907 = vmatprep.mubr.msk.bf16.mxu0 (!%p207_p3), %vm1029_vm0, %v1028_v0  ;;  %s1031_s30 = smov (!%p207_p3), 112   ;;  %vm517_vm3 = vcmask (!%p207_p3), 130112   ;;  %vm635_vm4 = vcmask (!%p207_p3), 195712   ;;  %vm753_vm5 = vcmask (!%p207_p3), 261312   ;;  %vm757_vm6 = vcmask (!%p207_p3), 257024  }
   0x8   : > { %911 = vmatprep.subr.bf16.mxu1 (!%p207_p3), %v1028_v0  ;;  %913 = vmatprep.mubr.msk.bf16.mxu1 (!%p207_p3), %vm1029_vm0, %v1028_v0  ;;  %s1032_s5 = smov (!%p207_p3), 104   ;;  %s1033_s9 = smov (!%p207_p3), 8  }
   0x9   : > { %s1034_s10 = smov (!%p207_p3), 16   ;;  %s1035_s11 = smov (!%p207_p3), 24  }
   0xe   : > { %s1188_s15 = smov (!%p247_p4, %s1018_s15), 1 }
   0xf   : > { %s1085_s19 = sshll.u32 %s1188_s15, 2  ;;  %s264_s28 = scalar_lea.vmem %s1181_s3, %s1188_s15 }
  0x10   : > { %s257_s22 = scalar_lea.vmem %s1179_s1, %s1085_s19  ;;  %s253_s25 = scalar_lea.vmem %s1178_s0, %s1085_s19  ;;  %v1103_v5 = vld [vmem:[%s264_s28] ss:$0 sm:$0xff] }
  0x11   : > { %v274_v1 = vld [vmem:[%s257_s22] sm:$0xf]  ;;  %s261_s8 = scalar_lea.vmem %s1180_s2, %s1085_s19  ;;  %s271_s14 = scalar_lea.vmem %s1182_s4, %s1085_s19 }
  0x12   : > { %v288_v2 = vsel %vm283_vm1, %v274_v1, 0  ;;  %v273_v3 = vld [vmem:[%s253_s25] sm:$0xf]  ;;  %v879_v12 = vcombine.low %v274_v1, %v274_v1 }
  0x13   : > { %906 = vmatpush3.bf16.xpose.msra.mxu0 %v288_v2  ;;  %v878_v13 = vcombine.low %v273_v3, %v273_v3  ;;  %v1117_v19 = vld [vmem:[%s261_s8] sm:$0xf] }
  0x14   : > { %923 = vmatprep.subr.bf16.mxu0 %v1028_v0  ;;  %400 = vrot.lane.b32.xlu1 %v879_v12, %s1030_s29  ;;  %v349_v20 = vsel %vm347_vm2, %v1117_v19, 0 }
  0x15   : > { %912 = vmatpush3.bf16.msra.mxu1 %v349_v20 }
  0x16   : > { %917 = vmatprep.subr.bf16.mxu1 %v1028_v0 }
  0x18   : > { %395 = vrot.lane.b32.xlu1 %v878_v13, %s1030_s29 }
  0x1a   : > { %908 = vmatmul.mubr.msk.bf16.vlgmr.msra.gmra.mrb[0].mxu0 %vm283_vm1, %v273_v3 }
  0x1b   : > { %925 = vmatprep.mubr.msk.bf16.mxu0 %vm1029_vm0, %v1028_v0 }
  0x1c   : > { %519 = vrot.lane.b32.xlu1 %v878_v13, %s1031_s30 }
  0x20   : > { %639 = vrot.lane.b32.xlu1 %v879_v12, %s1032_s5 }
  0x24   : > { %637 = vrot.lane.b32.xlu1 %v878_v13, %s1032_s5 }
  0x86   : > { %v401_v23 = vpop.permute.xlu1 %400 }
  0x87   : > { %v406_v25 = vsel %vm283_vm1, %v401_v23, 0 }
  0x8a   : > { %v396_v27 = vpop.permute.xlu1 %395 }
  0x8e   : > { %v520_v29 = vpop.permute.xlu1 %519 }
  0x92   : > { %v640_v31 = vpop.permute.xlu1 %639 }
  0x93   : > { %v645_v32 = vsel %vm283_vm1, %v640_v31, 0 }
  0x96   : > { %v638_v33 = vpop.permute.xlu1 %637 }
  0xed   : > { %v324_v4 = vpop.f32.mrb[0].mxu0 }
  0xee   : > { %v330_v6 = vmul.f32 0.35355338, %v324_v4  ;;  %v909_v7 = vpop.f32.mrb[1].mxu0 }
  0xef   : > { %v327_v8 = vpop.f32.mrb[2].mxu0 }
  0xf0   : > { %v910_v9 = vpop.f32.mrb[3].mxu0  ;;  %v331_v10 = vadd.f32 %v1103_v5, %v330_v6 }
  0xf2   : > { %v332_v11 = vsel %vm283_vm1, %v331_v10, -inf }
  0xf3   : > { %333 = vmax.xlane.f32.xlu0 %v332_v11 }
 0x180   : > { %v334_v14 = vpop.xlane.xlu0 %333 }
 0x181   : > { %v335_v15 = vsub.f32 %v331_v10, %v334_v14 }
 0x183   : > { %v336_v16 = vmul.f32 1.442695, %v335_v15 }
 0x185   : > { %988 = vpow2.f32 %v336_v16 }
 0x18f   : > { %v989_v17 = vpop.eup %988 }
 0x190   : > { %v338_v18 = vsel %vm283_vm1, %v989_v17, 0.0 }
 0x191   : > { %339 = vadd.xlane.f32.xlu0 %v338_v18 }
 0x1a7   : > { %521 = vrot.lane.b32.xlu0 %v879_v12, %s1031_s30 }
 0x21e   : > { %v340_v21 = vpop.xlane.xlu0 %339 }
 0x21f   : > { %990 = vrcp.f32 %v340_v21 }
 0x222   : > { %v522_v28 = vpop.permute.xlu0 %521 }
 0x223   : > { %v527_v30 = vsel %vm283_vm1, %v522_v28, 0 }
 0x229   : > { %v991_v22 = vpop.eup %990 }
 0x22a   : > { %v342_v24 = vmul.f32 %v991_v22, %v989_v17 }
 0x22c   : > { %v343_v26 = vpack.c.bf16 %v342_v24, %v342_v24 }
 0x22e   : > { %914 = vmatmul.mubr.msk.bf16.vlgmr.msra.gmra.mrb[0].mxu1 %vm283_vm1, %v343_v26 }
 0x22f   : > { %918 = vmatpush3.bf16.xpose.msra.mxu1 %v406_v25  ;;  %919 = vmatprep.mubr.msk.bf16.mxu1 %vm1029_vm0, %v1028_v0 }
 0x230   : > { %929 = vmatprep.subr.bf16.mxu1 %v1028_v0 }
 0x236   : > { %920 = vmatmul.mubr.msk.bf16.vlgmr.msra.gmra.mrb[4].mxu1 %vm283_vm1, %v396_v27 }
 0x237   : > { %930 = vmatpush3.bf16.xpose.msra.mxu1 %v527_v30  ;;  %931 = vmatprep.mubr.msk.bf16.mxu1 %vm1029_vm0, %v1028_v0 }
 0x238   : > { %941 = vmatprep.subr.bf16.mxu1 %v1028_v0 }
 0x23e   : > { %932 = vmatmul.mubr.msk.bf16.vlgmr.msra.gmra.mrb[8].mxu1 %vm283_vm1, %v520_v29 }
 0x23f   : > { %942 = vmatpush3.bf16.xpose.msra.mxu1 %v645_v32  ;;  %943 = vmatprep.mubr.msk.bf16.mxu1 %vm1029_vm0, %v1028_v0 }
 0x246   : > { %944 = vmatmul.mubr.msk.bf16.vlgmr.msra.gmra.mrb[12].mxu1 %vm283_vm1, %v638_v33 }
 0x301   : > { %v385_v34 = vpop.f32.mrb[0].mxu1 }
 0x302   : > { %391 = vst.msk [vmem:[#allocation2] sm:$0xff] %vm283_vm1, %v385_v34  ;;  %v915_v35 = vpop.f32.mrb[1].mxu1 }
 0x303   : > { %v388_v36 = vpop.f32.mrb[2].mxu1 }
 0x304   : > { %v916_v37 = vpop.f32.mrb[3].mxu1 }
 0x309   : > { %v442_v38 = vpop.f32.mrb[4].mxu1 }
 0x30a   : > { %v448_v39 = vmul.f32 0.35355338, %v442_v38  ;;  %v921_v40 = vpop.f32.mrb[5].mxu1 }
 0x30b   : > { %v445_v41 = vpop.f32.mrb[6].mxu1 }
 0x30c   : > { %v922_v42 = vpop.f32.mrb[7].mxu1  ;;  %v449_v43 = vadd.f32 %v1103_v5, %v448_v39 }
 0x30e   : > { %v450_v44 = vsel %vm283_vm1, %v449_v43, -inf }
 0x30f   : > { %451 = vmax.xlane.f32.xlu1 %v450_v44 }
 0x311   : > { %v563_v45 = vpop.f32.mrb[8].mxu1 }
 0x312   : > { %v569_v46 = vmul.f32 0.35355338, %v563_v45  ;;  %v933_v47 = vpop.f32.mrb[9].mxu1 }
 0x313   : > { %v566_v48 = vpop.f32.mrb[10].mxu1 }
 0x314   : > { %v570_v49 = vadd.f32 %v1103_v5, %v569_v46  ;;  %v934_v50 = vpop.f32.mrb[11].mxu1 }
 0x316   : > { %v571_v51 = vsel %vm283_vm1, %v570_v49, -inf }
 0x317   : > { %572 = vmax.xlane.f32.xlu0 %v571_v51 }
 0x319   : > { %v681_v52 = vpop.f32.mrb[12].mxu1 }
 0x31a   : > { %v687_v53 = vmul.f32 0.35355338, %v681_v52  ;;  %v945_v54 = vpop.f32.mrb[13].mxu1 }
 0x31b   : > { %v684_v55 = vpop.f32.mrb[14].mxu1 }
 0x31c   : > { %v688_v56 = vadd.f32 %v1103_v5, %v687_v53  ;;  %v946_v57 = vpop.f32.mrb[15].mxu1  ;;  %v881_v5 = vcombine.low %v1117_v19, %v1117_v19 }
 0x31e   : > { %v689_v58 = vsel %vm283_vm1, %v688_v56, -inf }
 0x31f   : > { %690 = vmax.xlane.f32.xlu1 %v689_v58 }
 0x39c   : > { %v452_v59 = vpop.xlane.xlu1 %451 }
 0x39d   : > { %v453_v60 = vsub.f32 %v449_v43, %v452_v59 }
 0x39f   : > { %v454_v61 = vmul.f32 1.442695, %v453_v60 }
 0x3a1   : > { %992 = vpow2.f32 %v454_v61 }
 0x3a4   : > { %v573_v62 = vpop.xlane.xlu0 %572 }
 0x3a5   : > { %v574_v63 = vsub.f32 %v570_v49, %v573_v62 }
 0x3a7   : > { %v575_v1 = vmul.f32 1.442695, %v574_v63 }
 0x3a9   : > { %994 = vpow2.f32 %v575_v1 }
 0x3ab   : > { %v993_v2 = vpop.eup %992 }
 0x3ac   : > { %v456_v3 = vsel %vm283_vm1, %v993_v2, 0.0  ;;  %v691_v7 = vpop.xlane.xlu1 %690 }
 0x3ad   : > { %457 = vadd.xlane.f32.xlu1 %v456_v3  ;;  %v692_v8 = vsub.f32 %v688_v56, %v691_v7 }
 0x3af   : > { %v693_v9 = vmul.f32 1.442695, %v692_v8 }
 0x3b1   : > { %996 = vpow2.f32 %v693_v9 }
 0x3b3   : > { %v995_v4 = vpop.eup %994 }
 0x3b4   : > { %v577_v6 = vsel %vm283_vm1, %v995_v4, 0.0 }
 0x3b5   : > { %578 = vadd.xlane.f32.xlu0 %v577_v6 }
 0x3bb   : > { %v997_v10 = vpop.eup %996 }
 0x3bc   : > { %v695_v11 = vsel %vm283_vm1, %v997_v10, 0.0 }
 0x3be   : > { %583 = vrot.lane.b32.xlu1 %v881_v5, %s1031_s30 }
 0x3cb   : > { %465 = vrot.lane.b32.xlu0 %v881_v5, %s1030_s29 }
 0x3e2   : > { %696 = vadd.xlane.f32.xlu1 %v695_v11 }
 0x3f3   : > { %701 = vrot.lane.b32.xlu1 %v881_v5, %s1032_s5 }
 0x43a   : > { %v458_v12 = vpop.xlane.xlu1 %457 }
 0x43b   : > { %998 = vrcp.f32 %v458_v12 }
 0x43e   : > { %v584_v18 = vpop.permute.xlu1 %583 }
 0x43f   : > { %v589_v20 = vsel %vm347_vm2, %v584_v18, 0 }
 0x442   : > { %v579_v13 = vpop.xlane.xlu0 %578 }
 0x443   : > { %1000 = vrcp.f32 %v579_v13 }
 0x445   : > { %v999_v14 = vpop.eup %998 }
 0x446   : > { %v460_v15 = vmul.f32 %v999_v14, %v993_v2  ;;  %v466_v16 = vpop.permute.xlu0 %465 }
 0x447   : > { %v471_v17 = vsel %vm347_vm2, %v466_v16, 0 }
 0x448   : > { %924 = vmatpush3.bf16.msra.mxu0 %v471_v17  ;;  %v461_v19 = vpack.c.bf16 %v460_v15, %v460_v15 }
 0x449   : > { %935 = vmatprep.subr.bf16.mxu0 %v1028_v0 }
 0x44b   : > { %926 = vmatmul.mubr.msk.bf16.vlgmr.msra.gmra.mrb[4].mxu0 %vm283_vm1, %v461_v19 }
 0x44c   : > { %936 = vmatpush3.bf16.msra.mxu0 %v589_v20  ;;  %937 = vmatprep.mubr.msk.bf16.mxu0 %vm1029_vm0, %v1028_v0 }
 0x44d   : > { %v1001_v21 = vpop.eup %1000  ;;  %947 = vmatprep.subr.bf16.mxu0 %v1028_v0 }
 0x44e   : > { %v581_v22 = vmul.f32 %v1001_v21, %v995_v4 }
 0x450   : > { %v582_v23 = vpack.c.bf16 %v581_v22, %v581_v22 }
 0x453   : > { %938 = vmatmul.mubr.msk.bf16.vlgmr.msra.gmra.mrb[8].mxu0 %vm283_vm1, %v582_v23 }
 0x454   : > { %949 = vmatprep.mubr.msk.bf16.mxu0 %vm1029_vm0, %v1028_v0 }
 0x46f   : > { %v697_v24 = vpop.xlane.xlu1 %696 }
 0x470   : > { %1002 = vrcp.f32 %v697_v24 }
 0x473   : > { %v702_v25 = vpop.permute.xlu1 %701 }
 0x474   : > { %v707_v26 = vsel %vm347_vm2, %v702_v25, 0 }
 0x475   : > { %948 = vmatpush3.bf16.msra.mxu0 %v707_v26 }
 0x47a   : > { %v1003_v27 = vpop.eup %1002 }
 0x47b   : > { %v699_v28 = vmul.f32 %v1003_v27, %v997_v10 }
 0x47d   : > { %v700_v29 = vpack.c.bf16 %v699_v28, %v699_v28 }
 0x47f   : > { %950 = vmatmul.mubr.msk.bf16.vlgmr.msra.gmra.mrb[12].mxu0 %vm283_vm1, %v700_v29 }
 0x51e   : > { %v507_v30 = vpop.f32.mrb[4].mxu0 }
 0x51f   : > { %514 = vrot.lane.b32.xlu0 %v507_v30, %s1033_s9  ;;  %v927_v31 = vpop.f32.mrb[5].mxu0 }
 0x520   : > { %v510_v32 = vpop.f32.mrb[6].mxu0 }
 0x521   : > { %v928_v33 = vpop.f32.mrb[7].mxu0 }
 0x526   : > { %v625_v34 = vpop.f32.mrb[8].mxu0 }
 0x527   : > { %632 = vrot.lane.b32.xlu1 %v625_v34, %s1034_s10  ;;  %v939_v0 = vpop.f32.mrb[9].mxu0 }
 0x528   : > { %v628_v35 = vpop.f32.mrb[10].mxu0 }
 0x529   : > { %v940_v36 = vpop.f32.mrb[11].mxu0 }
 0x552   : > { %v743_v37 = vpop.f32.mrb[12].mxu0 }
 0x553   : > { %750 = vrot.lane.b32.xlu0 %v743_v37, %s1035_s11  ;;  %v951_v38 = vpop.f32.mrb[13].mxu0 }
 0x554   : > { %v746_v39 = vpop.f32.mrb[14].mxu0 }
 0x555   : > { %v952_v40 = vpop.f32.mrb[15].mxu0 }
 0x591   : > { %v515_v41 = vpop.permute.xlu0 %514 }
 0x592   : > { %518 = vst.msk [vmem:[#allocation2] sm:$0xff] %vm517_vm3, %v515_v41 }
 0x599   : > { %v633_v42 = vpop.permute.xlu1 %632 }
 0x59a   : > { %636 = vst.msk [vmem:[#allocation2] sm:$0xff] %vm635_vm4, %v633_v42 }
 0x5c5   : > { %v751_v43 = vpop.permute.xlu0 %750 }
 0x5c6   : > { %754 = vst.msk [vmem:[#allocation2] sm:$0xff] %vm753_vm5, %v751_v43 }
 0x5cd   : > { %v755_v44 = vld [vmem:[#allocation2] sm:$0xff] }
 0x5ce   : > { %v756_v45 = vpack.c.bf16 %v755_v44, %v755_v44 }
 0x5d0   : > { %758 = vst.msk [vmem:[%s271_s14] sm:$0xf] %vm757_vm6, %v756_v45 }
 0x5d1 PF: > { %s14_s17 = sadd.s32 1, %s1026_s17   ;;  %s1183_s15 = smov %s1022_s16 }
 0x5d2   : > { %p11_p5 = scmp.ge.s32.totalorder %s14_s17, 4   ;;  %s1184_s16 = smov %s1186_s18 }
 0x5d4   :  { %13 = sbr.rel (!%p11_p5) target bundleno = 2 (0x2), region = 75 }

// kernel: bart_classification_forward.37
= control target key start
LH: loop header
LB: loop body
LE: loop exit
PB: predicated region body
PF: predicated region fallthrough
CT: control target
= control target key end

     0   :  { %v227_v0 = vmov 0.0   ;;  %vm228_vm0 = vmmov 0   ;;  %vm70_vm1 = vcmask 523264   ;;  %vm121_vm2 = vcmask 261120   ;;  %s301_s1 = inlined_call_operand.vmem [shape: bf16[64,32], index: 1, kind: input, shape index: {}]   ;;  %s302_s0 = inlined_call_operand.vmem [shape: bf16[16,64], index: 0, kind: input, shape index: {}]   ;;  %s303_s3 = inlined_call_operand.vmem [shape: bf16[16,32], index: 3, kind: input, shape index: {}]   ;;  %s304_s2 = inlined_call_operand.vmem [shape: f32[1,32], index: 2, kind: input, shape index: {}, may-alias: {2,5}]   ;;  %s305_s4 = inlined_call_operand.vmem [shape: f32[1,32], index: 4, kind: input, shape index: {}]   ;;  %s306_s5 = inlined_call_operand.vmem [shape: f32[1,32], index: 5, kind: input, shape index: {}, may-alias: {2,5}]   ;;  %s307_s6 = inlined_call_operand.vmem [shape: bf16[16,32], index: 6, kind: output, shape index: {}]  }
   0x1   :  { %204 = vmatprep.subr.bf16.mxu0 %v227_v0  ;;  %v218_v1 = vld [vmem:[%s301_s1] sm:$0xff]   ;;  %212 = vmatprep.mubr.msk.bf16.mxu0 %vm228_vm0, %v227_v0  ;;  %v219_v2 = vld [vmem:[%s301_s1 + $0x8] sm:$0xff]   ;;  %v220_v3 = vld [vmem:[%s301_s1 + $0x10] sm:$0xff]   ;;  %vm175_vm3 = vcmask 257024  }
   0x2   :  { %205 = vmatpush3.bf16.msra.mxu0 %v218_v1  ;;  %v221_v4 = vld [vmem:[%s301_s1 + $0x18] sm:$0xff]   ;;  %v222_v5 = vld [vmem:[%s302_s0] sm:$0xff]  }
   0x3   :  { %206 = vmatprep.subr.bf16.mxu0 %v227_v0  ;;  %v196_v6 = vld [vmem:[%s303_s3] sm:$0xff]  }
   0x4   :  { %v182_v7 = vld [vmem:[%s304_s2] ss:$0 sm:$0xff]  ;;  %v197_v8 = vunpack.c.l.bf16 %v196_v6  ;;  %v198_v12 = vunpack.c.h.bf16 %v196_v6 }
   0x5   :  { %v189_v37 = vld [vmem:[%s305_s4] ss:$0 sm:$0xff] }
   0x6   :  { %207 = vmatpush3.bf16.msra.mxu0 %v219_v2  ;;  %v190_v39 = vld [vmem:[%s306_s5] ss:$0 sm:$0xff] }
   0x7   :  { %208 = vmatprep.subr.bf16.mxu0 %v227_v0 }
   0xa   :  { %209 = vmatpush3.bf16.msra.mxu0 %v220_v3 }
   0xb   :  { %210 = vmatprep.subr.bf16.mxu0 %v227_v0 }
   0xe   :  { %211 = vmatpush3.bf16.msra.mxu0 %v221_v4 }
  0x11   :  { %213 = vmatmul.mubr.msk.bf16.vlgmr.msra.gmra.mrb[0].mxu0 %vm70_vm1, %v222_v5 }
  0xe4   :  { %v108_v9 = vpop.f32.mrb[0].mxu0 }
  0xe5   :  { %v109_v10 = vadd.f32 %v182_v7, %v108_v9  ;;  %v214_v11 = vpop.f32.mrb[1].mxu0 }
  0xe6   :  { %v111_v13 = vpop.f32.mrb[2].mxu0 }
  0xe7   :  { %v112_v14 = vadd.f32 %v182_v7, %v111_v13  ;;  %v215_v15 = vpop.f32.mrb[3].mxu0  ;;  %v119_v16 = vadd.f32 %v197_v8, %v109_v10 }
  0xe9   :  { %v122_v17 = vsel %vm121_vm2, %v119_v16, 0.0  ;;  %v120_v18 = vadd.f32 %v198_v12, %v112_v14 }
  0xea   :  { %123 = vadd.xlane.f32.xlu0 %v122_v17 }
  0xeb   :  { %v125_v19 = vsel %vm121_vm2, %v120_v18, 0.0 }
  0xee   :  { %126 = vadd.xlane.f32.xlu0 %v125_v19 }
 0x177   :  { %v124_v20 = vpop.xlane.xlu0 %123 }
 0x178   :  { %v129_v21 = vmul.f32 0.03125, %v124_v20 }
 0x17a   :  { %v131_v22 = vsub.f32 %v119_v16, %v129_v21 }
 0x17b   :  { %v127_v23 = vpop.xlane.xlu0 %126 }
 0x17c   :  { %v130_v24 = vmul.f32 0.03125, %v127_v23  ;;  %v133_v25 = vmul.f32 %v131_v22, %v131_v22 }
 0x17e   :  { %v132_v26 = vsub.f32 %v120_v18, %v130_v24  ;;  %v135_v27 = vsel %vm121_vm2, %v133_v25, 0.0 }
 0x17f   :  { %136 = vadd.xlane.f32.xlu1 %v135_v27 }
 0x180   :  { %v134_v28 = vmul.f32 %v132_v26, %v132_v26 }
 0x182   :  { %v138_v29 = vsel %vm121_vm2, %v134_v28, 0.0 }
 0x183   :  { %139 = vadd.xlane.f32.xlu1 %v138_v29 }
 0x20c   :  { %v137_v30 = vpop.xlane.xlu1 %136 }
 0x20d   :  { %v141_v31 = vmul.f32 0.03125, %v137_v30 }
 0x20f   :  { %v143_v32 = vadd.f32 1e-05, %v141_v31 }
 0x210   :  { %v140_v33 = vpop.xlane.xlu1 %139 }
 0x211   :  { %223 = vrsqrt.f32 %v143_v32  ;;  %v142_v34 = vmul.f32 0.03125, %v140_v33 }
 0x213   :  { %v144_v35 = vadd.f32 1e-05, %v142_v34 }
 0x215   :  { %225 = vrsqrt.f32 %v144_v35 }
 0x21b   :  { %v224_v36 = vpop.eup %223 }
 0x21c   :  { %v147_v38 = vmul.f32 %v224_v36, %v131_v22 }
 0x21e   :  { %v156_v40 = vmul.f32 %v189_v37, %v147_v38 }
 0x21f   :  { %v226_v41 = vpop.eup %225 }
 0x220   :  { %v165_v42 = vadd.f32 %v190_v39, %v156_v40  ;;  %v148_v43 = vmul.f32 %v226_v41, %v132_v26 }
 0x222   :  { %v193_v44 = vpack.c.bf16 %v165_v42, %v165_v42  ;;  %v157_v45 = vmul.f32 %v189_v37, %v148_v43 }
 0x224   :  { %176 = vst.msk [vmem:[%s307_s6] sm:$0xf] %vm175_vm3, %v193_v44  ;;  %v166_v46 = vadd.f32 %v190_v39, %v157_v45 }
 0x226   :  { %v194_v47 = vpack.c.bf16 %v166_v46, %v166_v46 }
 0x228   :  { %177 = vst.msk [vmem:[%s307_s6 + $0x4] sm:$0xf] %vm175_vm3, %v194_v47 }

// kernel: bart_classification_forward.36
= control target key start
LH: loop header
LB: loop body
LE: loop exit
PB: predicated region body
PF: predicated region fallthrough
CT: control target
= control target key end

     0   :  { %v152_v0 = vmov 0.0   ;;  %vm153_vm0 = vmmov 0   ;;  %vm45_vm1 = vcmask 261120   ;;  %vm116_vm2 = vcmask 519168   ;;  %s192_s1 = inlined_call_operand.vmem [shape: bf16[32,64], index: 1, kind: input, shape index: {}]   ;;  %s193_s0 = inlined_call_operand.vmem [shape: bf16[16,32], index: 0, kind: input, shape index: {}]   ;;  %s194_s2 = inlined_call_operand.vmem [shape: f32[1,64], index: 2, kind: input, shape index: {}]   ;;  %s195_s3 = inlined_call_operand.vmem [shape: bf16[16,64], index: 3, kind: output, shape index: {}]  }
   0x1   :  { %135 = vmatprep.subr.bf16.mxu0 %v152_v0  ;;  %v145_v1 = vld [vmem:[%s192_s1] sm:$0xff]   ;;  %139 = vmatprep.mubr.msk.bf16.mxu0 %vm153_vm0, %v152_v0  ;;  %v146_v2 = vld [vmem:[%s192_s1 + $0x8] sm:$0xff]  }
   0x2   :  { %136 = vmatpush3.bf16.msra.mxu0 %v145_v1  ;;  %v147_v3 = vld [vmem:[%s193_s0] sm:$0xff]  }
   0x3   :  { %137 = vmatprep.subr.bf16.mxu0 %v152_v0  ;;  %v123_v4 = vld [vmem:[%s194_s2] ss:$0 sm:$0xff] }
   0x6   :  { %138 = vmatpush3.bf16.msra.mxu0 %v146_v2 }
   0x9   :  { %140 = vmatmul.mubr.msk.bf16.vlgmr.msra.gmra.mrb[0].mxu0 %vm45_vm1, %v147_v3 }
  0xdc   :  { %v83_v5 = vpop.f32.mrb[0].mxu0 }
  0xdd   :  { %v84_v6 = vadd.f32 %v123_v4, %v83_v5  ;;  %v141_v7 = vpop.f32.mrb[1].mxu0 }
  0xde   :  { %v86_v8 = vpop.f32.mrb[2].mxu0 }
  0xdf   :  { %v90_v9 = vmul.f32 %v84_v6, %v84_v6  ;;  %v87_v10 = vadd.f32 %v123_v4, %v86_v8  ;;  %v142_v11 = vpop.f32.mrb[3].mxu0 }
  0xe1   :  { %v92_v12 = vmul.f32 %v90_v9, %v84_v6  ;;  %v91_v13 = vmul.f32 %v87_v10, %v87_v10 }
  0xe3   :  { %v94_v14 = vmul.f32 0.044715, %v92_v12  ;;  %v93_v15 = vmul.f32 %v91_v13, %v87_v10 }
  0xe5   :  { %v96_v16 = vadd.f32 %v94_v14, %v84_v6  ;;  %v95_v17 = vmul.f32 0.044715, %v93_v15 }
  0xe7   :  { %v98_v18 = vmul.f32 0.7978846, %v96_v16  ;;  %v97_v19 = vadd.f32 %v95_v17, %v87_v10 }
  0xe9   :  { %148 = vtanh.f32 %v98_v18  ;;  %v99_v20 = vmul.f32 0.7978846, %v97_v19 }
  0xeb   :  { %150 = vtanh.f32 %v99_v20 }
  0xf3   :  { %v149_v21 = vpop.eup %148 }
  0xf4   :  { %v102_v22 = vadd.f32 1.0, %v149_v21 }
  0xf5   :  { %v151_v23 = vpop.eup %150 }
  0xf6   :  { %v104_v24 = vmul.f32 0.5, %v102_v22  ;;  %v103_v25 = vadd.f32 1.0, %v151_v23 }
  0xf8   :  { %v106_v26 = vmul.f32 %v104_v24, %v84_v6  ;;  %v105_v27 = vmul.f32 0.5, %v103_v25 }
  0xfa   :  { %v130_v28 = vpack.c.bf16 %v106_v26, %v106_v26  ;;  %v107_v29 = vmul.f32 %v105_v27, %v87_v10 }
  0xfc   :  { %117 = vst.msk [vmem:[%s195_s3] sm:$0xf] %vm116_vm2, %v130_v28  ;;  %v131_v30 = vpack.c.bf16 %v107_v29, %v107_v29 }
  0xfe   :  { %118 = vst.msk [vmem:[%s195_s3 + $0x4] sm:$0xf] %vm116_vm2, %v131_v30 }

// kernel: bart_classification_forward.48
= control target key start
LH: loop header
LB: loop body
LE: loop exit
PB: predicated region body
PF: predicated region fallthrough
CT: control target
= control target key end

     0   :  { %v130_v0 = vmov 0.0   ;;  %vm131_vm0 = vmmov 0   ;;  %vm45_vm1 = vcmask 261120   ;;  %vm98_vm2 = vcmask 519168   ;;  %s170_s1 = inlined_call_operand.vmem [shape: bf16[32,64], index: 1, kind: input, shape index: {}]   ;;  %s171_s0 = inlined_call_operand.vmem [shape: bf16[16,32], index: 0, kind: input, shape index: {}]   ;;  %s172_s2 = inlined_call_operand.vmem [shape: f32[1,64], index: 2, kind: input, shape index: {}]   ;;  %s173_s3 = inlined_call_operand.vmem [shape: bf16[16,64], index: 3, kind: output, shape index: {}]  }
   0x1   :  { %117 = vmatprep.subr.bf16.mxu0 %v130_v0  ;;  %v127_v1 = vld [vmem:[%s170_s1] sm:$0xff]   ;;  %121 = vmatprep.mubr.msk.bf16.mxu0 %vm131_vm0, %v130_v0  ;;  %v128_v2 = vld [vmem:[%s170_s1 + $0x8] sm:$0xff]  }
   0x2   :  { %118 = vmatpush3.bf16.msra.mxu0 %v127_v1  ;;  %v129_v3 = vld [vmem:[%s171_s0] sm:$0xff]  }
   0x3   :  { %119 = vmatprep.subr.bf16.mxu0 %v130_v0  ;;  %v105_v4 = vld [vmem:[%s172_s2] ss:$0 sm:$0xff] }
   0x6   :  { %120 = vmatpush3.bf16.msra.mxu0 %v128_v2 }
   0x9   :  { %122 = vmatmul.mubr.msk.bf16.vlgmr.msra.gmra.mrb[0].mxu0 %vm45_vm1, %v129_v3 }
  0xdc   :  { %v83_v5 = vpop.f32.mrb[0].mxu0 }
  0xdd   :  { %v84_v6 = vadd.f32 %v105_v4, %v83_v5  ;;  %v123_v7 = vpop.f32.mrb[1].mxu0 }
  0xde   :  { %v86_v8 = vpop.f32.mrb[2].mxu0 }
  0xdf   :  { %v112_v9 = vpack.c.bf16 %v84_v6, %v84_v6  ;;  %v87_v10 = vadd.f32 %v105_v4, %v86_v8  ;;  %v124_v11 = vpop.f32.mrb[3].mxu0 }
  0xe1   :  { %99 = vst.msk [vmem:[%s173_s3] sm:$0xf] %vm98_vm2, %v112_v9  ;;  %v113_v12 = vpack.c.bf16 %v87_v10, %v87_v10 }
  0xe3   :  { %100 = vst.msk [vmem:[%s173_s3 + $0x4] sm:$0xf] %vm98_vm2, %v113_v12 }

// kernel: bart_classification_forward.62
= control target key start
LH: loop header
LB: loop body
LE: loop exit
PB: predicated region body
PF: predicated region fallthrough
CT: control target
= control target key end

     0   :  { %v136_v0 = vmov 0.0   ;;  %vm137_vm0 = vmmov 0   ;;  %vm45_vm1 = vcmask 261120   ;;  %vm100_vm2 = vcmask 519168   ;;  %s176_s1 = inlined_call_operand.vmem [shape: bf16[32,64], index: 1, kind: input, shape index: {}]   ;;  %s177_s0 = inlined_call_operand.vmem [shape: bf16[16,32], index: 0, kind: input, shape index: {}]   ;;  %s178_s2 = inlined_call_operand.vmem [shape: f32[1,64], index: 2, kind: input, shape index: {}]   ;;  %s179_s3 = inlined_call_operand.vmem [shape: bf16[16,64], index: 3, kind: output, shape index: {}]  }
   0x1   :  { %119 = vmatprep.subr.bf16.mxu0 %v136_v0  ;;  %v129_v1 = vld [vmem:[%s176_s1] sm:$0xff]   ;;  %123 = vmatprep.mubr.msk.bf16.mxu0 %vm137_vm0, %v136_v0  ;;  %v130_v2 = vld [vmem:[%s176_s1 + $0x8] sm:$0xff]  }
   0x2   :  { %120 = vmatpush3.bf16.msra.mxu0 %v129_v1  ;;  %v131_v3 = vld [vmem:[%s177_s0] sm:$0xff]  }
   0x3   :  { %121 = vmatprep.subr.bf16.mxu0 %v136_v0  ;;  %v107_v4 = vld [vmem:[%s178_s2] ss:$0 sm:$0xff] }
   0x6   :  { %122 = vmatpush3.bf16.msra.mxu0 %v130_v2 }
   0x9   :  { %124 = vmatmul.mubr.msk.bf16.vlgmr.msra.gmra.mrb[0].mxu0 %vm45_vm1, %v131_v3 }
  0xdc   :  { %v83_v5 = vpop.f32.mrb[0].mxu0 }
  0xdd   :  { %v84_v6 = vadd.f32 %v107_v4, %v83_v5  ;;  %v125_v7 = vpop.f32.mrb[1].mxu0 }
  0xde   :  { %v86_v8 = vpop.f32.mrb[2].mxu0 }
  0xdf   :  { %132 = vtanh.f32 %v84_v6  ;;  %v87_v9 = vadd.f32 %v107_v4, %v86_v8  ;;  %v126_v10 = vpop.f32.mrb[3].mxu0 }
  0xe1   :  { %134 = vtanh.f32 %v87_v9 }
  0xe9   :  { %v133_v11 = vpop.eup %132 }
  0xea   :  { %v114_v12 = vpack.c.bf16 %v133_v11, %v133_v11 }
  0xeb   :  { %v135_v13 = vpop.eup %134 }
  0xec   :  { %101 = vst.msk [vmem:[%s179_s3] sm:$0xf] %vm100_vm2, %v114_v12  ;;  %v115_v14 = vpack.c.bf16 %v135_v13, %v135_v13 }
  0xee   :  { %102 = vst.msk [vmem:[%s179_s3 + $0x4] sm:$0xf] %vm100_vm2, %v115_v14 }

// kernel: bart_classification_forward.63
= control target key start
LH: loop header
LB: loop body
LE: loop exit
PB: predicated region body
PF: predicated region fallthrough
CT: control target
= control target key end

     0   :  { %v335_v1 = vmov 0.0   ;;  %vm336_vm0 = vmmov 0   ;;  %s439_s0 = inlined_call_operand.vmem [shape: bf16[16,64], index: 0, kind: input, shape index: {}]   ;;  %s440_s1 = inlined_call_operand.vmem [shape: bf16[64,128], index: 1, kind: input, shape index: {}]   ;;  %s441_s2 = inlined_call_operand.vmem [shape: f32[1,128], index: 2, kind: input, shape index: {}]   ;;  %s442_s3 = inlined_call_operand.vmem [shape: s32[16,1], index: 3, kind: input, shape index: {}]   ;;  %s443_s4 = inlined_call_operand.vmem [shape: f32[16,128], index: 4, kind: output, shape index: {0}]   ;;  %s444_s5 = inlined_call_operand.hbm [shape: f32[1,1], index: 5, kind: output, shape index: {1}]  }
   0x1   :  { %v296_v0 = vld [vmem:[%s440_s1] sm:$0xff]   ;;  %274 = vmatprep.subr.bf16.mxu0 %v335_v1  ;;  %v297_v2 = vld [vmem:[%s440_s1 + $0x8] sm:$0xff]   ;;  %282 = vmatprep.mubr.msk.bf16.mxu0 %vm336_vm0, %v335_v1 }
   0x2   :  { %275 = vmatpush3.bf16.msra.mxu0 %v296_v0 }
   0x3   :  { %276 = vmatprep.subr.bf16.mxu0 %v335_v1 }
   0x4   :  { %11 = vsyncpa [#allocation5], 0  ;;  %v298_v3 = vld [vmem:[%s440_s1 + $0x10] sm:$0xff]   ;;  %v299_v4 = vld [vmem:[%s440_s1 + $0x18] sm:$0xff]   ;;  %vm74_vm1 = vcmask 523264   ;;  %v123_v6 = vlaneseq  ;;  %v337_v18 = vmov 0  }
   0x5   :  { %v300_v5 = vld [vmem:[%s439_s0] sm:$0xff]   ;;  %294 = vset.pattern.permute.xlu0 %v337_v18  ;;  %295 = vset.pattern.permute.xlu1 %v337_v18  ;;  %v122_v29 = vld [vmem:[%s442_s3 + $0x8] sm:$0xff]  ;;  %vm198_vm7 = vcmask 7168   ;;  %vm25_vm8 = vcmask 0   ;;  %s338_s10 = smov [#allocation4]  }
   0x6   :  { %277 = vmatpush3.bf16.msra.mxu0 %v297_v2  ;;  %v124_v7 = vand.u32 127, %v123_v6  ;;  %v258_v8 = vld [vmem:[%s441_s2] ss:$0 sm:$0xff]  ;;  %vm190_vm6 = vcmp.ne.s32.totalorder %v122_v29, 1  ;;  %26 = vst.msk [vmem:[#allocation2] sm:$0x1] %vm25_vm8, %v335_v1 }
   0x7   :  { %278 = vmatprep.subr.bf16.mxu0 %v335_v1  ;;  %v403_v17 = vld [vmem:[%s442_s3] sm:$0xff]  ;;  %v268_v0 = vsel %vm190_vm6, 1.0, %v335_v1  ;;  %27 = vst.msk [vmem:[#allocation3] sm:$0x1] %vm25_vm8, %v335_v1  ;;  %s248_s11 = sshll.u32 %s338_s10, 4  ;;  %s249_s11 = int_to_ptr.vmem [resolvable:$true] %s248_s11 }
   0x8   :  { %vm125_vm2 = vcmp.lt.s32.totalorder %v124_v7, 6  ;;  %vm189_vm5 = vcmp.ne.s32.totalorder %v403_v17, 1  ;;  %s311_s12 = scalar_lea.vmem %s249_s11, 16  ;;  %s315_s13 = scalar_lea.vmem %s249_s11, 32 }
   0x9   :  { %v267_v61 = vsel %vm189_vm5, 1.0, %v335_v1  ;;  %p312_p0 = scmp.ne.s32.totalorder %s249_s11, %s311_s12  ;;  %p316_p1 = scmp.lt.s32.totalorder %s249_s11, %s249_s11 }
   0xa   :  { %279 = vmatpush3.bf16.msra.mxu0 %v298_v3  ;;  %p317_p2 = scmp.lt.s32.totalorder %s315_s13, %s311_s12 }
   0xb   :  { %280 = vmatprep.subr.bf16.mxu0 %v335_v1 }
   0xc   :  { %p318_p3 = por %p317_p2, %p316_p1 }
   0xe   :  { %281 = vmatpush3.bf16.msra.mxu0 %v299_v4  ;;  %p319_p4 = pnand %p318_p3, %p312_p0 }
  0x11   :  { %283 = vmatmul.mubr.msk.bf16.vlgmr.msra.gmra.mrb[0].mxu0 %vm74_vm1, %v300_v5 }
  0xe4   :  { %v112_v9 = vpop.f32.mrb[0].mxu0 }
  0xe5   :  { %v113_v10 = vadd.f32 %v258_v8, %v112_v9  ;;  %v284_v11 = vpop.f32.mrb[1].mxu0 }
  0xe6   :  { %v115_v12 = vpop.f32.mrb[2].mxu0 }
  0xe7   :  { %119 = vst [vmem:[%s443_s4] sm:$0xff] %v113_v10  ;;  %v116_v13 = vadd.f32 %v258_v8, %v115_v12  ;;  %v285_v14 = vpop.f32.mrb[3].mxu0  ;;  %v126_v15 = vsel %vm125_vm2, %v113_v10, -1e+30  ;;  %v217_v8 = vsel %vm198_vm7, %v268_v0, 0.0 }
  0xe8   :  { %128 = vmax.xlane.f32.xlu0 %v126_v15 }
  0xe9   :  { %120 = vst [vmem:[%s443_s4 + $0x8] sm:$0xff] %v116_v13  ;;  %v127_v16 = vsel %vm125_vm2, %v116_v13, -1e+30 }
  0xec   :  { %130 = vmax.xlane.f32.xlu0 %v127_v16 }
 0x102   :  { %151 = vperm.xlu0 %294, %v403_v17  }
 0x175   :  { %v129_v19 = vpop.xlane.xlu0 %128 }
 0x176   :  { %v132_v20 = vsub.f32 %v126_v15, %v129_v19 }
 0x178   :  { %v134_v21 = vmul.f32 1.442695, %v132_v20 }
 0x179   :  { %v131_v22 = vpop.xlane.xlu0 %130 }
 0x17a   :  { %301 = vpow2.f32 %v134_v21  ;;  %v133_v23 = vsub.f32 %v127_v16, %v131_v22 }
 0x17c   :  { %v136_v24 = vmul.f32 1.442695, %v133_v23 }
 0x17e   :  { %303 = vpow2.f32 %v136_v24 }
 0x181   :  { %v152_v32 = vpop.permute.xlu0 %151 }
 0x182   :  { %vm156_vm3 = vcmp.eq.s32.totalorder %v124_v7, %v152_v32 }
 0x183   :  { %v265_v36 = vsel %vm156_vm3, 1.0, %v335_v1 }
 0x184   :  { %v302_v25 = vpop.eup %301 }
 0x185   :  { %v138_v26 = vsel %vm125_vm2, %v302_v25, 0.0  ;;  %v195_v25 = vld [vmem:[#allocation2] sm:$0x1] }
 0x186   :  { %140 = vadd.xlane.f32.xlu1 %v138_v26 }
 0x188   :  { %v304_v27 = vpop.eup %303 }
 0x189   :  { %v139_v28 = vsel %vm125_vm2, %v304_v27, 0.0  ;;  %v215_v27 = vld [vmem:[#allocation3] sm:$0x1] }
 0x18a   :  { %142 = vadd.xlane.f32.xlu1 %v139_v28 }
 0x19b   :  { %154 = vperm.xlu1 %295, %v122_v29  }
 0x213   :  { %v141_v30 = vpop.xlane.xlu1 %140 }
 0x214   :  { %305 = vlog2.f32 %v141_v30 }
 0x217   :  { %v143_v31 = vpop.xlane.xlu1 %142 }
 0x218   :  { %307 = vlog2.f32 %v143_v31 }
 0x21b   :  { %v155_v34 = vpop.permute.xlu1 %154 }
 0x21c   :  { %vm157_vm4 = vcmp.eq.s32.totalorder %v124_v7, %v155_v34  ;;  %v216_v7 = vsel %vm198_vm7, %v267_v61, 0.0 }
 0x21d   :  { %v266_v42 = vsel %vm157_vm4, 1.0, %v335_v1  ;;  %v218_v10 = vadd.f32 %v217_v8, %v216_v7 }
 0x21e   :  { %v306_v33 = vpop.eup %305 }
 0x21f   :  { %v145_v35 = vmul.f32 0.6931472, %v306_v33 }
 0x221   :  { %v148_v37 = vsub.f32 %v132_v20, %v145_v35 }
 0x222   :  { %v308_v38 = vpop.eup %307 }
 0x223   :  { %v147_v39 = vmul.f32 0.6931472, %v308_v38  ;;  %v172_v40 = vsel %vm125_vm2, %v148_v37, 0.0  ;;  %v162_v41 = vmul.f32 %v265_v36, %v148_v37 }
 0x224   :  { %174 = vadd.xlane.f32.xlu1 %v172_v40 }
 0x225   :  { %v149_v43 = vsub.f32 %v133_v23, %v147_v39  ;;  %v164_v45 = vsel %vm125_vm2, %v162_v41, 0.0 }
 0x227   :  { %v173_v44 = vsel %vm125_vm2, %v149_v43, 0.0  ;;  %v163_v46 = vmul.f32 %v266_v42, %v149_v43 }
 0x228   :  { %176 = vadd.xlane.f32.xlu0 %v173_v44  ;;  %166 = vadd.xlane.f32.xlu1 %v164_v45 }
 0x229   :  { %v165_v47 = vsel %vm125_vm2, %v163_v46, 0.0 }
 0x22c   :  { %168 = vadd.xlane.f32.xlu1 %v165_v47 }
 0x2b1   :  { %v175_v48 = vpop.xlane.xlu1 %174 }
 0x2b2   :  { %v178_v49 = vsub.f32 0.0, %v175_v48 }
 0x2b4   :  { %v181_v50 = vmul.f32 0.16666667, %v178_v49 }
 0x2b5   :  { %v167_v51 = vpop.xlane.xlu1 %166  ;;  %v177_v52 = vpop.xlane.xlu0 %176 }
 0x2b6   :  { %v170_v53 = vsub.f32 0.0, %v167_v51  ;;  %v179_v54 = vsub.f32 0.0, %v177_v52  ;;  %v185_v55 = vmul.f32 0.1, %v181_v50 }
 0x2b8   :  { %v183_v56 = vmul.f32 0.9, %v170_v53  ;;  %v182_v57 = vmul.f32 0.16666667, %v179_v54 }
 0x2b9   :  { %v169_v58 = vpop.xlane.xlu1 %168 }
 0x2ba   :  { %v187_v59 = vadd.f32 %v185_v55, %v183_v56  ;;  %v171_v60 = vsub.f32 0.0, %v169_v58  ;;  %v186_v62 = vmul.f32 0.1, %v182_v57 }
 0x2bc   :  { %v184_v63 = vmul.f32 0.9, %v171_v60  ;;  %v196_v3 = vmul.f32 %v267_v61, %v187_v59 }
 0x2be   :  { %v188_v2 = vadd.f32 %v186_v62, %v184_v63  ;;  %v199_v5 = vsel %vm198_vm7, %v196_v3, 0.0 }
 0x2c0   :  { %v197_v4 = vmul.f32 %v268_v0, %v188_v2 }
 0x2c2   :  { %v200_v6 = vsel %vm198_vm7, %v197_v4, 0.0 }
 0x2c3   :  { %v201_v9 = vadd.f32 %v200_v6, %v199_v5 }
 0x2c5   :  { %202 = vadd.xlane.f32.xlu1 %v201_v9 }
 0x2c9   :  { %219 = vadd.xlane.f32.xlu1 %v218_v10 }
 0x352   :  { %v203_v11 = vpop.xlane.xlu1 %202 }
 0x353   :  { %v204_v12 = vrot.slane %v203_v11, 4 }
 0x355   :  { %v205_v13 = vadd.f32 %v204_v12, %v203_v11 }
 0x356   :  { %v220_v14 = vpop.xlane.xlu1 %219 }
 0x357   :  { %v206_v15 = vrot.slane %v205_v13, 2  ;;  %v221_v16 = vrot.slane %v220_v14, 4 }
 0x359   :  { %v222_v17 = vadd.f32 %v221_v16, %v220_v14  ;;  %v207_v18 = vadd.f32 %v206_v15, %v205_v13 }
 0x35b   :  { %v223_v19 = vrot.slane %v222_v17, 2  ;;  %v208_v20 = vrot.slane %v207_v18, 1 }
 0x35d   :  { %v224_v21 = vadd.f32 %v223_v19, %v222_v17  ;;  %v209_v22 = vadd.f32 %v208_v20, %v207_v18 }
 0x35f   :  { %286 = vpush %v209_v22  ;;  %v225_v23 = vrot.slane %v224_v21, 1 }
 0x361   :  { %v226_v24 = vadd.f32 %v225_v23, %v224_v21 }
 0x363   :  { %288 = vpush %v226_v24 }
 0x390   :  { %s287_s3 = spop %286 }
 0x391   :  { %v211_v26 = vstv %s287_s3 }
 0x392   :  { %v212_v1 = vadd.f32 %v211_v26, %v195_v25 }
 0x394   :  { %214 = vst.msk [vmem:[#allocation2] sm:$0x1] %vm25_vm8, %v212_v1  ;;  %s289_s9 = spop %288 }
 0x395   :  { %v228_v28 = vstv %s289_s9 }
 0x396   :  { %v229_v29 = vadd.f32 %v228_v28, %v215_v27 }
 0x398   :  { %230 = vst.msk [vmem:[#allocation3] sm:$0x1] %vm25_vm8, %v229_v29 }
 0x39b   :  { %v234_v33 = vld [vmem:[#allocation2] sm:$0x1] }
 0x39f   :  { %v235_v30 = vld [vmem:[#allocation3] sm:$0x1] }
 0x3a0   :  { %v236_v31 = vmax.f32 %v235_v30, 1.0 }
 0x3a2   :  { %309 = vrcp.f32 %v236_v31 }
 0x3ac   :  { %v310_v32 = vpop.eup %309 }
 0x3ad   :  { %v238_v34 = vmul.f32 %v310_v32, %v234_v33 }
 0x3af   :  { %239 = vst.msk [vmem:[#allocation4] sm:$0x1] %vm25_vm8, %v238_v34 }
 0x3b0   :  { %322 = shalt.err (!%p319_p4)
}
 0x3b1   :  { %s323_s16 = scalar_lea.hbm %s444_s5, 16 }
 0x3b2   :  { %p324_p5 = scmp.ne.s32.totalorder %s444_s5, %s323_s16  ;;  %p327_p6 = scmp.lt.u32.totalorder %s323_s16, %s444_s5 }
 0x3b4   :  { %p329_p7 = pnand %p327_p6, %p324_p5 }
 0x3b6   :  { %332 = shalt.err (!%p329_p7)
}
 0x3b7   :  { %251 = dma.vmem_to_hbm [thread:$0]  %s249_s11, 16, %s444_s5, [#allocation5]  }
 0x3b8   :  { %333 = dma.done.wait [#allocation5], 16  }
 0x3b9   :  { %334 = vsyncadd [#allocation5], 4294967280 }
 0x3ba   :  { %257 = vsyncpa [#allocation5], 1 }

</bundles_post_ra>
